<compile_context>
chip_gen: v7x
topology: tpu7x:2x2x1
jax: 0.10.0
libtpu: 0.0.40
codegen_flags: <defaults>
</compile_context>

<pallas_src>
import jax
import jax.numpy as jnp
from jax import lax
from jax.experimental import pallas as pl
from jax.experimental.pallas import tpu as pltpu

VOCAB = 1000
VPAD = 1024          # vocab padded to a multiple of 128 for lane-dense loads/stores
HIDDEN = 64
NHEAD = 4
HEAD_DIM = HIDDEN // NHEAD
FFN = 2048
NLAYERS = 2
LN_EPS = 1e-5

# Per-layer tensors, stacked along a leading NLAYERS axis in the params dict.
LAYER_KEYS = ("wq", "wk", "wv", "bq", "bk", "bv",
              "wo", "bo", "g1", "b1",
              "wf1", "bf1", "wf2", "bf2", "g2", "b2")


# ---------------------------------------------------------------------------
# Shared math helper (works on plain arrays: used inside the kernel and in the
# pure-JAX reference)
# ---------------------------------------------------------------------------
def _layernorm(x, gamma, beta, eps=LN_EPS):
    mu = jnp.mean(x, axis=-1, keepdims=True)
    xc = x - mu
    var = jnp.mean(xc * xc, axis=-1, keepdims=True)
    return xc * lax.rsqrt(var + eps) * gamma + beta


# ---------------------------------------------------------------------------
# Fused forward kernel: one grid step per encoder layer.
#   l == 0           : embedding (one-hot x table on the MXU) -> x scratch
#   every step       : one post-norm TransformerEncoderLayer on x scratch
#   l == NLAYERS - 1 : lm_head -> lane-dense padded-vocab output
# ---------------------------------------------------------------------------
def fused_forward_kernel(ids_ref, emb_ref,
                         wq_ref, wk_ref, wv_ref, bq_ref, bk_ref, bv_ref,
                         wo_ref, bo_ref, g1_ref, b1_ref,
                         wf1_ref, bf1_ref, wf2_ref, bf2_ref, g2_ref, b2_ref,
                         lm_w_ref, lm_b_ref,
                         o_ref,
                         x_ref):
    l = pl.program_id(0)
    n_layers = pl.num_programs(0)

    # --- embedding: only on the first grid step (table is VMEM-resident) ---
    @pl.when(l == 0)
    def _embed():
        ids = ids_ref[...]                                    # (T, 1) int32
        T = ids.shape[0]
        VP = emb_ref.shape[0]
        iota = lax.broadcasted_iota(jnp.int32, (T, VP), 1)    # (T, VPAD)
        onehot = (iota == ids).astype(jnp.bfloat16)
        x_ref[...] = jnp.dot(onehot, emb_ref[...],
                             preferred_element_type=jnp.float32)   # (T, H) f32

    x = x_ref[...]                                            # (T, H) f32 residual stream
    xb = x.astype(jnp.bfloat16)
    T, H = x.shape
    hd = HEAD_DIM
    scale = float(hd) ** -0.5

    # --- self attention: separate q/k/v projections (no sub-128-lane column slicing) ---
    q = jnp.dot(xb, wq_ref[0], preferred_element_type=jnp.float32) + bq_ref[0]
    k = jnp.dot(xb, wk_ref[0], preferred_element_type=jnp.float32) + bk_ref[0]
    v = jnp.dot(xb, wv_ref[0], preferred_element_type=jnp.float32) + bv_ref[0]
    q = q * scale                                             # fold 1/sqrt(hd) into q once

    # Head split via reshape + swapaxes (no stack/concatenate of 16-wide slices).
    qh = jnp.swapaxes(q.astype(jnp.bfloat16).reshape(T, NHEAD, hd), 0, 1)   # (N, T, hd)
    kh = jnp.swapaxes(k.astype(jnp.bfloat16).reshape(T, NHEAD, hd), 0, 1)
    vh = jnp.swapaxes(v.astype(jnp.bfloat16).reshape(T, NHEAD, hd), 0, 1)

    s = jnp.einsum('hqd,hkd->hqk', qh, kh,
                   preferred_element_type=jnp.float32)        # (N, T, T) f32
    m = jnp.max(s, axis=-1, keepdims=True)
    e = jnp.exp(s - m)                                        # softmax math stays f32
    inv = pl.reciprocal(jnp.sum(e, axis=-1, keepdims=True), approx=True)   # EUP slot
    p = (e * inv).astype(jnp.bfloat16)

    ctx = jnp.einsum('hqk,hkd->hqd', p, vh,
                     preferred_element_type=jnp.float32)      # (N, T, hd) f32
    attn = jnp.swapaxes(ctx, 0, 1).reshape(T, H)              # (T, H)
    attn = jnp.dot(attn.astype(jnp.bfloat16), wo_ref[0],
                   preferred_element_type=jnp.float32) + bo_ref[0]

    # --- add & norm 1 (post-norm) ---
    h1 = _layernorm(x + attn, g1_ref[0], b1_ref[0])

    # --- feed forward ---
    ff = jnp.dot(h1.astype(jnp.bfloat16), wf1_ref[0],
                 preferred_element_type=jnp.float32) + bf1_ref[0]
    ff = jnp.maximum(ff, 0.0)                                 # relu
    ff = jnp.dot(ff.astype(jnp.bfloat16), wf2_ref[0],
                 preferred_element_type=jnp.float32) + bf2_ref[0]

    # --- add & norm 2 ---
    x_out = _layernorm(h1 + ff, g2_ref[0], b2_ref[0])
    x_ref[...] = x_out                                        # carry to next layer step

    # --- lm head: only on the last grid step; lane-dense padded vocab output ---
    @pl.when(l == n_layers - 1)
    def _head():
        o_ref[...] = (jnp.dot(x_out.astype(jnp.bfloat16), lm_w_ref[...],
                              preferred_element_type=jnp.float32)
                      + lm_b_ref[...]).astype(o_ref.dtype)


# ---------------------------------------------------------------------------
# Wrapper: single pallas_call, tokens flattened to (B*S, H), grid over layers.
# ---------------------------------------------------------------------------
@jax.jit
def mock_transformer_forward(params, input_ids):
    """Returns logits of shape (B, S, VOCAB); attention_mask ignored (as in the reference)."""
    B, S = input_ids.shape
    T = B * S
    ids = input_ids.astype(jnp.int32).reshape(T, 1)

    emb = params["embedding"]     # (VPAD, H)    bf16
    lm_w = params["lm_w"]         # (H, VPAD)    bf16
    lm_b = params["lm_b"]         # (1, VPAD)    f32
    layer_arrays = [params[k] for k in LAYER_KEYS]   # each (NLAYERS, ...)

    def const_spec(shape):
        # whole array, same block every step -> fetched once by the pipeline
        return pl.BlockSpec(shape, lambda l: (0, 0))

    def layer_spec(shape):
        # one layer slab per grid step -> double-buffered behind compute
        return pl.BlockSpec((1,) + tuple(shape[1:]), lambda l: (l, 0, 0))

    logits_padded = pl.pallas_call(
        fused_forward_kernel,
        out_shape=jax.ShapeDtypeStruct((T, VPAD), jnp.float32),
        grid=(NLAYERS,),
        in_specs=[const_spec(ids.shape), const_spec(emb.shape)]
                 + [layer_spec(a.shape) for a in layer_arrays]
                 + [const_spec(lm_w.shape), const_spec(lm_b.shape)],
        out_specs=pl.BlockSpec((T, VPAD), lambda l: (0, 0)),
        scratch_shapes=[pltpu.VMEM((T, HIDDEN), jnp.float32)],     # persistent residual x
        compiler_params=pltpu.CompilerParams(
            dimension_semantics=("arbitrary",)),                    # layers are sequential
    )(ids, emb, *layer_arrays, lm_w, lm_b)

    return logits_padded[:, :VOCAB].reshape(B, S, VOCAB)


# ---------------------------------------------------------------------------
# Pure-JAX reference (same weights) for a correctness check.
# ---------------------------------------------------------------------------
def reference_forward(params, input_ids):
    B, S = input_ids.shape
    T = B * S
    ids = input_ids.reshape(T)
    x = params["embedding"].astype(jnp.float32)[ids]              # (T, H)
    H = x.shape[-1]
    hd = H // NHEAD
    for l in range(NLAYERS):
        f32 = lambda a: a.astype(jnp.float32)
        wq, wk, wv = f32(params["wq"][l]), f32(params["wk"][l]), f32(params["wv"][l])
        wo, wf1, wf2 = f32(params["wo"][l]), f32(params["wf1"][l]), f32(params["wf2"][l])
        bq, bk, bv = params["bq"][l], params["bk"][l], params["bv"][l]
        bo, bf1, bf2 = params["bo"][l], params["bf1"][l], params["bf2"][l]
        g1, b1 = params["g1"][l], params["b1"][l]
        g2, b2 = params["g2"][l], params["b2"][l]

        q = (x @ wq + bq) * (float(hd) ** -0.5)
        k = x @ wk + bk
        v = x @ wv + bv
        qh = jnp.swapaxes(q.reshape(T, NHEAD, hd), 0, 1)
        kh = jnp.swapaxes(k.reshape(T, NHEAD, hd), 0, 1)
        vh = jnp.swapaxes(v.reshape(T, NHEAD, hd), 0, 1)
        s = jnp.einsum('hqd,hkd->hqk', qh, kh)
        p = jax.nn.softmax(s, axis=-1)
        ctx = jnp.einsum('hqk,hkd->hqd', p, vh)
        attn = jnp.swapaxes(ctx, 0, 1).reshape(T, H) @ wo + bo
        h1 = _layernorm(x + attn, g1, b1)
        ff = jnp.maximum(h1 @ wf1 + bf1, 0.0) @ wf2 + bf2
        x = _layernorm(h1 + ff, g2, b2)
    logits = x @ params["lm_w"].astype(jnp.float32) + params["lm_b"]
    return logits[:, :VOCAB].reshape(B, S, VOCAB)


# ---------------------------------------------------------------------------
# Deterministic parameter init (synthetic weights; matrices bf16, per-layer stacked,
# vocab pre-padded so logits are lane-dense).
# NOTE: when loading real PyTorch weights, in_proj_weight (3H, H) must be transposed,
# split into q/k/v slabs, and the padded vocab rows/cols must remain zero.
# ---------------------------------------------------------------------------
def init_params(key, vocab=VOCAB, hidden=HIDDEN, ffn=FFN, nlayers=NLAYERS):
    std = 0.02
    keys = jax.random.split(key, 2 + 6 * nlayers)

    emb = std * jax.random.normal(keys[0], (vocab, hidden), jnp.float32)
    emb_pad = jnp.zeros((VPAD, hidden), jnp.float32).at[:vocab].set(emb)

    lm_w = std * jax.random.normal(keys[1], (hidden, vocab), jnp.float32)
    lm_w_pad = jnp.zeros((hidden, VPAD), jnp.float32).at[:, :vocab].set(lm_w)

    params = {
        "embedding": emb_pad.astype(jnp.bfloat16),   # (VPAD, H), rows >= vocab are zero
        "lm_w": lm_w_pad.astype(jnp.bfloat16),       # (H, VPAD), cols >= vocab are zero
        "lm_b": jnp.zeros((1, VPAD), jnp.float32),
    }

    per_layer = {k: [] for k in LAYER_KEYS}
    for l in range(nlayers):
        k = keys[2 + 6 * l: 2 + 6 * (l + 1)]
        per_layer["wq"].append((std * jax.random.normal(k[0], (hidden, hidden), jnp.float32)).astype(jnp.bfloat16))
        per_layer["wk"].append((std * jax.random.normal(k[1], (hidden, hidden), jnp.float32)).astype(jnp.bfloat16))
        per_layer["wv"].append((std * jax.random.normal(k[2], (hidden, hidden), jnp.float32)).astype(jnp.bfloat16))
        per_layer["wo"].append((std * jax.random.normal(k[3], (hidden, hidden), jnp.float32)).astype(jnp.bfloat16))
        per_layer["wf1"].append((std * jax.random.normal(k[4], (hidden, ffn), jnp.float32)).astype(jnp.bfloat16))
        per_layer["wf2"].append((std * jax.random.normal(k[5], (ffn, hidden), jnp.float32)).astype(jnp.bfloat16))
        per_layer["bq"].append(jnp.zeros((1, hidden), jnp.float32))
        per_layer["bk"].append(jnp.zeros((1, hidden), jnp.float32))
        per_layer["bv"].append(jnp.zeros((1, hidden), jnp.float32))
        per_layer["bo"].append(jnp.zeros((1, hidden), jnp.float32))
        per_layer["bf1"].append(jnp.zeros((1, ffn), jnp.float32))
        per_layer["bf2"].append(jnp.zeros((1, hidden), jnp.float32))
        per_layer["g1"].append(jnp.ones((1, hidden), jnp.float32))
        per_layer["b1"].append(jnp.zeros((1, hidden), jnp.float32))
        per_layer["g2"].append(jnp.ones((1, hidden), jnp.float32))
        per_layer["b2"].append(jnp.zeros((1, hidden), jnp.float32))

    for name in LAYER_KEYS:
        params[name] = jnp.stack(per_layer[name], axis=0)   # (NLAYERS, ...)
    return params


if __name__ == "__main__":
    key = jax.random.PRNGKey(0)
    pkey, ikey = jax.random.split(key)
    params = init_params(pkey)

    batch, seq = 2, 8
    input_ids = jax.random.randint(ikey, (batch, seq), 0, VOCAB, dtype=jnp.int32)

    logits = mock_transformer_forward(params, input_ids)
    logits = jax.block_until_ready(logits)

    assert logits.shape == (batch, seq, VOCAB), logits.shape
    assert bool(jnp.all(jnp.isfinite(logits)))

    # Pure-JAX reference check (loose tolerance: bf16 MXU operands + approx reciprocal).
    ref = reference_forward(params, input_ids)
    max_err = float(jnp.max(jnp.abs(logits - ref)))
    assert bool(jnp.allclose(logits, ref, atol=2e-2, rtol=2e-2)), max_err

    print("KERNEL_OK")
</pallas_src>

<mosaic_0001>
module attributes {stable_mosaic.version = 11 : i64} {
  func.func @fused_forward_kernel(%arg0: i32, %arg1: memref<16x1xi32, #tpu.memory_space<vmem>>, %arg2: memref<1024x64xbf16, #tpu.memory_space<vmem>>, %arg3: memref<1x64x64xbf16, #tpu.memory_space<vmem>>, %arg4: memref<1x64x64xbf16, #tpu.memory_space<vmem>>, %arg5: memref<1x64x64xbf16, #tpu.memory_space<vmem>>, %arg6: memref<1x1x64xf32, #tpu.memory_space<vmem>>, %arg7: memref<1x1x64xf32, #tpu.memory_space<vmem>>, %arg8: memref<1x1x64xf32, #tpu.memory_space<vmem>>, %arg9: memref<1x64x64xbf16, #tpu.memory_space<vmem>>, %arg10: memref<1x1x64xf32, #tpu.memory_space<vmem>>, %arg11: memref<1x1x64xf32, #tpu.memory_space<vmem>>, %arg12: memref<1x1x64xf32, #tpu.memory_space<vmem>>, %arg13: memref<1x64x2048xbf16, #tpu.memory_space<vmem>>, %arg14: memref<1x1x2048xf32, #tpu.memory_space<vmem>>, %arg15: memref<1x2048x64xbf16, #tpu.memory_space<vmem>>, %arg16: memref<1x1x64xf32, #tpu.memory_space<vmem>>, %arg17: memref<1x1x64xf32, #tpu.memory_space<vmem>>, %arg18: memref<1x1x64xf32, #tpu.memory_space<vmem>>, %arg19: memref<64x1024xbf16, #tpu.memory_space<vmem>>, %arg20: memref<1x1024xf32, #tpu.memory_space<vmem>>, %arg21: memref<16x1024xf32, #tpu.memory_space<vmem>>, %arg22: memref<16x64xf32, #tpu.memory_space<vmem>>) attributes {dimension_semantics = [#tpu.dimension_semantics<arbitrary>], iteration_bounds = array<i64: 2>, scalar_prefetch = 0 : i64, scratch_operands = 1 : i64, tpu.core_type = #tpu.core_type<tc>, window_params = [{pipeline_mode = #tpu.pipeline_mode<synchronous>, transform_indices = @transform_0, window_bounds = array<i64: 16, 1>}, {pipeline_mode = #tpu.pipeline_mode<synchronous>, transform_indices = @transform_1, window_bounds = array<i64: 1024, 64>}, {transform_indices = @transform_2, window_bounds = array<i64: 1, 64, 64>}, {transform_indices = @transform_3, window_bounds = array<i64: 1, 64, 64>}, {transform_indices = @transform_4, window_bounds = array<i64: 1, 64, 64>}, {transform_indices = @transform_5, window_bounds = array<i64: 1, 1, 64>}, {transform_indices = @transform_6, window_bounds = array<i64: 1, 1, 64>}, {transform_indices = @transform_7, window_bounds = array<i64: 1, 1, 64>}, {transform_indices = @transform_8, window_bounds = array<i64: 1, 64, 64>}, {transform_indices = @transform_9, window_bounds = array<i64: 1, 1, 64>}, {transform_indices = @transform_10, window_bounds = array<i64: 1, 1, 64>}, {transform_indices = @transform_11, window_bounds = array<i64: 1, 1, 64>}, {transform_indices = @transform_12, window_bounds = array<i64: 1, 64, 2048>}, {transform_indices = @transform_13, window_bounds = array<i64: 1, 1, 2048>}, {transform_indices = @transform_14, window_bounds = array<i64: 1, 2048, 64>}, {transform_indices = @transform_15, window_bounds = array<i64: 1, 1, 64>}, {transform_indices = @transform_16, window_bounds = array<i64: 1, 1, 64>}, {transform_indices = @transform_17, window_bounds = array<i64: 1, 1, 64>}, {pipeline_mode = #tpu.pipeline_mode<synchronous>, transform_indices = @transform_18, window_bounds = array<i64: 64, 1024>}, {pipeline_mode = #tpu.pipeline_mode<synchronous>, transform_indices = @transform_19, window_bounds = array<i64: 1, 1024>}, {pipeline_mode = #tpu.pipeline_mode<synchronous>, transform_indices = @transform_20, window_bounds = array<i64: 16, 1024>}]} {
    %c0_i32 = arith.constant 0 : i32
    %0 = arith.cmpi eq, %arg0, %c0_i32 : i32
    %1 = arith.extui %0 : i1 to i32
    %c0_i32_0 = arith.constant 0 : i32
    %2 = arith.cmpi ne, %1, %c0_i32_0 : i32
    scf.if %2 {
      %c0_74 = arith.constant 0 : index
      %c0_75 = arith.constant 0 : index
      %132 = vector.load %arg1[%c0_74, %c0_75] : memref<16x1xi32, #tpu.memory_space<vmem>>, vector<16x1xi32>
      %133 = tpu.iota {dimensions = array<i32: 1>} : vector<16x1024xi32>
      %134 = vector.broadcast %132 : vector<16x1xi32> to vector<16x1024xi32>
      %135 = arith.cmpi eq, %133, %134 : vector<16x1024xi32>
      %136 = arith.extui %135 : vector<16x1024xi1> to vector<16x1024xi32>
      %137 = arith.sitofp %136 : vector<16x1024xi32> to vector<16x1024xf32>
      %138 = arith.truncf %137 : vector<16x1024xf32> to vector<16x1024xbf16>
      %c0_76 = arith.constant 0 : index
      %c0_77 = arith.constant 0 : index
      %139 = vector.load %arg2[%c0_76, %c0_77] : memref<1024x64xbf16, #tpu.memory_space<vmem>>, vector<1024x64xbf16>
      %cst_78 = arith.constant dense<0.000000e+00> : vector<16x64xf32>
      %140 = tpu.matmul %138, %139, %cst_78 {dimension_numbers = #tpu.dot_dimension_numbers<[1], [0], [0], [1], [0, 0, 1, 1], [], []>} : vector<16x1024xbf16>, vector<1024x64xbf16>, vector<16x64xf32> -> vector<16x64xf32>
      %c0_79 = arith.constant 0 : index
      %c0_80 = arith.constant 0 : index
      %141 = vector.load %arg22[%c0_79, %c0_80] : memref<16x64xf32, #tpu.memory_space<vmem>>, vector<16x64xf32>
      tpu.vector_store %arg22[%c0_79, %c0_80], %140 {strides = array<i32>} : memref<16x64xf32, #tpu.memory_space<vmem>>, vector<16x64xf32>,
    } else {
    }
    %c0 = arith.constant 0 : index
    %c0_1 = arith.constant 0 : index
    %3 = vector.load %arg22[%c0, %c0_1] : memref<16x64xf32, #tpu.memory_space<vmem>>, vector<16x64xf32>
    %4 = arith.truncf %3 : vector<16x64xf32> to vector<16x64xbf16>
    %c0_2 = arith.constant 0 : index
    %c0_3 = arith.constant 0 : index
    %c0_4 = arith.constant 0 : index
    %5 = vector.load %arg3[%c0_2, %c0_3, %c0_4] : memref<1x64x64xbf16, #tpu.memory_space<vmem>>, vector<1x64x64xbf16>
    %6 = vector.shape_cast %5 : vector<1x64x64xbf16> to vector<64x64xbf16>
    %cst = arith.constant dense<0.000000e+00> : vector<16x64xf32>
    %7 = tpu.matmul %4, %6, %cst {dimension_numbers = #tpu.dot_dimension_numbers<[1], [0], [0], [1], [0, 0, 1, 1], [], []>} : vector<16x64xbf16>, vector<64x64xbf16>, vector<16x64xf32> -> vector<16x64xf32>
    %c0_5 = arith.constant 0 : index
    %c0_6 = arith.constant 0 : index
    %c0_7 = arith.constant 0 : index
    %8 = vector.load %arg6[%c0_5, %c0_6, %c0_7] : memref<1x1x64xf32, #tpu.memory_space<vmem>>, vector<1x1x64xf32>
    %9 = vector.shape_cast %8 : vector<1x1x64xf32> to vector<1x64xf32>
    %10 = vector.broadcast %9 : vector<1x64xf32> to vector<16x64xf32>
    %11 = arith.addf %7, %10 : vector<16x64xf32>
    %c0_8 = arith.constant 0 : index
    %c0_9 = arith.constant 0 : index
    %c0_10 = arith.constant 0 : index
    %12 = vector.load %arg4[%c0_8, %c0_9, %c0_10] : memref<1x64x64xbf16, #tpu.memory_space<vmem>>, vector<1x64x64xbf16>
    %13 = vector.shape_cast %12 : vector<1x64x64xbf16> to vector<64x64xbf16>
    %cst_11 = arith.constant dense<0.000000e+00> : vector<16x64xf32>
    %14 = tpu.matmul %4, %13, %cst_11 {dimension_numbers = #tpu.dot_dimension_numbers<[1], [0], [0], [1], [0, 0, 1, 1], [], []>} : vector<16x64xbf16>, vector<64x64xbf16>, vector<16x64xf32> -> vector<16x64xf32>
    %c0_12 = arith.constant 0 : index
    %c0_13 = arith.constant 0 : index
    %c0_14 = arith.constant 0 : index
    %15 = vector.load %arg7[%c0_12, %c0_13, %c0_14] : memref<1x1x64xf32, #tpu.memory_space<vmem>>, vector<1x1x64xf32>
    %16 = vector.shape_cast %15 : vector<1x1x64xf32> to vector<1x64xf32>
    %17 = vector.broadcast %16 : vector<1x64xf32> to vector<16x64xf32>
    %18 = arith.addf %14, %17 : vector<16x64xf32>
    %c0_15 = arith.constant 0 : index
    %c0_16 = arith.constant 0 : index
    %c0_17 = arith.constant 0 : index
    %19 = vector.load %arg5[%c0_15, %c0_16, %c0_17] : memref<1x64x64xbf16, #tpu.memory_space<vmem>>, vector<1x64x64xbf16>
    %20 = vector.shape_cast %19 : vector<1x64x64xbf16> to vector<64x64xbf16>
    %cst_18 = arith.constant dense<0.000000e+00> : vector<16x64xf32>
    %21 = tpu.matmul %4, %20, %cst_18 {dimension_numbers = #tpu.dot_dimension_numbers<[1], [0], [0], [1], [0, 0, 1, 1], [], []>} : vector<16x64xbf16>, vector<64x64xbf16>, vector<16x64xf32> -> vector<16x64xf32>
    %c0_19 = arith.constant 0 : index
    %c0_20 = arith.constant 0 : index
    %c0_21 = arith.constant 0 : index
    %22 = vector.load %arg8[%c0_19, %c0_20, %c0_21] : memref<1x1x64xf32, #tpu.memory_space<vmem>>, vector<1x1x64xf32>
    %23 = vector.shape_cast %22 : vector<1x1x64xf32> to vector<1x64xf32>
    %24 = vector.broadcast %23 : vector<1x64xf32> to vector<16x64xf32>
    %25 = arith.addf %21, %24 : vector<16x64xf32>
    %cst_22 = arith.constant 2.500000e-01 : f32
    %26 = vector.broadcast %cst_22 : f32 to vector<16x64xf32>
    %27 = arith.mulf %11, %26 : vector<16x64xf32>
    %28 = arith.truncf %27 : vector<16x64xf32> to vector<16x64xbf16>
    %29 = vector.shape_cast %28 : vector<16x64xbf16> to vector<16x4x16xbf16>
    %30 = tpu.transpose %29, [1, 0, 2] : vector<16x4x16xbf16> -> vector<4x16x16xbf16>
    %31 = arith.truncf %18 : vector<16x64xf32> to vector<16x64xbf16>
    %32 = vector.shape_cast %31 : vector<16x64xbf16> to vector<16x4x16xbf16>
    %33 = tpu.transpose %32, [1, 0, 2] : vector<16x4x16xbf16> -> vector<4x16x16xbf16>
    %34 = arith.truncf %25 : vector<16x64xf32> to vector<16x64xbf16>
    %35 = vector.shape_cast %34 : vector<16x64xbf16> to vector<16x4x16xbf16>
    %36 = tpu.transpose %35, [1, 0, 2] : vector<16x4x16xbf16> -> vector<4x16x16xbf16>
    "tpu.trace_start"() <{level = 10 : i32, message = "hqd,hkd->hqk"}> : () -> ()
    %cst_23 = arith.constant dense<0.000000e+00> : vector<4x16x16xf32>
    %37 = tpu.matmul %30, %33, %cst_23 {dimension_numbers = #tpu.dot_dimension_numbers<[2], [2], [1], [1], [0, 0, 0, 1, 1, 1], [0], [0]>} : vector<4x16x16xbf16>, vector<4x16x16xbf16>, vector<4x16x16xf32> -> vector<4x16x16xf32>
    "tpu.trace_stop"() : () -> ()
    %cst_24 = arith.constant dense<0xFF800000> : vector<4x16xf32>
    %38 = vector.multi_reduction <maximumf>, %37, %cst_24 [2] : vector<4x16x16xf32> to vector<4x16xf32>
    %39 = vector.shape_cast %38 : vector<4x16xf32> to vector<4x16x1xf32>
    %40 = vector.broadcast %39 : vector<4x16x1xf32> to vector<4x16x16xf32>
    %41 = arith.subf %37, %40 : vector<4x16x16xf32>
    %42 = math.exp %41 : vector<4x16x16xf32>
    %cst_25 = arith.constant dense<0.000000e+00> : vector<4x16xf32>
    %43 = vector.multi_reduction <add>, %42, %cst_25 [2] : vector<4x16x16xf32> to vector<4x16xf32>
    %44 = vector.shape_cast %43 : vector<4x16xf32> to vector<4x16x1xf32>
    %45 = tpu.reciprocal %44 {approx = true} : vector<4x16x1xf32> -> vector<4x16x1xf32>
    %46 = vector.broadcast %45 : vector<4x16x1xf32> to vector<4x16x16xf32>
    %47 = arith.mulf %42, %46 : vector<4x16x16xf32>
    %48 = arith.truncf %47 : vector<4x16x16xf32> to vector<4x16x16xbf16>
    "tpu.trace_start"() <{level = 10 : i32, message = "hqk,hkd->hqd"}> : () -> ()
    %cst_26 = arith.constant dense<0.000000e+00> : vector<4x16x16xf32>
    %49 = tpu.matmul %48, %36, %cst_26 {dimension_numbers = #tpu.dot_dimension_numbers<[2], [1], [1], [2], [0, 0, 0, 1, 1, 2], [0], [0]>} : vector<4x16x16xbf16>, vector<4x16x16xbf16>, vector<4x16x16xf32> -> vector<4x16x16xf32>
    "tpu.trace_stop"() : () -> ()
    %50 = tpu.transpose %49, [1, 0, 2] : vector<4x16x16xf32> -> vector<16x4x16xf32>
    %51 = vector.shape_cast %50 : vector<16x4x16xf32> to vector<16x64xf32>
    %52 = arith.truncf %51 : vector<16x64xf32> to vector<16x64xbf16>
    %c0_27 = arith.constant 0 : index
    %c0_28 = arith.constant 0 : index
    %c0_29 = arith.constant 0 : index
    %53 = vector.load %arg9[%c0_27, %c0_28, %c0_29] : memref<1x64x64xbf16, #tpu.memory_space<vmem>>, vector<1x64x64xbf16>
    %54 = vector.shape_cast %53 : vector<1x64x64xbf16> to vector<64x64xbf16>
    %cst_30 = arith.constant dense<0.000000e+00> : vector<16x64xf32>
    %55 = tpu.matmul %52, %54, %cst_30 {dimension_numbers = #tpu.dot_dimension_numbers<[1], [0], [0], [1], [0, 0, 1, 1], [], []>} : vector<16x64xbf16>, vector<64x64xbf16>, vector<16x64xf32> -> vector<16x64xf32>
    %c0_31 = arith.constant 0 : index
    %c0_32 = arith.constant 0 : index
    %c0_33 = arith.constant 0 : index
    %56 = vector.load %arg10[%c0_31, %c0_32, %c0_33] : memref<1x1x64xf32, #tpu.memory_space<vmem>>, vector<1x1x64xf32>
    %57 = vector.shape_cast %56 : vector<1x1x64xf32> to vector<1x64xf32>
    %58 = vector.broadcast %57 : vector<1x64xf32> to vector<16x64xf32>
    %59 = arith.addf %55, %58 : vector<16x64xf32>
    %60 = arith.addf %3, %59 : vector<16x64xf32>
    %c0_34 = arith.constant 0 : index
    %c0_35 = arith.constant 0 : index
    %c0_36 = arith.constant 0 : index
    %61 = vector.load %arg11[%c0_34, %c0_35, %c0_36] : memref<1x1x64xf32, #tpu.memory_space<vmem>>, vector<1x1x64xf32>
    %62 = vector.shape_cast %61 : vector<1x1x64xf32> to vector<1x64xf32>
    %c0_37 = arith.constant 0 : index
    %c0_38 = arith.constant 0 : index
    %c0_39 = arith.constant 0 : index
    %63 = vector.load %arg12[%c0_37, %c0_38, %c0_39] : memref<1x1x64xf32, #tpu.memory_space<vmem>>, vector<1x1x64xf32>
    %64 = vector.shape_cast %63 : vector<1x1x64xf32> to vector<1x64xf32>
    %cst_40 = arith.constant dense<0.000000e+00> : vector<16xf32>
    %65 = vector.multi_reduction <add>, %60, %cst_40 [1] : vector<16x64xf32> to vector<16xf32>
    %66 = vector.shape_cast %65 : vector<16xf32> to vector<16x1xf32>
    %cst_41 = arith.constant 6.400000e+01 : f32
    %67 = vector.broadcast %cst_41 : f32 to vector<16x1xf32>
    %68 = arith.divf %66, %67 : vector<16x1xf32>
    %69 = vector.broadcast %68 : vector<16x1xf32> to vector<16x64xf32>
    %70 = arith.subf %60, %69 : vector<16x64xf32>
    %71 = arith.mulf %70, %70 : vector<16x64xf32>
    %cst_42 = arith.constant dense<0.000000e+00> : vector<16xf32>
    %72 = vector.multi_reduction <add>, %71, %cst_42 [1] : vector<16x64xf32> to vector<16xf32>
    %73 = vector.shape_cast %72 : vector<16xf32> to vector<16x1xf32>
    %cst_43 = arith.constant 6.400000e+01 : f32
    %74 = vector.broadcast %cst_43 : f32 to vector<16x1xf32>
    %75 = arith.divf %73, %74 : vector<16x1xf32>
    %cst_44 = arith.constant 9.99999974E-6 : f32
    %76 = vector.broadcast %cst_44 : f32 to vector<16x1xf32>
    %77 = arith.addf %75, %76 : vector<16x1xf32>
    %78 = math.rsqrt %77 : vector<16x1xf32>
    %79 = vector.broadcast %78 : vector<16x1xf32> to vector<16x64xf32>
    %80 = arith.mulf %70, %79 : vector<16x64xf32>
    %81 = vector.broadcast %62 : vector<1x64xf32> to vector<16x64xf32>
    %82 = arith.mulf %80, %81 : vector<16x64xf32>
    %83 = vector.broadcast %64 : vector<1x64xf32> to vector<16x64xf32>
    %84 = arith.addf %82, %83 : vector<16x64xf32>
    %85 = arith.truncf %84 : vector<16x64xf32> to vector<16x64xbf16>
    %c0_45 = arith.constant 0 : index
    %c0_46 = arith.constant 0 : index
    %c0_47 = arith.constant 0 : index
    %86 = vector.load %arg13[%c0_45, %c0_46, %c0_47] : memref<1x64x2048xbf16, #tpu.memory_space<vmem>>, vector<1x64x2048xbf16>
    %87 = vector.shape_cast %86 : vector<1x64x2048xbf16> to vector<64x2048xbf16>
    %cst_48 = arith.constant dense<0.000000e+00> : vector<16x2048xf32>
    %88 = tpu.matmul %85, %87, %cst_48 {dimension_numbers = #tpu.dot_dimension_numbers<[1], [0], [0], [1], [0, 0, 1, 1], [], []>} : vector<16x64xbf16>, vector<64x2048xbf16>, vector<16x2048xf32> -> vector<16x2048xf32>
    %c0_49 = arith.constant 0 : index
    %c0_50 = arith.constant 0 : index
    %c0_51 = arith.constant 0 : index
    %89 = vector.load %arg14[%c0_49, %c0_50, %c0_51] : memref<1x1x2048xf32, #tpu.memory_space<vmem>>, vector<1x1x2048xf32>
    %90 = vector.shape_cast %89 : vector<1x1x2048xf32> to vector<1x2048xf32>
    %91 = vector.broadcast %90 : vector<1x2048xf32> to vector<16x2048xf32>
    %92 = arith.addf %88, %91 : vector<16x2048xf32>
    %cst_52 = arith.constant 0.000000e+00 : f32
    %93 = vector.broadcast %cst_52 : f32 to vector<16x2048xf32>
    %94 = arith.maximumf %92, %93 : vector<16x2048xf32>
    %95 = arith.truncf %94 : vector<16x2048xf32> to vector<16x2048xbf16>
    %c0_53 = arith.constant 0 : index
    %c0_54 = arith.constant 0 : index
    %c0_55 = arith.constant 0 : index
    %96 = vector.load %arg15[%c0_53, %c0_54, %c0_55] : memref<1x2048x64xbf16, #tpu.memory_space<vmem>>, vector<1x2048x64xbf16>
    %97 = vector.shape_cast %96 : vector<1x2048x64xbf16> to vector<2048x64xbf16>
    %cst_56 = arith.constant dense<0.000000e+00> : vector<16x64xf32>
    %98 = tpu.matmul %95, %97, %cst_56 {dimension_numbers = #tpu.dot_dimension_numbers<[1], [0], [0], [1], [0, 0, 1, 1], [], []>} : vector<16x2048xbf16>, vector<2048x64xbf16>, vector<16x64xf32> -> vector<16x64xf32>
    %c0_57 = arith.constant 0 : index
    %c0_58 = arith.constant 0 : index
    %c0_59 = arith.constant 0 : index
    %99 = vector.load %arg16[%c0_57, %c0_58, %c0_59] : memref<1x1x64xf32, #tpu.memory_space<vmem>>, vector<1x1x64xf32>
    %100 = vector.shape_cast %99 : vector<1x1x64xf32> to vector<1x64xf32>
    %101 = vector.broadcast %100 : vector<1x64xf32> to vector<16x64xf32>
    %102 = arith.addf %98, %101 : vector<16x64xf32>
    %103 = arith.addf %84, %102 : vector<16x64xf32>
    %c0_60 = arith.constant 0 : index
    %c0_61 = arith.constant 0 : index
    %c0_62 = arith.constant 0 : index
    %104 = vector.load %arg17[%c0_60, %c0_61, %c0_62] : memref<1x1x64xf32, #tpu.memory_space<vmem>>, vector<1x1x64xf32>
    %105 = vector.shape_cast %104 : vector<1x1x64xf32> to vector<1x64xf32>
    %c0_63 = arith.constant 0 : index
    %c0_64 = arith.constant 0 : index
    %c0_65 = arith.constant 0 : index
    %106 = vector.load %arg18[%c0_63, %c0_64, %c0_65] : memref<1x1x64xf32, #tpu.memory_space<vmem>>, vector<1x1x64xf32>
    %107 = vector.shape_cast %106 : vector<1x1x64xf32> to vector<1x64xf32>
    %cst_66 = arith.constant dense<0.000000e+00> : vector<16xf32>
    %108 = vector.multi_reduction <add>, %103, %cst_66 [1] : vector<16x64xf32> to vector<16xf32>
    %109 = vector.shape_cast %108 : vector<16xf32> to vector<16x1xf32>
    %cst_67 = arith.constant 6.400000e+01 : f32
    %110 = vector.broadcast %cst_67 : f32 to vector<16x1xf32>
    %111 = arith.divf %109, %110 : vector<16x1xf32>
    %112 = vector.broadcast %111 : vector<16x1xf32> to vector<16x64xf32>
    %113 = arith.subf %103, %112 : vector<16x64xf32>
    %114 = arith.mulf %113, %113 : vector<16x64xf32>
    %cst_68 = arith.constant dense<0.000000e+00> : vector<16xf32>
    %115 = vector.multi_reduction <add>, %114, %cst_68 [1] : vector<16x64xf32> to vector<16xf32>
    %116 = vector.shape_cast %115 : vector<16xf32> to vector<16x1xf32>
    %cst_69 = arith.constant 6.400000e+01 : f32
    %117 = vector.broadcast %cst_69 : f32 to vector<16x1xf32>
    %118 = arith.divf %116, %117 : vector<16x1xf32>
    %cst_70 = arith.constant 9.99999974E-6 : f32
    %119 = vector.broadcast %cst_70 : f32 to vector<16x1xf32>
    %120 = arith.addf %118, %119 : vector<16x1xf32>
    %121 = math.rsqrt %120 : vector<16x1xf32>
    %122 = vector.broadcast %121 : vector<16x1xf32> to vector<16x64xf32>
    %123 = arith.mulf %113, %122 : vector<16x64xf32>
    %124 = vector.broadcast %105 : vector<1x64xf32> to vector<16x64xf32>
    %125 = arith.mulf %123, %124 : vector<16x64xf32>
    %126 = vector.broadcast %107 : vector<1x64xf32> to vector<16x64xf32>
    %127 = arith.addf %125, %126 : vector<16x64xf32>
    %c0_71 = arith.constant 0 : index
    %c0_72 = arith.constant 0 : index
    %128 = vector.load %arg22[%c0_71, %c0_72] : memref<16x64xf32, #tpu.memory_space<vmem>>, vector<16x64xf32>
    tpu.vector_store %arg22[%c0_71, %c0_72], %127 {strides = array<i32>} : memref<16x64xf32, #tpu.memory_space<vmem>>, vector<16x64xf32>,
    %c1_i32 = arith.constant 1 : i32
    %129 = arith.cmpi eq, %arg0, %c1_i32 : i32
    %130 = arith.extui %129 : i1 to i32
    %c0_i32_73 = arith.constant 0 : i32
    %131 = arith.cmpi ne, %130, %c0_i32_73 : i32
    scf.if %131 {
      %132 = arith.truncf %127 : vector<16x64xf32> to vector<16x64xbf16>
      %c0_74 = arith.constant 0 : index
      %c0_75 = arith.constant 0 : index
      %133 = vector.load %arg19[%c0_74, %c0_75] : memref<64x1024xbf16, #tpu.memory_space<vmem>>, vector<64x1024xbf16>
      %cst_76 = arith.constant dense<0.000000e+00> : vector<16x1024xf32>
      %134 = tpu.matmul %132, %133, %cst_76 {dimension_numbers = #tpu.dot_dimension_numbers<[1], [0], [0], [1], [0, 0, 1, 1], [], []>} : vector<16x64xbf16>, vector<64x1024xbf16>, vector<16x1024xf32> -> vector<16x1024xf32>
      %c0_77 = arith.constant 0 : index
      %c0_78 = arith.constant 0 : index
      %135 = vector.load %arg20[%c0_77, %c0_78] : memref<1x1024xf32, #tpu.memory_space<vmem>>, vector<1x1024xf32>
      %136 = vector.broadcast %135 : vector<1x1024xf32> to vector<16x1024xf32>
      %137 = arith.addf %134, %136 : vector<16x1024xf32>
      %c0_79 = arith.constant 0 : index
      %c0_80 = arith.constant 0 : index
      %138 = vector.load %arg21[%c0_79, %c0_80] : memref<16x1024xf32, #tpu.memory_space<vmem>>, vector<16x1024xf32>
      tpu.vector_store %arg21[%c0_79, %c0_80], %137 {strides = array<i32>} : memref<16x1024xf32, #tpu.memory_space<vmem>>, vector<16x1024xf32>,
    } else {
    }
    return
  }
  func.func @transform_0(%arg0: i32) -> (i32, i32) {
    %c0_i32 = arith.constant 0 : i32
    %c0_i32_0 = arith.constant 0 : i32
    %c0_i32_1 = arith.constant 0 : i32
    return %c0_i32, %c0_i32_0 : i32, i32
  }
  func.func @transform_1(%arg0: i32) -> (i32, i32) {
    %c0_i32 = arith.constant 0 : i32
    %c0_i32_0 = arith.constant 0 : i32
    %c0_i32_1 = arith.constant 0 : i32
    return %c0_i32, %c0_i32_0 : i32, i32
  }
  func.func @transform_2(%arg0: i32) -> (i32, i32, i32) {
    %c0_i32 = arith.constant 0 : i32
    %c0_i32_0 = arith.constant 0 : i32
    %c0_i32_1 = arith.constant 0 : i32
    return %arg0, %c0_i32, %c0_i32_0 : i32, i32, i32
  }
  func.func @transform_3(%arg0: i32) -> (i32, i32, i32) {
    %c0_i32 = arith.constant 0 : i32
    %c0_i32_0 = arith.constant 0 : i32
    %c0_i32_1 = arith.constant 0 : i32
    return %arg0, %c0_i32, %c0_i32_0 : i32, i32, i32
  }
  func.func @transform_4(%arg0: i32) -> (i32, i32, i32) {
    %c0_i32 = arith.constant 0 : i32
    %c0_i32_0 = arith.constant 0 : i32
    %c0_i32_1 = arith.constant 0 : i32
    return %arg0, %c0_i32, %c0_i32_0 : i32, i32, i32
  }
  func.func @transform_5(%arg0: i32) -> (i32, i32, i32) {
    %c0_i32 = arith.constant 0 : i32
    %c0_i32_0 = arith.constant 0 : i32
    %c0_i32_1 = arith.constant 0 : i32
    return %arg0, %c0_i32, %c0_i32_0 : i32, i32, i32
  }
  func.func @transform_6(%arg0: i32) -> (i32, i32, i32) {
    %c0_i32 = arith.constant 0 : i32
    %c0_i32_0 = arith.constant 0 : i32
    %c0_i32_1 = arith.constant 0 : i32
    return %arg0, %c0_i32, %c0_i32_0 : i32, i32, i32
  }
  func.func @transform_7(%arg0: i32) -> (i32, i32, i32) {
    %c0_i32 = arith.constant 0 : i32
    %c0_i32_0 = arith.constant 0 : i32
    %c0_i32_1 = arith.constant 0 : i32
    return %arg0, %c0_i32, %c0_i32_0 : i32, i32, i32
  }
  func.func @transform_8(%arg0: i32) -> (i32, i32, i32) {
    %c0_i32 = arith.constant 0 : i32
    %c0_i32_0 = arith.constant 0 : i32
    %c0_i32_1 = arith.constant 0 : i32
    return %arg0, %c0_i32, %c0_i32_0 : i32, i32, i32
  }
  func.func @transform_9(%arg0: i32) -> (i32, i32, i32) {
    %c0_i32 = arith.constant 0 : i32
    %c0_i32_0 = arith.constant 0 : i32
    %c0_i32_1 = arith.constant 0 : i32
    return %arg0, %c0_i32, %c0_i32_0 : i32, i32, i32
  }
  func.func @transform_10(%arg0: i32) -> (i32, i32, i32) {
    %c0_i32 = arith.constant 0 : i32
    %c0_i32_0 = arith.constant 0 : i32
    %c0_i32_1 = arith.constant 0 : i32
    return %arg0, %c0_i32, %c0_i32_0 : i32, i32, i32
  }
  func.func @transform_11(%arg0: i32) -> (i32, i32, i32) {
    %c0_i32 = arith.constant 0 : i32
    %c0_i32_0 = arith.constant 0 : i32
    %c0_i32_1 = arith.constant 0 : i32
    return %arg0, %c0_i32, %c0_i32_0 : i32, i32, i32
  }
  func.func @transform_12(%arg0: i32) -> (i32, i32, i32) {
    %c0_i32 = arith.constant 0 : i32
    %c0_i32_0 = arith.constant 0 : i32
    %c0_i32_1 = arith.constant 0 : i32
    return %arg0, %c0_i32, %c0_i32_0 : i32, i32, i32
  }
  func.func @transform_13(%arg0: i32) -> (i32, i32, i32) {
    %c0_i32 = arith.constant 0 : i32
    %c0_i32_0 = arith.constant 0 : i32
    %c0_i32_1 = arith.constant 0 : i32
    return %arg0, %c0_i32, %c0_i32_0 : i32, i32, i32
  }
  func.func @transform_14(%arg0: i32) -> (i32, i32, i32) {
    %c0_i32 = arith.constant 0 : i32
    %c0_i32_0 = arith.constant 0 : i32
    %c0_i32_1 = arith.constant 0 : i32
    return %arg0, %c0_i32, %c0_i32_0 : i32, i32, i32
  }
  func.func @transform_15(%arg0: i32) -> (i32, i32, i32) {
    %c0_i32 = arith.constant 0 : i32
    %c0_i32_0 = arith.constant 0 : i32
    %c0_i32_1 = arith.constant 0 : i32
    return %arg0, %c0_i32, %c0_i32_0 : i32, i32, i32
  }
  func.func @transform_16(%arg0: i32) -> (i32, i32, i32) {
    %c0_i32 = arith.constant 0 : i32
    %c0_i32_0 = arith.constant 0 : i32
    %c0_i32_1 = arith.constant 0 : i32
    return %arg0, %c0_i32, %c0_i32_0 : i32, i32, i32
  }
  func.func @transform_17(%arg0: i32) -> (i32, i32, i32) {
    %c0_i32 = arith.constant 0 : i32
    %c0_i32_0 = arith.constant 0 : i32
    %c0_i32_1 = arith.constant 0 : i32
    return %arg0, %c0_i32, %c0_i32_0 : i32, i32, i32
  }
  func.func @transform_18(%arg0: i32) -> (i32, i32) {
    %c0_i32 = arith.constant 0 : i32
    %c0_i32_0 = arith.constant 0 : i32
    %c0_i32_1 = arith.constant 0 : i32
    return %c0_i32, %c0_i32_0 : i32, i32
  }
  func.func @transform_19(%arg0: i32) -> (i32, i32) {
    %c0_i32 = arith.constant 0 : i32
    %c0_i32_0 = arith.constant 0 : i32
    %c0_i32_1 = arith.constant 0 : i32
    return %c0_i32, %c0_i32_0 : i32, i32
  }
  func.func @transform_20(%arg0: i32) -> (i32, i32) {
    %c0_i32 = arith.constant 0 : i32
    %c0_i32_0 = arith.constant 0 : i32
    %c0_i32_1 = arith.constant 0 : i32
    return %c0_i32, %c0_i32_0 : i32, i32
  }
}

</mosaic_0001>

<bundles_post_ra>
// kernel: mock_transformer_forward.1
= control target key start
LH: loop header
LB: loop body
LE: loop exit
PB: predicated region body
PF: predicated region fallthrough
CT: control target
= control target key end

     0   :  { %s8833_s0 = inlined_call_operand.vmem [shape: s32[16,1], index: 0, kind: input, shape index: {}]   ;;  %s8834_s1 = inlined_call_operand.vmem [shape: bf16[1024,64], index: 1, kind: input, shape index: {}]   ;;  %s8835_s2 = inlined_call_operand.vmem [shape: bf16[2,64,64], index: 2, kind: input, shape index: {}]   ;;  %s8836_s3 = inlined_call_operand.vmem [shape: bf16[2,64,64], index: 3, kind: input, shape index: {}]   ;;  %s8837_s4 = inlined_call_operand.vmem [shape: bf16[2,64,64], index: 4, kind: input, shape index: {}]   ;;  %s8838_s5 = inlined_call_operand.vmem [shape: f32[2,1,64], index: 5, kind: input, shape index: {}]   ;;  %s8839_s6 = inlined_call_operand.vmem [shape: f32[2,1,64], index: 6, kind: input, shape index: {}]   ;;  %s8840_s7 = inlined_call_operand.vmem [shape: f32[2,1,64], index: 7, kind: input, shape index: {}]   ;;  %s8841_s8 = inlined_call_operand.vmem [shape: bf16[2,64,64], index: 8, kind: input, shape index: {}]   ;;  %s8842_s9 = inlined_call_operand.vmem [shape: f32[2,1,64], index: 9, kind: input, shape index: {}]   ;;  %s8843_s10 = inlined_call_operand.vmem [shape: f32[2,1,64], index: 10, kind: input, shape index: {}]   ;;  %s8844_s11 = inlined_call_operand.vmem [shape: f32[2,1,64], index: 11, kind: input, shape index: {}]   ;;  %s8845_s12 = inlined_call_operand.vmem [shape: bf16[2,64,2048], index: 12, kind: input, shape index: {}]   ;;  %s8846_s13 = inlined_call_operand.vmem [shape: f32[2,1,2048], index: 13, kind: input, shape index: {}]   ;;  %s8847_s14 = inlined_call_operand.vmem [shape: bf16[2,2048,64], index: 14, kind: input, shape index: {}]   ;;  %s8848_s15 = inlined_call_operand.vmem [shape: f32[2,1,64], index: 15, kind: input, shape index: {}]   ;;  %s8849_s16 = inlined_call_operand.vmem [shape: f32[2,1,64], index: 16, kind: input, shape index: {}]   ;;  %s8850_s17 = inlined_call_operand.vmem [shape: f32[2,1,64], index: 17, kind: input, shape index: {}]   ;;  %s8851_s18 = inlined_call_operand.vmem [shape: bf16[64,1024], index: 18, kind: input, shape index: {}]   ;;  %s8852_s19 = inlined_call_operand.vmem [shape: f32[1,1024], index: 19, kind: input, shape index: {}]   ;;  %s8853_s20 = inlined_call_operand.vmem [shape: f32[16,1024], index: 20, kind: output, shape index: {}]  }
   0x1   :  { %8862 = sst [smem:[#allocation7_spill]] %s8833_s0 }
   0x2   :  { %8863 = sst [smem:[#allocation8_spill]] %s8834_s1  ;;  %s7675_s1 = smov 0  }
   0x3   :  { %8864 = sst [smem:[#allocation9_spill]] %s8835_s2 }
   0x4   :  { %8865 = sst [smem:[#allocation10_spill]] %s8836_s3 }
   0x5   :  { %8866 = sst [smem:[#allocation11_spill]] %s8837_s4 }
   0x6   :  { %8867 = sst [smem:[#allocation12_spill]] %s8838_s5 }
   0x7   :  { %8868 = sst [smem:[#allocation13_spill]] %s8841_s8 }
   0x8   :  { %8869 = sst [smem:[#allocation14_spill]] %s8851_s18 }
   0x9   :  { %8870 = sst [smem:[#allocation15_spill]] %s8852_s19 }
   0xa   :  { %8871 = sst [smem:[#allocation16_spill]] %s8853_s20 }
   0xb LB: > { %8872 = sst [smem:[#allocation3_spill]] %s7554_s1  ;;  %s7681_s22 = sadd.s32 4294967295, %s7554_s1   ;;  %s7554_s1 = sphi %s7675_s1, %s30_s1  }
   0xc   : > { %p6455_p0 = scmp.ge.s32.totalorder %s7554_s1, 1  ;;  %p688_p1 = scmp.lt.s32.totalorder %s7554_s1, 3 }
   0xe   : > { %p689_p2 = pnand %p6455_p0, %p688_p1 }
  0x10   : > { %692 = sbr.rel (%p689_p2) target bundleno = 3372 (0xd2c), region = 100 }
  0x17   : > { %p797_p3 = scmp.lt.s32.totalorder %s7681_s22, 1  ;;  %s8874_s28 = sld [smem:[#allocation9_spill]] }
  0x18   : > { %s8876_s0 = sld [smem:[#allocation10_spill]]  ;;  %s8878_s19 = sld [smem:[#allocation11_spill]] }
  0x19   : > { %s7687_s23 = scalar_select %p797_p3, %s7681_s22, 1 }
  0x1a   : > { %s8880_s8 = sld [smem:[#allocation13_spill]]  ;;  %p6469_p4 = scmp.ne.s32.totalorder %s7681_s22, 0 }
  0x1b   : > { %s6858_s24 = sshll.u32 %s7687_s23, 5  ;;  %s6862_s3 = sshll.u32 %s7687_s23, 9  ;;  %v7556_v1 = vmov (!%p6469_p4), 0   ;;  %v865_v37 = vlaneseq (!%p6469_p4)  ;;  %v7557_v47 = vmov (!%p6469_p4), 1.0|1.0  }
  0x1c   : > { %s6466_s5 = sshll.u32 %s7687_s23, 4  ;;  %s851_s25 = scalar_lea.vmem %s8848_s15, %s7687_s23  ;;  %7282 = vset.pattern.permute.xlu0 (!%p6469_p4), %v7556_v1 }
  0x1d   : > { %s7697_s4 = scalar_lea.vmem %s8874_s28, %s6858_s24  ;;  %s7738_s28 = scalar_lea.vmem %s8845_s12, %s6862_s3  ;;  %v7873_v38 = vand.u32 (!%p6469_p4), 127, %v865_v37 }
  0x1e   : > { %8875 = sst [smem:[#allocation4_spill]] %s7697_s4  ;;  %s7702_s21 = scalar_lea.vmem %s8876_s0, %s6858_s24 }
  0x1f   : > { %8877 = sst [smem:[#allocation5_spill]] %s7702_s21  ;;  %s7707_s18 = scalar_lea.vmem %s8878_s19, %s6858_s24  ;;  %v867_v40 = vadd.s32 (!%p6469_p4), 128, %v7873_v38  ;;  %v869_v41 = vadd.s32 (!%p6469_p4), 384, %v7873_v38  ;;  %v868_v43 = vadd.s32 (!%p6469_p4), 256, %v7873_v38  ;;  %v871_v44 = vadd.s32 (!%p6469_p4), 640, %v7873_v38 }
  0x20   : > { %8879 = sst [smem:[#allocation6_spill]] %s7707_s18  ;;  %s7720_s29 = scalar_lea.vmem %s8880_s8, %s6858_s24  ;;  %v873_v46 = vadd.s32 (!%p6469_p4), 896, %v7873_v38 }
  0x21   : > { %s7744_s30 = scalar_lea.vmem %s8846_s13, %s6466_s5  ;;  %s6863_s0 = sshll.u32 %s7687_s23, 10 }
  0x22   : > { %s7750_s19 = scalar_lea.vmem %s8847_s14, %s6863_s0  ;;  %s854_s3 = scalar_lea.vmem %s8849_s16, %s7687_s23 }
  0x23   : > { %862 = sbr.rel (%p6469_p4) target bundleno = 432 (0x1b0), region = 104  ;;  %s8881_s20 = sld [smem:[#allocation7_spill]] (!%p6469_p4) }
  0x24   : > { %s8882_s2 = sld [smem:[#allocation8_spill]] (!%p6469_p4) }
  0x29   : > { %v863_v0 = vld [vmem:[%s8881_s20] sm:$0xff] (!%p6469_p4)  ;;  %v864_v2 = vld [vmem:[%s8881_s20 + $0x8] sm:$0xff] (!%p6469_p4) }
  0x2a   : > { %v7283_v3 = vld [vmem:[%s8882_s2 + $0x40] sm:$0xff]   ;;  %875 = vperm.xlu0 %7282, %v863_v0   ;;  %v7287_v7 = vld [vmem:[%s8882_s2 + $0x48] sm:$0xff]   ;;  %v7291_v11 = vld [vmem:[%s8882_s2 + $0x50] sm:$0xff]  }
  0x2b   : > { %v7284_v4 = vld [vmem:[%s8882_s2 + $0xc0] sm:$0xff]   ;;  %6864 = vmatprep.subr.bf16.mxu0 %v7283_v3  ;;  %v7288_v8 = vld [vmem:[%s8882_s2 + $0xc8] sm:$0xff]   ;;  %v7292_v12 = vld [vmem:[%s8882_s2 + $0xd0] sm:$0xff]  }
  0x2c   : > { %v7285_v5 = vld [vmem:[%s8882_s2] sm:$0xff]   ;;  %6886 = vmatprep.subr.bf16.mxu1 %v7284_v4  ;;  %v7289_v9 = vld [vmem:[%s8882_s2 + $0x8] sm:$0xff]   ;;  %v7293_v13 = vld [vmem:[%s8882_s2 + $0x10] sm:$0xff]  }
  0x2d   : > { %v7286_v6 = vld [vmem:[%s8882_s2 + $0x80] sm:$0xff]   ;;  %6865 = vmatpush3.bf16.msra.mxu0 %v7285_v5  ;;  %v7290_v10 = vld [vmem:[%s8882_s2 + $0x88] sm:$0xff]   ;;  %v7294_v14 = vld [vmem:[%s8882_s2 + $0x90] sm:$0xff]  }
  0x2e   : > { %878 = vperm.xlu0 %7282, %v864_v2   ;;  %6887 = vmatpush3.bf16.msra.mxu1 %v7286_v6  ;;  %v7295_v15 = vld [vmem:[%s8882_s2 + $0x58] sm:$0xff]   ;;  %v7299_v19 = vld [vmem:[%s8882_s2 + $0x60] sm:$0xff]   ;;  %v7303_v23 = vld [vmem:[%s8882_s2 + $0x68] sm:$0xff]  }
  0x2f   : > { %6866 = vmatprep.subr.bf16.mxu0 %v7287_v7  ;;  %6888 = vmatprep.subr.bf16.mxu1 %v7288_v8  ;;  %v7296_v16 = vld [vmem:[%s8882_s2 + $0xd8] sm:$0xff]   ;;  %v7300_v20 = vld [vmem:[%s8882_s2 + $0xe0] sm:$0xff]   ;;  %v7304_v24 = vld [vmem:[%s8882_s2 + $0xe8] sm:$0xff]  }
  0x30   : > { %v7297_v17 = vld [vmem:[%s8882_s2 + $0x18] sm:$0xff]   ;;  %v7301_v21 = vld [vmem:[%s8882_s2 + $0x20] sm:$0xff]   ;;  %v7305_v25 = vld [vmem:[%s8882_s2 + $0x28] sm:$0xff]  }
  0x31   : > { %6867 = vmatpush3.bf16.msra.mxu0 %v7289_v9  ;;  %v7298_v18 = vld [vmem:[%s8882_s2 + $0x98] sm:$0xff]   ;;  %v7302_v22 = vld [vmem:[%s8882_s2 + $0xa0] sm:$0xff]   ;;  %v7306_v26 = vld [vmem:[%s8882_s2 + $0xa8] sm:$0xff]  }
  0x32   : > { %6889 = vmatpush3.bf16.msra.mxu1 %v7290_v10  ;;  %6868 = vmatprep.subr.bf16.mxu0 %v7291_v11  ;;  %v7307_v27 = vld [vmem:[%s8882_s2 + $0x70] sm:$0xff]   ;;  %v7311_v31 = vld [vmem:[%s8882_s2 + $0x78] sm:$0xff]   ;;  %v7315_v35 = vld [vmem:[%s8882_s2 + $0x140] sm:$0xff]  }
  0x33   : > { %6890 = vmatprep.subr.bf16.mxu1 %v7292_v12  ;;  %v7308_v28 = vld [vmem:[%s8882_s2 + $0xf0] sm:$0xff]   ;;  %v7312_v32 = vld [vmem:[%s8882_s2 + $0xf8] sm:$0xff]   ;;  %v7316_v36 = vld [vmem:[%s8882_s2 + $0x1c0] sm:$0xff]  }
  0x34   : > { %v7309_v29 = vld [vmem:[%s8882_s2 + $0x30] sm:$0xff]   ;;  %v7313_v33 = vld [vmem:[%s8882_s2 + $0x38] sm:$0xff]   ;;  %v7317_v45 = vld [vmem:[%s8882_s2 + $0x100] sm:$0xff]  }
  0x35   : > { %6869 = vmatpush3.bf16.msra.mxu0 %v7293_v13  ;;  %v7310_v30 = vld [vmem:[%s8882_s2 + $0xb0] sm:$0xff]   ;;  %v7314_v34 = vld [vmem:[%s8882_s2 + $0xb8] sm:$0xff]   ;;  %v7318_v48 = vld [vmem:[%s8882_s2 + $0x180] sm:$0xff]   ;;  %v870_v13 = vadd.s32 512, %v7873_v38 }
  0x36   : > { %6891 = vmatpush3.bf16.msra.mxu1 %v7294_v14  ;;  %6870 = vmatprep.subr.bf16.mxu0 %v7295_v15  ;;  %v7319_v49 = vld [vmem:[%s8882_s2 + $0x148] sm:$0xff]   ;;  %v7323_v53 = vld [vmem:[%s8882_s2 + $0x150] sm:$0xff]   ;;  %v7327_v57 = vld [vmem:[%s8882_s2 + $0x158] sm:$0xff]   ;;  %v872_v14 = vadd.s32 768, %v7873_v38 }
  0x37   : > { %6892 = vmatprep.subr.bf16.mxu1 %v7296_v16  ;;  %v7320_v50 = vld [vmem:[%s8882_s2 + $0x1c8] sm:$0xff]   ;;  %v7324_v54 = vld [vmem:[%s8882_s2 + $0x1d0] sm:$0xff]   ;;  %v7328_v58 = vld [vmem:[%s8882_s2 + $0x1d8] sm:$0xff]  }
  0x38   : > { %v7321_v51 = vld [vmem:[%s8882_s2 + $0x108] sm:$0xff]   ;;  %v7325_v55 = vld [vmem:[%s8882_s2 + $0x110] sm:$0xff]   ;;  %v7329_v59 = vld [vmem:[%s8882_s2 + $0x118] sm:$0xff]  }
  0x39   : > { %6871 = vmatpush3.bf16.msra.mxu0 %v7297_v17  ;;  %v7322_v52 = vld [vmem:[%s8882_s2 + $0x188] sm:$0xff]   ;;  %v7326_v56 = vld [vmem:[%s8882_s2 + $0x190] sm:$0xff]   ;;  %v7330_v60 = vld [vmem:[%s8882_s2 + $0x198] sm:$0xff]  }
  0x3a   : > { %6893 = vmatpush3.bf16.msra.mxu1 %v7298_v18  ;;  %6872 = vmatprep.subr.bf16.mxu0 %v7299_v19  ;;  %v7331_v61 = vld [vmem:[%s8882_s2 + $0x160] sm:$0xff]   ;;  %v7335_v1 = vld [vmem:[%s8882_s2 + $0x168] sm:$0xff]   ;;  %v7339_v5 = vld [vmem:[%s8882_s2 + $0x170] sm:$0xff]  }
  0x3b   : > { %6894 = vmatprep.subr.bf16.mxu1 %v7300_v20  ;;  %v7332_v62 = vld [vmem:[%s8882_s2 + $0x1e0] sm:$0xff]   ;;  %v7336_v2 = vld [vmem:[%s8882_s2 + $0x1e8] sm:$0xff]   ;;  %v7340_v6 = vld [vmem:[%s8882_s2 + $0x1f0] sm:$0xff]  }
  0x3c   : > { %v7333_v63 = vld [vmem:[%s8882_s2 + $0x120] sm:$0xff]   ;;  %v7337_v3 = vld [vmem:[%s8882_s2 + $0x128] sm:$0xff]   ;;  %v7341_v7 = vld [vmem:[%s8882_s2 + $0x130] sm:$0xff]  }
  0x3d   : > { %6873 = vmatpush3.bf16.msra.mxu0 %v7301_v21  ;;  %v7334_v0 = vld [vmem:[%s8882_s2 + $0x1a0] sm:$0xff]   ;;  %v7338_v4 = vld [vmem:[%s8882_s2 + $0x1a8] sm:$0xff]   ;;  %v7342_v8 = vld [vmem:[%s8882_s2 + $0x1b0] sm:$0xff]  }
  0x3e   : > { %6895 = vmatpush3.bf16.msra.mxu1 %v7302_v22  ;;  %6874 = vmatprep.subr.bf16.mxu0 %v7303_v23  ;;  %v7343_v9 = vld [vmem:[%s8882_s2 + $0x178] sm:$0xff]  }
  0x3f   : > { %6896 = vmatprep.subr.bf16.mxu1 %v7304_v24  ;;  %v7344_v10 = vld [vmem:[%s8882_s2 + $0x1f8] sm:$0xff]  }
  0x40   : > { %v7345_v11 = vld [vmem:[%s8882_s2 + $0x138] sm:$0xff]  }
  0x41   : > { %6875 = vmatpush3.bf16.msra.mxu0 %v7305_v25  ;;  %v7346_v12 = vld [vmem:[%s8882_s2 + $0x1b8] sm:$0xff]  }
  0x42   : > { %6897 = vmatpush3.bf16.msra.mxu1 %v7306_v26  ;;  %6876 = vmatprep.subr.bf16.mxu0 %v7307_v27 }
  0x43   : > { %6898 = vmatprep.subr.bf16.mxu1 %v7308_v28 }
  0x45   : > { %6877 = vmatpush3.bf16.msra.mxu0 %v7309_v29 }
  0x46   : > { %6899 = vmatpush3.bf16.msra.mxu1 %v7310_v30  ;;  %6878 = vmatprep.subr.bf16.mxu0 %v7311_v31 }
  0x47   : > { %6900 = vmatprep.subr.bf16.mxu1 %v7312_v32 }
  0x49   : > { %6879 = vmatpush3.bf16.msra.mxu0 %v7313_v33 }
  0x4a   : > { %6901 = vmatpush3.bf16.msra.mxu1 %v7314_v34  ;;  %6908 = vmatprep.subr.bf16.mxu0 %v7315_v35 }
  0x4b   : > { %6930 = vmatprep.subr.bf16.mxu1 %v7316_v36 }
  0xa9   : > { %v7875_v39 = vpop.permute.xlu0 %875 }
  0xaa   : > { %vm881_vm0 = vcmp.eq.s32.totalorder %v867_v40, %v7875_v39  ;;  %vm883_vm5 = vcmp.eq.s32.totalorder %v869_v41, %v7875_v39  ;;  %vm880_vm8 = vcmp.eq.s32.totalorder %v7873_v38, %v7875_v39  ;;  %vm882_vm11 = vcmp.eq.s32.totalorder %v868_v43, %v7875_v39 }
  0xab   : > { %vm885_vm14 = vcmp.eq.s32.totalorder %v871_v44, %v7875_v39 }
  0xad   : > { %v7879_v42 = vpop.permute.xlu0 %878 }
  0xae   : > { %vm889_vm1 = vcmp.eq.s32.totalorder %v867_v40, %v7879_v42  ;;  %vm891_vm2 = vcmp.eq.s32.totalorder %v869_v41, %v7879_v42  ;;  %vm888_vm3 = vcmp.eq.s32.totalorder %v7873_v38, %v7879_v42  ;;  %vm890_vm6 = vcmp.eq.s32.totalorder %v868_v43, %v7879_v42 }
  0xaf   : > { %vm6550_vm4 = vmpackc.low %vm889_vm1, %vm881_vm0  ;;  %vm893_vm9 = vcmp.eq.s32.totalorder %v871_v44, %v7879_v42  ;;  %vm895_vm12 = vcmp.eq.s32.totalorder %v873_v46, %v7879_v42  ;;  %vm887_vm0 = vcmp.eq.s32.totalorder %v873_v46, %v7875_v39 }
  0xb0   : > { %6551 = vmatprep.mubr.msk.bf16.mxu0 %vm6550_vm4, %v7557_v47  ;;  %vm6554_vm7 = vmpackc.low %vm891_vm2, %vm883_vm5  ;;  %vm892_vm2 = vcmp.eq.s32.totalorder %v870_v13, %v7879_v42  ;;  %vm884_vm4 = vcmp.eq.s32.totalorder %v870_v13, %v7875_v39 }
  0xb1   : > { %6555 = vmatprep.mubr.msk.bf16.mxu1 %vm6554_vm7, %v7557_v47  ;;  %vm6552_vm10 = vmpackc.low %vm888_vm3, %vm880_vm8  ;;  %vm894_vm3 = vcmp.eq.s32.totalorder %v872_v14, %v7879_v42  ;;  %vm1612_vm8 = vcmask 523264  }
  0xb2   : > { %6553 = vmatmul.mubr.msk.bf16.vlgmr.msra.gmra.mrb[0].mxu0 %vm6552_vm10, %v7557_v47  ;;  %vm6556_vm13 = vmpackc.low %vm890_vm6, %vm882_vm11  ;;  %vm886_vm6 = vcmp.eq.s32.totalorder %v872_v14, %v7875_v39 }
  0xb3   : > { %6557 = vmatmul.mubr.msk.bf16.vlgmr.msra.gmra.mrb[0].mxu1 %vm6556_vm13, %v7557_v47  ;;  %6909 = vmatpush3.bf16.msra.mxu0 %v7317_v45  ;;  %vm6558_vm15 = vmpackc.low %vm893_vm9, %vm885_vm14 }
  0xb4   : > { %6931 = vmatpush3.bf16.msra.mxu1 %v7318_v48  ;;  %6559 = vmatprep.mubr.msk.bf16.mxu0 %vm6558_vm15, %v7557_v47  ;;  %vm6562_vm1 = vmpackc.low %vm895_vm12, %vm887_vm0 }
  0xb5   : > { %6563 = vmatprep.mubr.msk.bf16.mxu1 %vm6562_vm1, %v7557_v47  ;;  %6910 = vmatprep.subr.bf16.mxu0 %v7319_v49  ;;  %vm6560_vm5 = vmpackc.low %vm892_vm2, %vm884_vm4 }
  0xb6   : > { %6932 = vmatprep.subr.bf16.mxu1 %v7320_v50  ;;  %vm6564_vm7 = vmpackc.low %vm894_vm3, %vm886_vm6 }
  0xb7   : > { %6911 = vmatpush3.bf16.msra.mxu0 %v7321_v51 }
  0xb8   : > { %6933 = vmatpush3.bf16.msra.mxu1 %v7322_v52  ;;  %6912 = vmatprep.subr.bf16.mxu0 %v7323_v53 }
  0xb9   : > { %6934 = vmatprep.subr.bf16.mxu1 %v7324_v54 }
  0xbb   : > { %6913 = vmatpush3.bf16.msra.mxu0 %v7325_v55 }
  0xbc   : > { %6935 = vmatpush3.bf16.msra.mxu1 %v7326_v56  ;;  %6914 = vmatprep.subr.bf16.mxu0 %v7327_v57 }
  0xbd   : > { %6936 = vmatprep.subr.bf16.mxu1 %v7328_v58 }
  0xbf   : > { %6915 = vmatpush3.bf16.msra.mxu0 %v7329_v59 }
  0xc0   : > { %6937 = vmatpush3.bf16.msra.mxu1 %v7330_v60  ;;  %6916 = vmatprep.subr.bf16.mxu0 %v7331_v61 }
  0xc1   : > { %6938 = vmatprep.subr.bf16.mxu1 %v7332_v62 }
  0xc3   : > { %6917 = vmatpush3.bf16.msra.mxu0 %v7333_v63 }
  0xc4   : > { %6939 = vmatpush3.bf16.msra.mxu1 %v7334_v0  ;;  %6918 = vmatprep.subr.bf16.mxu0 %v7335_v1 }
  0xc5   : > { %6940 = vmatprep.subr.bf16.mxu1 %v7336_v2 }
  0xc7   : > { %6919 = vmatpush3.bf16.msra.mxu0 %v7337_v3 }
  0xc8   : > { %6941 = vmatpush3.bf16.msra.mxu1 %v7338_v4  ;;  %6920 = vmatprep.subr.bf16.mxu0 %v7339_v5 }
  0xc9   : > { %6942 = vmatprep.subr.bf16.mxu1 %v7340_v6 }
  0xcb   : > { %6921 = vmatpush3.bf16.msra.mxu0 %v7341_v7 }
  0xcc   : > { %6943 = vmatpush3.bf16.msra.mxu1 %v7342_v8  ;;  %6922 = vmatprep.subr.bf16.mxu0 %v7343_v9 }
  0xcd   : > { %6944 = vmatprep.subr.bf16.mxu1 %v7344_v10 }
  0xcf   : > { %6923 = vmatpush3.bf16.msra.mxu0 %v7345_v11 }
  0xd0   : > { %6945 = vmatpush3.bf16.msra.mxu1 %v7346_v12 }
  0xd2   : > { %6561 = vmatmul.mubr.msk.bf16.vlgmr.msra.gmra.mrb[4].mxu0 %vm6560_vm5, %v7557_v47 }
  0xd3   : > { %6565 = vmatmul.mubr.msk.bf16.vlgmr.msra.gmra.mrb[4].mxu1 %vm6564_vm7, %v7557_v47 }
 0x185   : > { %v6880_v15 = vpop.f32.mrb[0].mxu0 }
 0x186   : > { %v6902_v16 = vpop.f32.mrb[0].mxu1  ;;  %v6881_v17 = vpop.f32.mrb[1].mxu0 }
 0x187   : > { %v6882_v18 = vadd.f32 %v6881_v17, %v6880_v15  ;;  %v6903_v19 = vpop.f32.mrb[1].mxu1  ;;  %v6883_v20 = vpop.f32.mrb[2].mxu0 }
 0x188   : > { %v6904_v21 = vadd.f32 %v6903_v19, %v6902_v16  ;;  %v6905_v22 = vpop.f32.mrb[2].mxu1  ;;  %v6884_v23 = vpop.f32.mrb[3].mxu0 }
 0x189   : > { %v6885_v24 = vadd.f32 %v6884_v23, %v6883_v20  ;;  %v6906_v25 = vpop.f32.mrb[3].mxu1 }
 0x18a   : > { %v1524_v26 = vadd.f32 %v6904_v21, %v6882_v18  ;;  %v6907_v27 = vadd.f32 %v6906_v25, %v6905_v22 }
 0x18c   : > { %v1527_v28 = vadd.f32 %v6907_v27, %v6885_v24 }
 0x1a5   : > { %v6924_v29 = vpop.f32.mrb[4].mxu0 }
 0x1a6   : > { %v6946_v30 = vpop.f32.mrb[4].mxu1  ;;  %v6925_v31 = vpop.f32.mrb[5].mxu0 }
 0x1a7   : > { %v6926_v32 = vadd.f32 %v6925_v31, %v6924_v29  ;;  %v6947_v33 = vpop.f32.mrb[5].mxu1  ;;  %v6927_v34 = vpop.f32.mrb[6].mxu0 }
 0x1a8   : > { %v6948_v35 = vadd.f32 %v6947_v33, %v6946_v30  ;;  %v6949_v36 = vpop.f32.mrb[6].mxu1  ;;  %v6928_v37 = vpop.f32.mrb[7].mxu0 }
 0x1a9   : > { %v1565_v38 = vadd.f32 %v6926_v32, %v1524_v26  ;;  %v6929_v39 = vadd.f32 %v6928_v37, %v6927_v34  ;;  %v6950_v40 = vpop.f32.mrb[7].mxu1 }
 0x1aa   : > { %v6951_v41 = vadd.f32 %v6950_v40, %v6949_v36 }
 0x1ab   : > { %v1606_v42 = vadd.f32 %v6948_v35, %v1565_v38  ;;  %v1568_v43 = vadd.f32 %v6929_v39, %v1527_v28 }
 0x1ad   : > { %1613 = vst.msk [vmem:[#allocation2] sm:$0xff] %vm1612_vm8, %v1606_v42  ;;  %v1609_v44 = vadd.f32 %v6951_v41, %v1568_v43 }
 0x1af   : > { %1614 = vst.msk [vmem:[#allocation2 + $0x8] sm:$0xff] %vm1612_vm8, %v1609_v44 }
 0x1b0 PF: > { %s8883_s0 = sld [smem:[#allocation5_spill]]  ;;  %s8884_s1 = sld [smem:[#allocation4_spill]]  ;;  %v7558_v46 = vmov 0.0   ;;  %vm7559_vm9 = vmmov 0   ;;  %vm1657_vm10 = vcmask 523264   ;;  %v1898_v17 = vlaneseq }
 0x1b1   : > { %7176 = vmatprep.subr.bf16.mxu1 %v7558_v46  ;;  %7164 = vmatprep.subr.bf16.mxu0 %v7558_v46  ;;  %s8885_s8 = sld [smem:[#allocation12_spill]]  ;;  %s8887_s5 = scalar_lea.vmem %s8839_s6, %s7687_s23  ;;  %v7563_v15 = vmov 1983009808   ;;  %v7564_v20 = vmov 1934713408   ;;  %v7565_v23 = vmov 0  }
 0x1b2   : > { %7184 = vmatprep.mubr.msk.bf16.mxu1 %vm7559_vm9, %v7558_v46  ;;  %7172 = vmatprep.mubr.msk.bf16.mxu0 %vm7559_vm9, %v7558_v46  ;;  %v6572_v58 = vld [vmem:[%s8887_s5] ss:$0 sm:$0xff]  ;;  %s8888_s4 = sld [smem:[#allocation6_spill]]  ;;  %s7562_s21 = smov 96   ;;  %v1896_v16 = vunpack.c.l.s4 %v7563_v15  ;;  %v8064_v19 = vshrl.u32 %v1898_v17, 7  ;;  %v1927_v21 = vunpack.c.l.s4 %v7564_v20  ;;  %v8068_v24 = vpack.i.b16 %v7565_v23, %v7565_v23 }
 0x1b3   : > { %vm2678_vm11 = vcmask 130048   ;;  %s7567_s26 = smov 16   ;;  %s7568_s27 = smov 48   ;;  %vm3433_vm12 = vcmask 261120   ;;  %vm3436_vm13 = vcmask 392192  }
 0x1b4   : > { %v1615_v53 = vld [vmem:[#allocation2] sm:$0xff]  ;;  %v1897_v18 = vunpack.c.0.s8 %v1896_v16  ;;  %v1928_v31 = vunpack.c.0.s8 %v1927_v21  ;;  %s8891_s18 = scalar_lea.vmem %s8843_s10, %s7687_s23  ;;  %s8893_s5 = scalar_lea.vmem %s8850_s17, %s7687_s23 }
 0x1b5   : > { %p6819_p5 = scmp.ne.s32.totalorder %s7681_s22, 1 }
 0x1b6   : > { %v7362_v45 = vld [vmem:[%s8883_s0] sm:$0xff]   ;;  %v7364_v48 = vld [vmem:[%s8883_s0 + $0x8] sm:$0xff]   ;;  %v7366_v50 = vld [vmem:[%s8883_s0 + $0x10] sm:$0xff]   ;;  %v8071_v29 = vsub.s32 %v1897_v18, %v8064_v19  ;;  %v8077_v40 = vsub.s32 %v1928_v31, %v8064_v19 }
 0x1b7   : > { %v7363_v47 = vld [vmem:[%s8884_s1] sm:$0xff]   ;;  %7177 = vmatpush3.bf16.msra.mxu1 %v7362_v45  ;;  %v7365_v49 = vld [vmem:[%s8884_s1 + $0x8] sm:$0xff]   ;;  %v7367_v51 = vld [vmem:[%s8884_s1 + $0x10] sm:$0xff]   ;;  %s8886_s24 = scalar_lea.vmem %s8885_s8, %s7687_s23 }
 0x1b8   : > { %7165 = vmatpush3.bf16.msra.mxu0 %v7363_v47  ;;  %7178 = vmatprep.subr.bf16.mxu1 %v7558_v46  ;;  %v7368_v52 = vld [vmem:[%s8883_s0 + $0x18] sm:$0xff]   ;;  %v1616_v54 = vld [vmem:[#allocation2 + $0x8] sm:$0xff]  ;;  %v6566_v57 = vld [vmem:[%s8886_s24] ss:$0 sm:$0xff]  ;;  %s7560_s0 = smov 80   ;;  %s8889_s24 = scalar_lea.vmem %s8840_s7, %s7687_s23 }
 0x1b9   : > { %7166 = vmatprep.subr.bf16.mxu0 %v7558_v46  ;;  %v7369_v55 = vld [vmem:[%s8884_s1 + $0x18] sm:$0xff]   ;;  %v1617_v56 = vpack.c.bf16 %v1616_v54, %v1615_v53  ;;  %s7561_s1 = smov 112   ;;  %v7370_v11 = vld [vmem:[%s8888_s4] sm:$0xff]   ;;  %v7371_v12 = vld [vmem:[%s8888_s4 + $0x8] sm:$0xff]  }
 0x1ba   : > { %v7372_v13 = vld [vmem:[%s8888_s4 + $0x10] sm:$0xff]   ;;  %v7373_v14 = vld [vmem:[%s8888_s4 + $0x18] sm:$0xff]   ;;  %s8896_s4 = sld [smem:[#allocation16_spill]] (!%p6819_p5) }
 0x1bb   : > { %7179 = vmatpush3.bf16.msra.mxu1 %v7364_v48 }
 0x1bc   : > { %7167 = vmatpush3.bf16.msra.mxu0 %v7365_v49  ;;  %7180 = vmatprep.subr.bf16.mxu1 %v7558_v46 }
 0x1bd   : > { %7168 = vmatprep.subr.bf16.mxu0 %v7558_v46 }
 0x1bf   : > { %7181 = vmatpush3.bf16.msra.mxu1 %v7366_v50 }
 0x1c0   : > { %7169 = vmatpush3.bf16.msra.mxu0 %v7367_v51  ;;  %7182 = vmatprep.subr.bf16.mxu1 %v7558_v46 }
 0x1c1   : > { %7170 = vmatprep.subr.bf16.mxu0 %v7558_v46 }
 0x1c3   : > { %7183 = vmatpush3.bf16.msra.mxu1 %v7368_v52 }
 0x1c4   : > { %7171 = vmatpush3.bf16.msra.mxu0 %v7369_v55  ;;  %7200 = vmatprep.subr.bf16.mxu1 %v7558_v46 }
 0x1c5   : > { %7188 = vmatprep.subr.bf16.mxu0 %v7558_v46 }
 0x1c6   : > { %7185 = vmatmul.mubr.msk.bf16.vlgmr.msra.gmra.mrb[0].mxu1 %vm1657_vm10, %v1617_v56 }
 0x1c7   : > { %7173 = vmatmul.mubr.msk.bf16.vlgmr.msra.gmra.mrb[0].mxu0 %vm1657_vm10, %v1617_v56  ;;  %7202 = vmatprep.mubr.msk.bf16.mxu1 %vm7559_vm9, %v7558_v46 }
 0x1c8   : > { %7196 = vmatprep.mubr.msk.bf16.mxu0 %vm7559_vm9, %v7558_v46  ;;  %7189 = vmatpush3.bf16.msra.mxu0 %v7370_v11 }
 0x1c9   : > { %7190 = vmatprep.subr.bf16.mxu0 %v7558_v46 }
 0x1cc   : > { %7191 = vmatpush3.bf16.msra.mxu0 %v7371_v12 }
 0x1cd   : > { %7192 = vmatprep.subr.bf16.mxu0 %v7558_v46 }
 0x1d0   : > { %7193 = vmatpush3.bf16.msra.mxu0 %v7372_v13 }
 0x1d1   : > { %7194 = vmatprep.subr.bf16.mxu0 %v7558_v46 }
 0x1d4   : > { %7195 = vmatpush3.bf16.msra.mxu0 %v7373_v14 }
 0x1d5   : > { %7224 = vmatprep.subr.bf16.mxu0 %v7558_v46 }
 0x1d7   : > { %7197 = vmatmul.mubr.msk.bf16.vlgmr.msra.gmra.mrb[4].mxu0 %vm1657_vm10, %v1617_v56 }
 0x1d8   : > { %7226 = vmatprep.mubr.msk.bf16.mxu0 %vm7559_vm9, %v7558_v46 }
 0x299   : > { %v1775_v59 = vpop.f32.mrb[0].mxu1 }
 0x29a   : > { %v7186_v60 = vpop.f32.mrb[1].mxu1  ;;  %v1695_v61 = vpop.f32.mrb[0].mxu0  ;;  %v1776_v1 = vadd.f32 %v6572_v58, %v1775_v59 }
 0x29b   : > { %v1696_v62 = vadd.f32 %v6566_v57, %v1695_v61  ;;  %v1778_v63 = vpop.f32.mrb[2].mxu1  ;;  %v7174_v0 = vpop.f32.mrb[1].mxu0 }
 0x29c   : > { %v1779_v2 = vadd.f32 %v6572_v58, %v1778_v63  ;;  %v7187_v3 = vpop.f32.mrb[3].mxu1  ;;  %v1698_v4 = vpop.f32.mrb[2].mxu0 }
 0x29d   : > { %v1862_v5 = vmul.f32 0.25, %v1696_v62  ;;  %v1699_v6 = vadd.f32 %v6566_v57, %v1698_v4  ;;  %v7175_v7 = vpop.f32.mrb[3].mxu0 }
 0x29e   : > { %v2138_v8 = vpack.c.bf16 %v1779_v2, %v1776_v1 }
 0x29f   : > { %v1863_v9 = vmul.f32 0.25, %v1699_v6 }
 0x2a0   : > { %2144 = vrot.lane.b32.xlu1 %v2138_v8, %s7560_s0  ;;  %2140 = vrot.lane.b32.xlu0 %v2138_v8, %s7561_s1  ;;  %v2150_v27 = vshrl.u32 %v2138_v8, 16 }
 0x2a1   : > { %v8044_v10 = vpack.c.bf16 %v1863_v9, %v1862_v5 }
 0x2a3   : > { %v1876_v45 = vshrl.u32 %v8044_v10, 16 }
 0x2a4   : > { %2142 = vrot.lane.b32.xlu0 %v2138_v8, %s7562_s21  ;;  %1866 = vrot.lane.b32.xlu1 %v8044_v10, %s7561_s1 }
 0x2a8   : > { %1868 = vrot.lane.b32.xlu0 %v8044_v10, %s7562_s21  ;;  %1870 = vrot.lane.b32.xlu1 %v8044_v10, %s7560_s0 }
 0x312   : > { %v2145_v22 = vpop.permute.xlu1 %2144  ;;  %v2141_v25 = vpop.permute.xlu0 %2140 }
 0x313   : > { %v2148_v26 = vpack.i.b16 %v2141_v25, %v2138_v8  ;;  %v2151_v28 = vshrl.u32 %v2141_v25, 16  ;;  %v2159_v36 = vshrl.u32 %v2145_v22, 16 }
 0x315   : > { %v2152_v30 = vpack.i.b16 %v2151_v28, %v2150_v27  ;;  %v2162_v32 = vcombine.high %v2148_v26, %v8068_v24  ;;  %v2169_v39 = vrot.slane %v2148_v26, %v8071_v29 }
 0x316   : > { %v2143_v33 = vpop.permute.xlu0 %2142  ;;  %v1867_v35 = vpop.permute.xlu1 %1866 }
 0x317   : > { %v2156_v34 = vpack.i.b16 %v2145_v22, %v2143_v33  ;;  %v2228_v37 = vcombine.high %v2152_v30, %v8068_v24  ;;  %v2158_v38 = vshrl.u32 %v2143_v33, 16  ;;  %v2176_v43 = vrot.slane %v2162_v32, %v8071_v29 }
 0x318   : > { %v1877_v47 = vshrl.u32 %v1867_v35, 16  ;;  %v2235_v48 = vrot.slane %v2152_v30, %v8071_v29  ;;  %v1874_v55 = vpack.i.b16 %v1867_v35, %v8044_v10 }
 0x319   : > { %v2177_v41 = vcombine.high %v2156_v34, %v8068_v24  ;;  %v2184_v42 = vrot.slane %v2156_v34, %v8071_v29  ;;  %v2160_v44 = vpack.i.b16 %v2159_v36, %v2158_v38  ;;  %v2242_v52 = vrot.slane %v2228_v37, %v8071_v29 }
 0x31a   : > { %v1878_v63 = vpack.i.b16 %v1877_v47, %v1876_v45  ;;  %v1869_v0 = vpop.permute.xlu0 %1868  ;;  %v1871_v9 = vpop.permute.xlu1 %1870  ;;  %v1894_v13 = vcombine.high %v1874_v55, %v8068_v24  ;;  %v1901_v14 = vrot.slane %v1874_v55, %v8071_v29 }
 0x31b   : > { %v2191_v49 = vrot.slane %v2177_v41, %v8071_v29  ;;  %v2192_v50 = vcombine.low %v2169_v39, %v2184_v42  ;;  %v2193_v51 = vcombine.high %v2169_v39, %v2184_v42  ;;  %v2243_v53 = vcombine.high %v2160_v44, %v8068_v24 }
 0x31c   : > { %v2250_v54 = vrot.slane %v2160_v44, %v8071_v29  ;;  %v1884_v12 = vshrl.u32 %v1869_v0, 16  ;;  %v1960_v15 = vcombine.high %v1878_v63, %v8068_v24  ;;  %v1882_v18 = vpack.i.b16 %v1871_v9, %v1869_v0 }
 0x31d   : > { %v2200_v56 = vrot.slane %v2192_v50, %v8077_v40  ;;  %v2207_v57 = vrot.slane %v2193_v51, %v8077_v40  ;;  %v2208_v58 = vcombine.low %v2176_v43, %v2191_v49  ;;  %v2209_v59 = vcombine.high %v2176_v43, %v2191_v49 }
 0x31e   : > { %v2257_v60 = vrot.slane %v2243_v53, %v8071_v29  ;;  %v2258_v61 = vcombine.low %v2235_v48, %v2250_v54  ;;  %v2259_v62 = vcombine.high %v2235_v48, %v2250_v54  ;;  %v1885_v20 = vshrl.u32 %v1871_v9, 16 }
 0x31f   : > { %v2216_v1 = vrot.slane %v2208_v58, %v8077_v40  ;;  %v2223_v2 = vrot.slane %v2209_v59, %v8077_v40  ;;  %v2294_v3 = vcombine.low %v2200_v56, %v2207_v57  ;;  %v6588_v4 = vcombine.high %v2200_v56, %v2207_v57 }
 0x320   : > { %v2266_v5 = vrot.slane %v2258_v61, %v8077_v40  ;;  %v2273_v6 = vrot.slane %v2259_v62, %v8077_v40  ;;  %v2274_v7 = vcombine.low %v2242_v52, %v2257_v60  ;;  %v2275_v8 = vcombine.high %v2242_v52, %v2257_v60 }
 0x321   : > { %v2310_v10 = vcombine.low %v2216_v1, %v2223_v2  ;;  %v6589_v11 = vcombine.high %v2216_v1, %v2223_v2  ;;  %v2301_v16 = vrot.slane %v2294_v3, %v8071_v29  ;;  %v2309_v17 = vrot.slane %v6588_v4, %v8071_v29 }
 0x322   : > { %v2282_v21 = vrot.slane %v2274_v7, %v8077_v40  ;;  %v2289_v22 = vrot.slane %v2275_v8, %v8077_v40  ;;  %v2344_v25 = vcombine.low %v2266_v5, %v2273_v6  ;;  %v1886_v27 = vpack.i.b16 %v1885_v20, %v1884_v12 }
 0x323   : > { %v2317_v26 = vrot.slane %v2310_v10, %v8071_v29  ;;  %v1909_v28 = vcombine.high %v1882_v18, %v8068_v24  ;;  %v1916_v30 = vrot.slane %v1882_v18, %v8071_v29  ;;  %v2325_v31 = vrot.slane %v6589_v11, %v8071_v29 }
 0x324   : > { %v6590_v32 = vcombine.high %v2266_v5, %v2273_v6  ;;  %v1908_v33 = vrot.slane %v1894_v13, %v8071_v29  ;;  %v1967_v34 = vrot.slane %v1878_v63, %v8071_v29  ;;  %v1974_v35 = vrot.slane %v1960_v15, %v8071_v29 }
 0x325   : > { %v1923_v36 = vrot.slane %v1909_v28, %v8071_v29  ;;  %v1924_v37 = vcombine.low %v1901_v14, %v1916_v30  ;;  %v1925_v38 = vcombine.high %v1901_v14, %v1916_v30  ;;  %v1975_v39 = vcombine.high %v1886_v27, %v8068_v24 }
 0x326   : > { %v2360_v41 = vcombine.low %v2282_v21, %v2289_v22  ;;  %v6591_v42 = vcombine.high %v2282_v21, %v2289_v22  ;;  %v1982_v43 = vrot.slane %v1886_v27, %v8071_v29  ;;  %v2326_v44 = vcombine.low %v2301_v16, %v2309_v17 }
 0x327   : > { %v1940_v45 = vcombine.low %v1908_v33, %v1923_v36  ;;  %v1941_v47 = vcombine.high %v1908_v33, %v1923_v36  ;;  %v2334_v48 = vcombine.low %v2317_v26, %v2325_v31  ;;  %v2351_v49 = vrot.slane %v2344_v25, %v8071_v29 }
 0x328   : > { %v1989_v50 = vrot.slane %v1975_v39, %v8071_v29  ;;  %v1990_v51 = vcombine.low %v1967_v34, %v1982_v43  ;;  %v1991_v52 = vcombine.high %v1967_v34, %v1982_v43  ;;  %v2359_v53 = vrot.slane %v6590_v32, %v8071_v29 }
 0x329   : > { %v1932_v54 = vrot.slane %v1924_v37, %v8077_v40  ;;  %v1939_v55 = vrot.slane %v1925_v38, %v8077_v40  ;;  %v1948_v56 = vrot.slane %v1940_v45, %v8077_v40  ;;  %v1955_v57 = vrot.slane %v1941_v47, %v8077_v40 }
 0x32a   : > { %v1998_v58 = vrot.slane %v1990_v51, %v8077_v40  ;;  %v2005_v59 = vrot.slane %v1991_v52, %v8077_v40  ;;  %v2006_v60 = vcombine.low %v1974_v35, %v1989_v50  ;;  %v2007_v61 = vcombine.high %v1974_v35, %v1989_v50 }
 0x32b   : > { %v2042_v62 = vcombine.low %v1948_v56, %v1955_v57  ;;  %v6585_v63 = vcombine.high %v1948_v56, %v1955_v57  ;;  %v2367_v0 = vrot.slane %v2360_v41, %v8071_v29  ;;  %v2375_v1 = vrot.slane %v6591_v42, %v8071_v29 }
 0x32c   : > { %v2014_v2 = vrot.slane %v2006_v60, %v8077_v40  ;;  %v2021_v3 = vrot.slane %v2007_v61, %v8077_v40  ;;  %v2076_v4 = vcombine.low %v1998_v58, %v2005_v59  ;;  %v6586_v5 = vcombine.high %v1998_v58, %v2005_v59 }
 0x32d   : > { %v2026_v6 = vcombine.low %v1932_v54, %v1939_v55  ;;  %v6584_v7 = vcombine.high %v1932_v54, %v1939_v55  ;;  %v2376_v8 = vcombine.low %v2351_v49, %v2359_v53  ;;  %v2049_v9 = vrot.slane %v2042_v62, %v8071_v29 }
 0x32e   : > { %v2092_v10 = vcombine.low %v2014_v2, %v2021_v3  ;;  %v6587_v11 = vcombine.high %v2014_v2, %v2021_v3  ;;  %v2341_v12 = vrot.slane %v2334_v48, %v8077_v40  ;;  %v2057_v13 = vrot.slane %v6585_v63, %v8071_v29  ;;  %v6578_v2 = vld [vmem:[%s8889_s24] ss:$0 sm:$0xff]  ;;  %v1855_v3 = vpop.f32.mrb[4].mxu0 }
 0x32f   : > { %v2083_v14 = vrot.slane %v2076_v4, %v8071_v29  ;;  %v2091_v15 = vrot.slane %v6586_v5, %v8071_v29  ;;  %v2384_v16 = vcombine.low %v2367_v0, %v2375_v1  ;;  %v2333_v20 = vrot.slane %v2326_v44, %v8077_v40  ;;  %v7198_v5 = vpop.f32.mrb[5].mxu0 }
 0x330   : > { %v2099_v17 = vrot.slane %v2092_v10, %v8071_v29  ;;  %v2107_v18 = vrot.slane %v6587_v11, %v8071_v29  ;;  %v2033_v21 = vrot.slane %v2026_v6, %v8071_v29  ;;  %v2041_v22 = vrot.slane %v6584_v7, %v8071_v29  ;;  %v1858_v6 = vpop.f32.mrb[6].mxu0 }
 0x331   : > { %v2383_v25 = vrot.slane %v2376_v8, %v8077_v40  ;;  %v2391_v26 = vrot.slane %v2384_v16, %v8077_v40  ;;  %v2066_v28 = vcombine.low %v2049_v9, %v2057_v13  ;;  %v2108_v30 = vcombine.low %v2083_v14, %v2091_v15  ;;  %v7199_v8 = vpop.f32.mrb[7].mxu0 }
 0x332   : > { %v2116_v27 = vcombine.low %v2099_v17, %v2107_v18  ;;  %v2342_v31 = vcombine.low %v2333_v20, %v2341_v12  ;;  %v2058_v33 = vcombine.low %v2033_v21, %v2041_v22  ;;  %v2343_v51 = vcombine.high %v2333_v20, %v2341_v12 }
 0x333   : > { %v2392_v32 = vcombine.low %v2383_v25, %v2391_v26  ;;  %v2073_v37 = vrot.slane %v2066_v28, %v8077_v40  ;;  %v2115_v38 = vrot.slane %v2108_v30, %v8077_v40  ;;  %v2393_v49 = vcombine.high %v2383_v25, %v2391_v26 }
 0x334   : > { %v2123_v35 = vrot.slane %v2116_v27, %v8077_v40  ;;  %v2065_v41 = vrot.slane %v2058_v33, %v8077_v40  ;;  %v2397_v43 = vshrl.u32 %v2342_v31, 16  ;;  %v2403_v58 = vshrl.u32 %v2343_v51, 16 }
 0x335   : > { %v2396_v34 = vpack.i.b16 %v2392_v32, %v2342_v31  ;;  %v2398_v39 = vshrl.u32 %v2392_v32, 16  ;;  %v2402_v53 = vpack.i.b16 %v2393_v49, %v2343_v51  ;;  %v2404_v56 = vshrl.u32 %v2393_v49, 16 }
 0x336   : > { %v2124_v42 = vcombine.low %v2115_v38, %v2123_v35  ;;  %v2074_v44 = vcombine.low %v2065_v41, %v2073_v37  ;;  %v2125_v57 = vcombine.high %v2115_v38, %v2123_v35  ;;  %v2075_v59 = vcombine.high %v2065_v41, %v2073_v37 }
 0x337   : > { %v2683_v36 = vsel %vm2678_vm11, %v2396_v34, 0  ;;  %v2399_v45 = vpack.i.b16 %v2398_v39, %v2397_v43  ;;  %v2777_v55 = vsel %vm2678_vm11, %v2402_v53, 0  ;;  %v2405_v60 = vpack.i.b16 %v2404_v56, %v2403_v58 }
 0x338   : > { %7201 = vmatpush3.bf16.xpose.msra.mxu1 %v2683_v36  ;;  %v2128_v47 = vpack.i.b16 %v2124_v42, %v2074_v44  ;;  %v2130_v50 = vshrl.u32 %v2124_v42, 16  ;;  %v2129_v52 = vshrl.u32 %v2074_v44, 16  ;;  %v2134_v61 = vpack.i.b16 %v2125_v57, %v2075_v59 }
 0x339   : > { %7206 = vmatprep.subr.bf16.mxu1 %v7558_v46  ;;  %v2730_v48 = vsel %vm2678_vm11, %v2399_v45, 0  ;;  %v2824_v62 = vsel %vm2678_vm11, %v2405_v60, 0  ;;  %v2136_v63 = vshrl.u32 %v2125_v57, 16  ;;  %v2135_v0 = vshrl.u32 %v2075_v59, 16 }
 0x33a   : > { %v2131_v54 = vpack.i.b16 %v2130_v50, %v2129_v52  ;;  %v1856_v4 = vadd.f32 %v6578_v2, %v1855_v3  ;;  %v1859_v7 = vadd.f32 %v6578_v2, %v1858_v6 }
 0x33b   : > { %v2137_v1 = vpack.i.b16 %v2136_v63, %v2135_v0 }
 0x33c   : > { %v8167_v9 = vpack.c.bf16 %v1859_v7, %v1856_v4 }
 0x33e   : > { %v2418_v7 = vshrl.u32 %v8167_v9, 16 }
 0x33f   : > { %7203 = vmatmul.mubr.msk.bf16.vlgmr.msra.gmra.mrb[4].mxu1 %vm2678_vm11, %v2128_v47 }
 0x340   : > { %7207 = vmatpush3.bf16.xpose.msra.mxu1 %v2730_v48  ;;  %7208 = vmatprep.mubr.msk.bf16.mxu1 %vm7559_vm9, %v7558_v46 }
 0x341   : > { %7212 = vmatprep.subr.bf16.mxu1 %v7558_v46 }
 0x347   : > { %7209 = vmatmul.mubr.msk.bf16.vlgmr.msra.gmra.mrb[8].mxu1 %vm2678_vm11, %v2131_v54 }
 0x348   : > { %7213 = vmatpush3.bf16.xpose.msra.mxu1 %v2777_v55  ;;  %7214 = vmatprep.mubr.msk.bf16.mxu1 %vm7559_vm9, %v7558_v46 }
 0x349   : > { %7218 = vmatprep.subr.bf16.mxu1 %v7558_v46 }
 0x34f   : > { %7215 = vmatmul.mubr.msk.bf16.vlgmr.msra.gmra.mrb[12].mxu1 %vm2678_vm11, %v2134_v61 }
 0x350   : > { %7219 = vmatpush3.bf16.xpose.msra.mxu1 %v2824_v62  ;;  %7220 = vmatprep.mubr.msk.bf16.mxu1 %vm7559_vm9, %v7558_v46 }
 0x351   : > { %7230 = vmatprep.subr.bf16.mxu1 %v7558_v46 }
 0x357   : > { %7221 = vmatmul.mubr.msk.bf16.vlgmr.msra.gmra.mrb[16].mxu1 %vm2678_vm11, %v2137_v1 }
 0x358   : > { %7232 = vmatprep.mubr.msk.bf16.mxu1 %vm7559_vm9, %v7558_v46 }
 0x412   : > { %v2719_v10 = vpop.f32.mrb[4].mxu1 }
 0x413   : > { %v7204_v11 = vpop.f32.mrb[5].mxu1  ;;  %v2867_v12 = vsel %vm2678_vm11, %v2719_v10, -inf }
 0x414   : > { %2868 = vmax.xlane.f32.xlu0 %v2867_v12  ;;  %v2722_v13 = vpop.f32.mrb[6].mxu1 }
 0x415   : > { %v7205_v14 = vpop.f32.mrb[7].mxu1  ;;  %v2870_v15 = vsel %vm2678_vm11, %v2722_v13, -inf }
 0x416   : > { %2871 = vmax.xlane.f32.xlu1 %v2870_v15 }
 0x41a   : > { %v2766_v16 = vpop.f32.mrb[8].mxu1 }
 0x41b   : > { %v7210_v17 = vpop.f32.mrb[9].mxu1  ;;  %v2873_v18 = vsel %vm2678_vm11, %v2766_v16, -inf }
 0x41c   : > { %2874 = vmax.xlane.f32.xlu0 %v2873_v18  ;;  %v2769_v20 = vpop.f32.mrb[10].mxu1 }
 0x41d   : > { %v7211_v21 = vpop.f32.mrb[11].mxu1  ;;  %v2876_v22 = vsel %vm2678_vm11, %v2769_v20, -inf }
 0x420   : > { %2877 = vmax.xlane.f32.xlu0 %v2876_v22 }
 0x422   : > { %v2813_v25 = vpop.f32.mrb[12].mxu1 }
 0x423   : > { %v7216_v26 = vpop.f32.mrb[13].mxu1  ;;  %v2879_v27 = vsel %vm2678_vm11, %v2813_v25, -inf }
 0x424   : > { %2880 = vmax.xlane.f32.xlu1 %v2879_v27  ;;  %v2816_v28 = vpop.f32.mrb[14].mxu1 }
 0x425   : > { %v7217_v30 = vpop.f32.mrb[15].mxu1  ;;  %v2882_v31 = vsel %vm2678_vm11, %v2816_v28, -inf }
 0x426   : > { %2883 = vmax.xlane.f32.xlu0 %v2882_v31 }
 0x42a   : > { %v2860_v32 = vpop.f32.mrb[16].mxu1 }
 0x42b   : > { %v7222_v33 = vpop.f32.mrb[17].mxu1  ;;  %v2885_v34 = vsel %vm2678_vm11, %v2860_v32, -inf }
 0x42c   : > { %2886 = vmax.xlane.f32.xlu1 %v2885_v34  ;;  %v2863_v35 = vpop.f32.mrb[18].mxu1 }
 0x42d   : > { %v7223_v36 = vpop.f32.mrb[19].mxu1  ;;  %v2888_v37 = vsel %vm2678_vm11, %v2863_v35, -inf }
 0x42e   : > { %2889 = vmax.xlane.f32.xlu0 %v2888_v37 }
 0x43d   : > { %2408 = vrot.lane.b32.xlu1 %v8167_v9, %s7561_s1 }
 0x441   : > { %2412 = vrot.lane.b32.xlu1 %v8167_v9, %s7560_s0  ;;  %s8890_s0 = scalar_lea.vmem %s8842_s9, %s7687_s23 }
 0x444   : > { %2410 = vrot.lane.b32.xlu0 %v8167_v9, %s7562_s21 }
 0x4a1   : > { %v2869_v38 = vpop.xlane.xlu0 %2868 }
 0x4a2   : > { %v2891_v39 = vsub.f32 %v2719_v10, %v2869_v38 }
 0x4a3   : > { %v2872_v41 = vpop.xlane.xlu1 %2871 }
 0x4a4   : > { %v2899_v42 = vmul.f32 1.442695, %v2891_v39  ;;  %v2892_v43 = vsub.f32 %v2722_v13, %v2872_v41 }
 0x4a6   : > { %7506 = vpow2.f32 %v2899_v42  ;;  %v2901_v44 = vmul.f32 1.442695, %v2892_v43 }
 0x4a8   : > { %7508 = vpow2.f32 %v2901_v44 }
 0x4a9   : > { %v2875_v45 = vpop.xlane.xlu0 %2874 }
 0x4aa   : > { %v2893_v47 = vsub.f32 %v2766_v16, %v2875_v45 }
 0x4ac   : > { %v2903_v48 = vmul.f32 1.442695, %v2893_v47 }
 0x4ad   : > { %v2878_v49 = vpop.xlane.xlu0 %2877 }
 0x4ae   : > { %7510 = vpow2.f32 %v2903_v48  ;;  %v2894_v50 = vsub.f32 %v2769_v20, %v2878_v49 }
 0x4b0   : > { %v8183_v51 = vpop.eup %7506  ;;  %v2905_v52 = vmul.f32 1.442695, %v2894_v50 }
 0x4b1   : > { %v2881_v53 = vpop.xlane.xlu1 %2880  ;;  %v2915_v54 = vsel %vm2678_vm11, %v8183_v51, 0.0 }
 0x4b2   : > { %v8187_v55 = vpop.eup %7508  ;;  %7512 = vpow2.f32 %v2905_v52  ;;  %v2895_v56 = vsub.f32 %v2813_v25, %v2881_v53  ;;  %2916 = vadd.xlane.f32.xlu1 %v2915_v54 }
 0x4b3   : > { %v2884_v57 = vpop.xlane.xlu0 %2883  ;;  %v2918_v58 = vsel %vm2678_vm11, %v8187_v55, 0.0 }
 0x4b4   : > { %v2907_v59 = vmul.f32 1.442695, %v2895_v56  ;;  %v2896_v60 = vsub.f32 %v2816_v28, %v2884_v57  ;;  %2919 = vadd.xlane.f32.xlu0 %v2918_v58 }
 0x4b6   : > { %7514 = vpow2.f32 %v2907_v59  ;;  %v2909_v61 = vmul.f32 1.442695, %v2896_v60 }
 0x4b8   : > { %v8191_v62 = vpop.eup %7510  ;;  %7516 = vpow2.f32 %v2909_v61 }
 0x4b9   : > { %v2887_v63 = vpop.xlane.xlu1 %2886  ;;  %v2921_v0 = vsel %vm2678_vm11, %v8191_v62, 0.0 }
 0x4ba   : > { %v2897_v1 = vsub.f32 %v2860_v32, %v2887_v63  ;;  %2922 = vadd.xlane.f32.xlu0 %v2921_v0 }
 0x4bb   : > { %v2890_v2 = vpop.xlane.xlu0 %2889 }
 0x4bc   : > { %v8195_v3 = vpop.eup %7512  ;;  %v2911_v4 = vmul.f32 1.442695, %v2897_v1  ;;  %v2898_v5 = vsub.f32 %v2863_v35, %v2890_v2 }
 0x4bd   : > { %v2409_v6 = vpop.permute.xlu1 %2408  ;;  %v2924_v8 = vsel %vm2678_vm11, %v8195_v3, 0.0 }
 0x4be   : > { %7518 = vpow2.f32 %v2911_v4  ;;  %v2913_v10 = vmul.f32 1.442695, %v2898_v5  ;;  %v2416_v11 = vpack.i.b16 %v2409_v6, %v8167_v9  ;;  %v2419_v12 = vshrl.u32 %v2409_v6, 16  ;;  %2925 = vadd.xlane.f32.xlu1 %v2924_v8 }
 0x4bf   : > { %v2411_v13 = vpop.permute.xlu0 %2410 }
 0x4c0   : > { %v8201_v14 = vpop.eup %7514  ;;  %v2420_v15 = vpack.i.b16 %v2419_v12, %v2418_v7  ;;  %7520 = vpow2.f32 %v2913_v10  ;;  %v2426_v16 = vshrl.u32 %v2411_v13, 16  ;;  %v2430_v21 = vcombine.high %v2416_v11, %v8068_v24 }
 0x4c1   : > { %v2413_v17 = vpop.permute.xlu1 %2412  ;;  %v2927_v18 = vsel %vm2678_vm11, %v8201_v14, 0.0  ;;  %v2437_v27 = vrot.slane %v2416_v11, %v8071_v29 }
 0x4c2   : > { %v8205_v20 = vpop.eup %7516  ;;  %v2424_v22 = vpack.i.b16 %v2413_v17, %v2411_v13  ;;  %2928 = vadd.xlane.f32.xlu0 %v2927_v18  ;;  %v2496_v9 = vcombine.high %v2420_v15, %v8068_v24  ;;  %v2427_v25 = vshrl.u32 %v2413_v17, 16  ;;  %v2444_v32 = vrot.slane %v2430_v21, %v8071_v29 }
 0x4c3   : > { %v2930_v26 = vsel %vm2678_vm11, %v8205_v20, 0.0  ;;  %v2503_v36 = vrot.slane %v2420_v15, %v8071_v29 }
 0x4c4   : > { %v2445_v28 = vcombine.high %v2424_v22, %v8068_v24  ;;  %v2452_v30 = vrot.slane %v2424_v22, %v8071_v29  ;;  %2931 = vadd.xlane.f32.xlu1 %v2930_v26  ;;  %v2428_v31 = vpack.i.b16 %v2427_v25, %v2426_v16  ;;  %v2510_v37 = vrot.slane %v2496_v9, %v8071_v29 }
 0x4c6   : > { %v2459_v33 = vrot.slane %v2445_v28, %v8071_v29  ;;  %v2460_v34 = vcombine.low %v2437_v27, %v2452_v30  ;;  %v2461_v35 = vcombine.high %v2437_v27, %v2452_v30  ;;  %v2511_v38 = vcombine.high %v2428_v31, %v8068_v24 }
 0x4c7   : > { %v2518_v39 = vrot.slane %v2428_v31, %v8071_v29 }
 0x4c8   : > { %v8220_v41 = vpop.eup %7518  ;;  %v2468_v42 = vrot.slane %v2460_v34, %v8077_v40  ;;  %v2475_v43 = vrot.slane %v2461_v35, %v8077_v40  ;;  %v2476_v44 = vcombine.low %v2444_v32, %v2459_v33  ;;  %v2477_v45 = vcombine.high %v2444_v32, %v2459_v33 }
 0x4c9   : > { %v2525_v47 = vrot.slane %v2511_v38, %v8071_v29  ;;  %v2526_v48 = vcombine.low %v2503_v36, %v2518_v39  ;;  %v2527_v49 = vcombine.high %v2503_v36, %v2518_v39  ;;  %v2933_v50 = vsel %vm2678_vm11, %v8220_v41, 0.0 }
 0x4ca   : > { %v2484_v52 = vrot.slane %v2476_v44, %v8077_v40  ;;  %v2491_v24 = vrot.slane %v2477_v45, %v8077_v40  ;;  %v2562_v53 = vcombine.low %v2468_v42, %v2475_v43  ;;  %v6592_v54 = vcombine.high %v2468_v42, %v2475_v43  ;;  %2934 = vadd.xlane.f32.xlu0 %v2933_v50  ;;  %v8229_v56 = vpop.eup %7520 }
 0x4cb   : > { %v2534_v57 = vrot.slane %v2526_v48, %v8077_v40  ;;  %v2541_v58 = vrot.slane %v2527_v49, %v8077_v40  ;;  %v2542_v59 = vcombine.low %v2510_v37, %v2525_v47  ;;  %v2543_v60 = vcombine.high %v2510_v37, %v2525_v47 }
 0x4cc   : > { %v2569_v61 = vrot.slane %v2562_v53, %v8071_v29  ;;  %v2577_v63 = vrot.slane %v6592_v54, %v8071_v29  ;;  %v2578_v0 = vcombine.low %v2484_v52, %v2491_v24  ;;  %v6593_v1 = vcombine.high %v2484_v52, %v2491_v24 }
 0x4cd   : > { %v2550_v2 = vrot.slane %v2542_v59, %v8077_v40  ;;  %v2557_v4 = vrot.slane %v2543_v60, %v8077_v40  ;;  %v2612_v5 = vcombine.low %v2534_v57, %v2541_v58  ;;  %v6594_v6 = vcombine.high %v2534_v57, %v2541_v58 }
 0x4ce   : > { %v2585_v7 = vrot.slane %v2578_v0, %v8071_v29  ;;  %v2593_v8 = vrot.slane %v6593_v1, %v8071_v29  ;;  %v2936_v10 = vsel %vm2678_vm11, %v8229_v56, 0.0  ;;  %v2594_v11 = vcombine.low %v2569_v61, %v2577_v63 }
 0x4cf   : > { %v2619_v12 = vrot.slane %v2612_v5, %v8071_v29  ;;  %v2627_v13 = vrot.slane %v6594_v6, %v8071_v29  ;;  %v2628_v15 = vcombine.low %v2550_v2, %v2557_v4  ;;  %v6595_v16 = vcombine.high %v2550_v2, %v2557_v4  ;;  %2937 = vadd.xlane.f32.xlu1 %v2936_v10 }
 0x4d0   : > { %v2602_v17 = vcombine.low %v2585_v7, %v2593_v8  ;;  %v2601_v9 = vrot.slane %v2594_v11, %v8077_v40 }
 0x4d1   : > { %v2635_v18 = vrot.slane %v2628_v15, %v8071_v29  ;;  %v2643_v21 = vrot.slane %v6595_v16, %v8071_v29  ;;  %v2644_v22 = vcombine.low %v2619_v12, %v2627_v13 }
 0x4d2   : > { %v2609_v25 = vrot.slane %v2602_v17, %v8077_v40 }
 0x4d3   : > { %v2652_v26 = vcombine.low %v2635_v18, %v2643_v21  ;;  %v2651_v30 = vrot.slane %v2644_v22, %v8077_v40 }
 0x4d4   : > { %v2610_v27 = vcombine.low %v2601_v9, %v2609_v25  ;;  %v2611_v28 = vcombine.high %v2601_v9, %v2609_v25 }
 0x4d5   : > { %v2659_v31 = vrot.slane %v2652_v26, %v8077_v40 }
 0x4d6   : > { %v2666_v34 = vshrl.u32 %v2610_v27, 16  ;;  %v2674_v35 = vshrl.u32 %v2611_v28, 16 }
 0x4d7   : > { %v2660_v32 = vcombine.low %v2651_v30, %v2659_v31  ;;  %v2661_v33 = vcombine.high %v2651_v30, %v2659_v31 }
 0x4d9   : > { %v2664_v36 = vpack.i.b16 %v2660_v32, %v2610_v27  ;;  %v2667_v37 = vshrl.u32 %v2660_v32, 16  ;;  %v2672_v38 = vpack.i.b16 %v2661_v33, %v2611_v28  ;;  %v2675_v39 = vshrl.u32 %v2661_v33, 16 }
 0x4db   : > { %7225 = vmatpush3.bf16.msra.mxu0 %v2664_v36  ;;  %v2668_v42 = vpack.i.b16 %v2667_v37, %v2666_v34  ;;  %v2676_v43 = vpack.i.b16 %v2675_v39, %v2674_v35 }
 0x4dc   : > { %7236 = vmatprep.subr.bf16.mxu0 %v7558_v46 }
 0x4dd   : > { %7231 = vmatpush3.bf16.msra.mxu1 %v2668_v42 }
 0x4de   : > { %7242 = vmatprep.subr.bf16.mxu1 %v7558_v46 }
 0x53f   : > { %v2917_v44 = vpop.xlane.xlu1 %2916 }
 0x540   : > { %7522 = vrcp.f32 %v2917_v44 }
 0x541   : > { %v2920_v45 = vpop.xlane.xlu0 %2919 }
 0x542   : > { %7524 = vrcp.f32 %v2920_v45 }
 0x547   : > { %v2923_v47 = vpop.xlane.xlu0 %2922 }
 0x548   : > { %7526 = vrcp.f32 %v2923_v47 }
 0x54a   : > { %v7523_v48 = vpop.eup %7522 }
 0x54b   : > { %v2926_v49 = vpop.xlane.xlu1 %2925  ;;  %v2947_v52 = vmul.f32 %v7523_v48, %v8183_v51 }
 0x54c   : > { %v7525_v50 = vpop.eup %7524  ;;  %7528 = vrcp.f32 %v2926_v49 }
 0x54d   : > { %v2948_v24 = vmul.f32 %v7525_v50, %v8187_v55 }
 0x54f   : > { %v2929_v53 = vpop.xlane.xlu0 %2928  ;;  %v2955_v54 = vpack.c.bf16 %v2948_v24, %v2947_v52 }
 0x550   : > { %7530 = vrcp.f32 %v2929_v53 }
 0x551   : > { %v2932_v57 = vpop.xlane.xlu1 %2931  ;;  %7227 = vmatmul.mubr.msk.bf16.vlgmr.msra.gmra.mrb[8].mxu0 %vm2678_vm11, %v2955_v54 }
 0x552   : > { %7532 = vrcp.f32 %v2932_v57  ;;  %7237 = vmatpush3.bf16.msra.mxu0 %v2672_v38  ;;  %7238 = vmatprep.mubr.msk.bf16.mxu0 %vm7559_vm9, %v7558_v46  ;;  %v7527_v58 = vpop.eup %7526 }
 0x553   : > { %7248 = vmatprep.subr.bf16.mxu0 %v7558_v46  ;;  %v2949_v60 = vmul.f32 %v7527_v58, %v8191_v62 }
 0x556   : > { %v7529_v59 = vpop.eup %7528 }
 0x557   : > { %v2950_v51 = vmul.f32 %v7529_v59, %v8195_v3  ;;  %v2935_v55 = vpop.xlane.xlu0 %2934 }
 0x558   : > { %7534 = vrcp.f32 %v2935_v55 }
 0x559   : > { %v2956_v61 = vpack.c.bf16 %v2950_v51, %v2949_v60 }
 0x55a   : > { %v7531_v63 = vpop.eup %7530 }
 0x55b   : > { %7233 = vmatmul.mubr.msk.bf16.vlgmr.msra.gmra.mrb[20].mxu1 %vm2678_vm11, %v2956_v61  ;;  %v2951_v2 = vmul.f32 %v7531_v63, %v8201_v14  ;;  %v7374_v14 = vld [vmem:[%s7720_s29] sm:$0xff]  }
 0x55c   : > { %v7533_v0 = vpop.eup %7532  ;;  %v2938_v1 = vpop.xlane.xlu1 %2937  ;;  %7243 = vmatpush3.bf16.msra.mxu1 %v2676_v43  ;;  %7244 = vmatprep.mubr.msk.bf16.mxu1 %vm7559_vm9, %v7558_v46 }
 0x55d   : > { %v2952_v62 = vmul.f32 %v7533_v0, %v8205_v20  ;;  %7536 = vrcp.f32 %v2938_v1  ;;  %v7375_v20 = vld [vmem:[%s7720_s29 + $0x8] sm:$0xff]  }
 0x55f   : > { %v2957_v3 = vpack.c.bf16 %v2952_v62, %v2951_v2 }
 0x561   : > { %7239 = vmatmul.mubr.msk.bf16.vlgmr.msra.gmra.mrb[12].mxu0 %vm2678_vm11, %v2957_v3 }
 0x562   : > { %7256 = vmatprep.mubr.msk.bf16.mxu0 %vm7559_vm9, %v7558_v46  ;;  %v7535_v4 = vpop.eup %7534  ;;  %7249 = vmatpush3.bf16.msra.mxu0 %v7374_v14 }
 0x563   : > { %v2953_v6 = vmul.f32 %v7535_v4, %v8220_v41  ;;  %7250 = vmatprep.subr.bf16.mxu0 %v7558_v46 }
 0x566   : > { %7251 = vmatpush3.bf16.msra.mxu0 %v7375_v20 }
 0x567   : > { %v7537_v5 = vpop.eup %7536  ;;  %7252 = vmatprep.subr.bf16.mxu0 %v7558_v46 }
 0x568   : > { %v2954_v7 = vmul.f32 %v7537_v5, %v8229_v56 }
 0x56a   : > { %v2958_v8 = vpack.c.bf16 %v2954_v7, %v2953_v6 }
 0x56c   : > { %7245 = vmatmul.mubr.msk.bf16.vlgmr.msra.gmra.mrb[24].mxu1 %vm2678_vm11, %v2958_v8  ;;  %v7376_v8 = vld [vmem:[%s7720_s29 + $0x10] sm:$0xff]  }
 0x56d   : > { %4074 = vmatprep.mubr.bf16.mxu1 %v7565_v23  ;;  %7253 = vmatpush3.bf16.msra.mxu0 %v7376_v8 }
 0x56e   : > { %7254 = vmatprep.subr.bf16.mxu0 %v7558_v46 }
 0x624   : > { %v2996_v10 = vpop.f32.mrb[8].mxu0 }
 0x625   : > { %v7228_v11 = vpop.f32.mrb[9].mxu0 }
 0x626   : > { %v2999_v12 = vpop.f32.mrb[10].mxu0 }
 0x627   : > { %v7229_v13 = vpop.f32.mrb[11].mxu0 }
 0x62e   : > { %v3040_v41 = vpop.f32.mrb[20].mxu1 }
 0x62f   : > { %v7234_v15 = vpop.f32.mrb[21].mxu1 }
 0x630   : > { %v3043_v56 = vpop.f32.mrb[22].mxu1 }
 0x631   : > { %v7235_v16 = vpop.f32.mrb[23].mxu1 }
 0x634   : > { %v3084_v17 = vpop.f32.mrb[12].mxu0 }
 0x635   : > { %v3135_v18 = vcombine.low %v2996_v10, %v3084_v17  ;;  %v3136_v21 = vcombine.high %v2996_v10, %v3084_v17  ;;  %v7240_v22 = vpop.f32.mrb[13].mxu0 }
 0x636   : > { %v3087_v9 = vpop.f32.mrb[14].mxu0 }
 0x637   : > { %v3203_v25 = vcombine.low %v2999_v12, %v3087_v9  ;;  %v3204_v26 = vcombine.high %v2999_v12, %v3087_v9  ;;  %v7241_v27 = vpop.f32.mrb[15].mxu0  ;;  %v3143_v33 = vrot.slane %v3135_v18, %v8071_v29  ;;  %v3150_v34 = vrot.slane %v3136_v21, %v8071_v29 }
 0x639   : > { %v3211_v48 = vrot.slane %v3203_v25, %v8071_v29  ;;  %v3218_v49 = vrot.slane %v3204_v26, %v8071_v29  ;;  %v7377_v26 = vld [vmem:[%s7720_s29 + $0x18] sm:$0xff]   ;;  %s7566_s29 = smov 32  }
 0x63a   : > { %7255 = vmatpush3.bf16.msra.mxu0 %v7377_v26 }
 0x63f   : > { %v3128_v28 = vpop.f32.mrb[24].mxu1 }
 0x640   : > { %v3151_v30 = vcombine.low %v3040_v41, %v3128_v28  ;;  %v3152_v31 = vcombine.high %v3040_v41, %v3128_v28  ;;  %v7246_v32 = vpop.f32.mrb[25].mxu1 }
 0x641   : > { %v3131_v35 = vpop.f32.mrb[26].mxu1 }
 0x642   : > { %v3159_v36 = vrot.slane %v3151_v30, %v8071_v29  ;;  %v3166_v37 = vrot.slane %v3152_v31, %v8071_v29  ;;  %v3219_v38 = vcombine.low %v3043_v56, %v3131_v35  ;;  %v3220_v39 = vcombine.high %v3043_v56, %v3131_v35  ;;  %v7247_v42 = vpop.f32.mrb[27].mxu1 }
 0x644   : > { %v3167_v43 = vcombine.low %v3143_v33, %v3159_v36  ;;  %v3168_v44 = vcombine.high %v3143_v33, %v3159_v36  ;;  %v3183_v45 = vcombine.low %v3150_v34, %v3166_v37  ;;  %v3184_v47 = vcombine.high %v3150_v34, %v3166_v37 }
 0x645   : > { %v3227_v50 = vrot.slane %v3219_v38, %v8071_v29  ;;  %v3234_v52 = vrot.slane %v3220_v39, %v8071_v29 }
 0x646   : > { %v3175_v24 = vrot.slane %v3167_v43, %v8077_v40  ;;  %v3182_v53 = vrot.slane %v3168_v44, %v8077_v40  ;;  %v3191_v54 = vrot.slane %v3183_v45, %v8077_v40  ;;  %v3198_v57 = vrot.slane %v3184_v47, %v8077_v40 }
 0x647   : > { %v3235_v58 = vcombine.low %v3211_v48, %v3227_v50  ;;  %v3236_v59 = vcombine.high %v3211_v48, %v3227_v50  ;;  %v3251_v60 = vcombine.low %v3218_v49, %v3234_v52  ;;  %v3252_v51 = vcombine.high %v3218_v49, %v3234_v52 }
 0x648   : > { %v3271_v55 = vcombine.low %v3175_v24, %v3182_v53  ;;  %v6604_v61 = vcombine.high %v3175_v24, %v3182_v53  ;;  %v3287_v63 = vcombine.low %v3191_v54, %v3198_v57  ;;  %v6605_v0 = vcombine.high %v3191_v54, %v3198_v57 }
 0x649   : > { %v3243_v1 = vrot.slane %v3235_v58, %v8077_v40  ;;  %v3250_v2 = vrot.slane %v3236_v59, %v8077_v40  ;;  %v3259_v62 = vrot.slane %v3251_v60, %v8077_v40  ;;  %v3266_v3 = vrot.slane %v3252_v51, %v8077_v40 }
 0x64a   : > { %v3278_v4 = vrot.slane %v3271_v55, %v8071_v29  ;;  %v3286_v5 = vrot.slane %v6604_v61, %v8071_v29  ;;  %v3294_v6 = vrot.slane %v3287_v63, %v8071_v29  ;;  %v3302_v7 = vrot.slane %v6605_v0, %v8071_v29  ;;  %v6608_v0 = vld [vmem:[%s8890_s0] ss:$0 sm:$0xff]  ;;  %s8894_s0 = sld [smem:[#allocation14_spill]] (!%p6819_p5) }
 0x64b   : > { %v3339_v14 = vcombine.low %v3243_v1, %v3250_v2  ;;  %v6606_v20 = vcombine.high %v3243_v1, %v3250_v2  ;;  %v3355_v10 = vcombine.low %v3259_v62, %v3266_v3  ;;  %v6607_v11 = vcombine.high %v3259_v62, %v3266_v3 }
 0x64c   : > { %v3304_v12 = vcombine.high %v3278_v4, %v3286_v5  ;;  %v3320_v13 = vcombine.high %v3294_v6, %v3302_v7  ;;  %v3303_v41 = vcombine.low %v3278_v4, %v3286_v5  ;;  %v3319_v15 = vcombine.low %v3294_v6, %v3302_v7  ;;  %v7546_v6 = vld [vmem:[#allocation2] sm:$0xff] }
 0x64d   : > { %v3346_v56 = vrot.slane %v3339_v14, %v8071_v29  ;;  %v3354_v16 = vrot.slane %v6606_v20, %v8071_v29  ;;  %v3362_v17 = vrot.slane %v3355_v10, %v8071_v29  ;;  %v3370_v18 = vrot.slane %v6607_v11, %v8071_v29  ;;  %v7547_v14 = vld [vmem:[#allocation2 + $0x8] sm:$0xff] }
 0x64e   : > { %v3318_v21 = vrot.slane %v3304_v12, %v8077_v40  ;;  %v3334_v22 = vrot.slane %v3320_v13, %v8077_v40  ;;  %v3311_v9 = vrot.slane %v3303_v41, %v8077_v40  ;;  %v3327_v25 = vrot.slane %v3319_v15, %v8077_v40 }
 0x64f   : > { %v3372_v27 = vcombine.high %v3346_v56, %v3354_v16  ;;  %v3388_v28 = vcombine.high %v3362_v17, %v3370_v18  ;;  %v3371_v30 = vcombine.low %v3346_v56, %v3354_v16  ;;  %v3387_v31 = vcombine.low %v3362_v17, %v3370_v18 }
 0x650   : > { %v3337_v32 = vcombine.low %v3318_v21, %v3334_v22  ;;  %v3335_v33 = vcombine.low %v3311_v9, %v3327_v25  ;;  %v3336_v34 = vcombine.high %v3311_v9, %v3327_v25  ;;  %v3338_v35 = vcombine.high %v3318_v21, %v3334_v22  ;;  %v3571_v22 = vld [vmem:[%s7738_s28] sm:$0xff]  ;;  %v3572_v25 = vld [vmem:[%s7738_s28 + $0x8] sm:$0xff] }
 0x651   : > { %v3386_v46 = vrot.slane %v3372_v27, %v8077_v40  ;;  %v3402_v29 = vrot.slane %v3388_v28, %v8077_v40  ;;  %v3379_v36 = vrot.slane %v3371_v30, %v8077_v40  ;;  %v3395_v37 = vrot.slane %v3387_v31, %v8077_v40  ;;  %v3579_v9 = vld [vmem:[%s7738_s28 + $0x40] sm:$0xff]  ;;  %v3580_v27 = vld [vmem:[%s7738_s28 + $0x48] sm:$0xff] }
 0x652   : > { %v6617_v26 = vcombine.high %v3571_v22, %v3579_v9  ;;  %v6616_v28 = vcombine.low %v3571_v22, %v3579_v9  ;;  %v6618_v30 = vcombine.low %v3572_v25, %v3580_v27  ;;  %v6619_v31 = vcombine.high %v3572_v25, %v3580_v27  ;;  %v3605_v9 = vld [vmem:[%s7738_s28 + $0x110] sm:$0xff]  ;;  %v3614_v27 = vld [vmem:[%s7738_s28 + $0x158] sm:$0xff] }
 0x653   : > { %v3405_v38 = vcombine.low %v3386_v46, %v3402_v29  ;;  %v3404_v39 = vcombine.high %v3379_v36, %v3395_v37  ;;  %v3403_v42 = vcombine.low %v3379_v36, %v3395_v37  ;;  %v3406_v43 = vcombine.high %v3386_v46, %v3402_v29  ;;  %v3596_v46 = vld [vmem:[%s7738_s28 + $0xc8] sm:$0xff]  ;;  %v3613_v25 = vld [vmem:[%s7738_s28 + $0x150] sm:$0xff] }
 0x654   : > { %4042 = vmatprep.subr.bf16.mxu1 %v6617_v26  ;;  %4085 = vmatprep.subr.bf16.mxu0 %v6619_v31  ;;  %v3606_v26 = vld [vmem:[%s7738_s28 + $0x118] sm:$0xff]  ;;  %v6653_v31 = vcombine.high %v3605_v9, %v3613_v25 }
 0x655   : > { %v7352_v44 = vpack.i.bf16 %v3405_v38, %v3337_v32  ;;  %v7347_v45 = vpack.i.bf16 %v3404_v39, %v3336_v34  ;;  %v7357_v47 = vpack.i.bf16 %v3406_v43, %v3338_v35  ;;  %4043 = vmatpush1.bf16.msra.mxu1 %v6616_v28  ;;  %v3587_v32 = vld [vmem:[%s7738_s28 + $0x80] sm:$0xff]  ;;  %v3588_v34 = vld [vmem:[%s7738_s28 + $0x88] sm:$0xff] }
 0x656   : > { %v6634_v36 = vcombine.low %v3588_v34, %v3596_v46  ;;  %v6635_v37 = vcombine.high %v3588_v34, %v3596_v46  ;;  %v3603_v38 = vld [vmem:[%s7738_s28 + $0x100] sm:$0xff]  ;;  %v3629_v34 = vld [vmem:[%s7738_s28 + $0x1d0] sm:$0xff]  ;;  %v3630_v46 = vld [vmem:[%s7738_s28 + $0x1d8] sm:$0xff] }
 0x657   : > { %7353 = vrot.lane.b32.xlu1 %v7352_v44, %s7566_s29  ;;  %7348 = vrot.lane.b32.xlu0 %v7347_v45, %s7567_s26  ;;  %v3611_v39 = vld [vmem:[%s7738_s28 + $0x140] sm:$0xff]  ;;  %v3612_v44 = vld [vmem:[%s7738_s28 + $0x148] sm:$0xff]  ;;  %s8892_s29 = scalar_lea.vmem %s8844_s11, %s7687_s23 }
 0x658   : > { %v6649_v43 = vcombine.high %v3603_v38, %v3611_v39  ;;  %v6648_v45 = vcombine.low %v3603_v38, %v3611_v39  ;;  %v3575_v39 = vld [vmem:[%s7738_s28 + $0x20] sm:$0xff] }
 0x65b   : > { %7358 = vrot.lane.b32.xlu1 %v7357_v47, %s7568_s27  ;;  %s8895_s27 = sld [smem:[#allocation15_spill]] (!%p6819_p5) }
 0x6c9   : > { %v7354_v48 = vpop.permute.xlu1 %7353  ;;  %v7349_v49 = vpop.permute.xlu0 %7348 }
 0x6ca   : > { %v7351_v50 = vunpack.i.h.bf16 %v7349_v49  ;;  %v7350_v52 = vunpack.i.l.bf16 %v7349_v49  ;;  %v7356_v24 = vunpack.i.h.bf16 %v7354_v48  ;;  %v7355_v40 = vunpack.i.l.bf16 %v7354_v48  ;;  %v3619_v49 = vld [vmem:[%s7738_s28 + $0x180] sm:$0xff] }
 0x6cc   : > { %v3431_v53 = vsel %vm2678_vm11, %v3335_v33, %v7350_v52  ;;  %v3432_v54 = vsel %vm2678_vm11, %v3403_v42, %v7351_v50  ;;  %v3595_v33 = vld [vmem:[%s7738_s28 + $0xc0] sm:$0xff]  ;;  %v3604_v42 = vld [vmem:[%s7738_s28 + $0x108] sm:$0xff] }
 0x6cd   : > { %v7359_v57 = vpop.permute.xlu1 %7358  ;;  %v3434_v60 = vsel %vm3433_vm12, %v3431_v53, %v7355_v40  ;;  %v3435_v51 = vsel %vm3433_vm12, %v3432_v54, %v7356_v24  ;;  %v6633_v35 = vcombine.high %v3587_v32, %v3595_v33  ;;  %v6632_v29 = vcombine.low %v3587_v32, %v3595_v33  ;;  %v3627_v50 = vld [vmem:[%s7738_s28 + $0x1c0] sm:$0xff]  ;;  %v3620_v52 = vld [vmem:[%s7738_s28 + $0x188] sm:$0xff]  ;;  %v3621_v33 = vld [vmem:[%s7738_s28 + $0x190] sm:$0xff] }
 0x6ce   : > { %v7361_v58 = vunpack.i.h.bf16 %v7359_v57  ;;  %v7360_v59 = vunpack.i.l.bf16 %v7359_v57  ;;  %v6650_v47 = vcombine.low %v3604_v42, %v3612_v44  ;;  %v6651_v48 = vcombine.high %v3604_v42, %v3612_v44  ;;  %v3628_v40 = vld [vmem:[%s7738_s28 + $0x1c8] sm:$0xff]  ;;  %v3583_v42 = vld [vmem:[%s7738_s28 + $0x60] sm:$0xff] }
 0x6cf   : > { %4044 = vmatprep.subr.bf16.mxu1 %v6633_v35  ;;  %v6665_v24 = vcombine.high %v3619_v49, %v3627_v50  ;;  %v6664_v53 = vcombine.low %v3619_v49, %v3627_v50  ;;  %v6666_v54 = vcombine.low %v3620_v52, %v3628_v40  ;;  %v6667_v57 = vcombine.high %v3620_v52, %v3628_v40  ;;  %v3622_v35 = vld [vmem:[%s7738_s28 + $0x198] sm:$0xff]  ;;  %v3584_v44 = vld [vmem:[%s7738_s28 + $0x68] sm:$0xff]  ;;  %v3591_v50 = vld [vmem:[%s7738_s28 + $0xa0] sm:$0xff] }
 0x6d0   : > { %v3437_v55 = vsel %vm3436_vm13, %v3434_v60, %v7360_v59  ;;  %v3438_v61 = vsel %vm3436_vm13, %v3435_v51, %v7361_v58  ;;  %4045 = vmatpush1.bf16.msra.mxu1 %v6632_v29  ;;  %v3573_v58 = vld [vmem:[%s7738_s28 + $0x10] sm:$0xff]  ;;  %v3574_v60 = vld [vmem:[%s7738_s28 + $0x18] sm:$0xff]  ;;  %v6655_v32 = vcombine.high %v3606_v26, %v3614_v27  ;;  %v6652_v29 = vcombine.low %v3605_v9, %v3613_v25  ;;  %v3599_v52 = vld [vmem:[%s7738_s28 + $0xe0] sm:$0xff] }
 0x6d1   : > { %v3439_v63 = vpack.c.bf16 %v3438_v61, %v3437_v55  ;;  %4046 = vmatprep.subr.bf16.mxu1 %v6649_v43  ;;  %v3581_v59 = vld [vmem:[%s7738_s28 + $0x50] sm:$0xff]  ;;  %v3582_v55 = vld [vmem:[%s7738_s28 + $0x58] sm:$0xff]  ;;  %v6671_v38 = vcombine.high %v3622_v35, %v3630_v46  ;;  %v3576_v43 = vld [vmem:[%s7738_s28 + $0x28] sm:$0xff] }
 0x6d2   : > { %v6621_v51 = vcombine.high %v3573_v58, %v3581_v59  ;;  %v6620_v61 = vcombine.low %v3573_v58, %v3581_v59  ;;  %v6627_v49 = vcombine.high %v3576_v43, %v3584_v44  ;;  %v3600_v40 = vld [vmem:[%s7738_s28 + $0xe8] sm:$0xff]  ;;  %v3607_v59 = vld [vmem:[%s7738_s28 + $0x120] sm:$0xff]  ;;  %v3602_v9 = vld [vmem:[%s7738_s28 + $0xf8] sm:$0xff] }
 0x6d3   : > { %7257 = vmatmul.mubr.msk.bf16.vlgmr.msra.gmra.mrb[16].mxu0 %vm1657_vm10, %v3439_v63  ;;  %v6622_v63 = vcombine.low %v3574_v60, %v3582_v55 }
 0x6d4   : > { %4117 = vmatprep.mubr.bf16.mxu0 %v7565_v23  ;;  %4086 = vmatpush1.bf16.msra.mxu0 %v6618_v30 }
 0x6d5   : > { %4087 = vmatprep.subr.bf16.mxu0 %v6635_v37  ;;  %4047 = vmatpush1.bf16.msra.mxu1 %v6648_v45  ;;  %v6669_v37 = vcombine.high %v3621_v33, %v3629_v34  ;;  %v6668_v45 = vcombine.low %v3621_v33, %v3629_v34  ;;  %v3618_v33 = vld [vmem:[%s7738_s28 + $0x178] sm:$0xff] }
 0x6d6   : > { %4048 = vmatprep.subr.bf16.mxu1 %v6665_v24  ;;  %v3592_v24 = vld [vmem:[%s7738_s28 + $0xa8] sm:$0xff] }
 0x6d7   : > { %v6643_v58 = vcombine.high %v3592_v24, %v3600_v40 }
 0x6d8   : > { %4088 = vmatpush1.bf16.msra.mxu0 %v6634_v36  ;;  %v6654_v36 = vcombine.low %v3606_v26, %v3614_v27 }
 0x6d9   : > { %4089 = vmatprep.subr.bf16.mxu0 %v6651_v48  ;;  %4049 = vmatpush1.bf16.msra.mxu1 %v6664_v53  ;;  %v6625_v48 = vcombine.high %v3575_v39, %v3583_v42  ;;  %v6624_v53 = vcombine.low %v3575_v39, %v3583_v42  ;;  %v3634_v39 = vld [vmem:[%s7738_s28 + $0x1f8] sm:$0xff] }
 0x6da   : > { %4128 = vmatprep.subr.bf16.mxu1 %v6621_v51  ;;  %v3608_v51 = vld [vmem:[%s7738_s28 + $0x128] sm:$0xff] }
 0x6dc   : > { %4090 = vmatpush1.bf16.msra.mxu0 %v6650_v47  ;;  %v6670_v47 = vcombine.low %v3622_v35, %v3630_v46 }
 0x6dd   : > { %4091 = vmatprep.subr.bf16.mxu0 %v6667_v57  ;;  %v6641_v57 = vcombine.high %v3591_v50, %v3599_v52 }
 0x6e0   : > { %4092 = vmatpush1.bf16.msra.mxu0 %v6666_v54  ;;  %v6626_v54 = vcombine.low %v3576_v43, %v3584_v44 }
 0x7a6   : > { %v3516_v1 = vpop.f32.mrb[16].mxu0 }
 0x7a7   : > { %v3517_v2 = vadd.f32 %v6608_v0, %v3516_v1  ;;  %v7258_v62 = vpop.f32.mrb[17].mxu0 }
 0x7a8   : > { %v3519_v3 = vpop.f32.mrb[18].mxu0 }
 0x7a9   : > { %v3520_v4 = vadd.f32 %v6608_v0, %v3519_v3  ;;  %v7259_v5 = vpop.f32.mrb[19].mxu0  ;;  %v3523_v7 = vadd.f32 %v7546_v6, %v3517_v2  ;;  %v6623_v0 = vcombine.high %v3574_v60, %v3582_v55  ;;  %v3615_v60 = vld [vmem:[%s7738_s28 + $0x160] sm:$0xff]  ;;  %v3616_v55 = vld [vmem:[%s7738_s28 + $0x168] sm:$0xff] }
 0x7ab   : > { %v3527_v8 = vsel %vm1657_vm10, %v3523_v7, 0.0  ;;  %v3524_v20 = vadd.f32 %v7547_v14, %v3520_v4  ;;  %4171 = vmatprep.subr.bf16.mxu0 %v6623_v0  ;;  %v6657_v0 = vcombine.high %v3607_v59, %v3615_v60 }
 0x7ac   : > { %3528 = vadd.xlane.f32.xlu0 %v3527_v8  ;;  %v6614_v8 = vld [vmem:[%s8891_s18] ss:$0 sm:$0xff] }
 0x7ad   : > { %v3530_v10 = vsel %vm1657_vm10, %v3524_v20, 0.0 }
 0x7ae   : > { %3531 = vadd.xlane.f32.xlu1 %v3530_v10 }
 0x839   : > { %v3529_v11 = vpop.xlane.xlu0 %3528 }
 0x83a   : > { %v3534_v12 = vmul.f32 0.015625, %v3529_v11  ;;  %v6615_v11 = vld [vmem:[%s8892_s29] ss:$0 sm:$0xff] }
 0x83b   : > { %v3532_v13 = vpop.xlane.xlu1 %3531 }
 0x83c   : > { %v8321_v41 = vsub.f32 %v3523_v7, %v3534_v12  ;;  %v3535_v15 = vmul.f32 0.015625, %v3532_v13  ;;  %v3589_v13 = vld [vmem:[%s7738_s28 + $0x90] sm:$0xff] }
 0x83e   : > { %v8323_v56 = vsub.f32 %v3524_v20, %v3535_v15  ;;  %v3538_v16 = vmul.f32 %v8321_v41, %v8321_v41  ;;  %v3590_v15 = vld [vmem:[%s7738_s28 + $0x98] sm:$0xff] }
 0x840   : > { %v3540_v17 = vsel %vm1657_vm10, %v3538_v16, 0.0  ;;  %v3539_v18 = vmul.f32 %v8323_v56, %v8323_v56  ;;  %v3598_v16 = vld [vmem:[%s7738_s28 + $0xd8] sm:$0xff] }
 0x841   : > { %3541 = vadd.xlane.f32.xlu0 %v3540_v17  ;;  %v6638_v30 = vcombine.low %v3590_v15, %v3598_v16 }
 0x842   : > { %v3543_v21 = vsel %vm1657_vm10, %v3539_v18, 0.0 }
 0x845   : > { %3544 = vadd.xlane.f32.xlu0 %v3543_v21 }
 0x8ce   : > { %v3542_v1 = vpop.xlane.xlu0 %3541 }
 0x8cf   : > { %v3546_v2 = vmul.f32 0.015625, %v3542_v1  ;;  %v6659_v1 = vcombine.high %v3608_v51, %v3616_v55 }
 0x8d1   : > { %v3548_v62 = vadd.f32 1e-05, %v3546_v2  ;;  %v3623_v2 = vld [vmem:[%s7738_s28 + $0x1a0] sm:$0xff] }
 0x8d2   : > { %v3545_v3 = vpop.xlane.xlu0 %3544 }
 0x8d3   : > { %7538 = vrsqrt.f32 %v3548_v62  ;;  %v3547_v4 = vmul.f32 0.015625, %v3545_v3  ;;  %v3631_v62 = vld [vmem:[%s7738_s28 + $0x1e0] sm:$0xff]  ;;  %v3624_v3 = vld [vmem:[%s7738_s28 + $0x1a8] sm:$0xff] }
 0x8d5   : > { %v3549_v5 = vadd.f32 1e-05, %v3547_v4  ;;  %v3632_v4 = vld [vmem:[%s7738_s28 + $0x1e8] sm:$0xff] }
 0x8d7   : > { %7540 = vrsqrt.f32 %v3549_v5  ;;  %v6656_v5 = vcombine.low %v3607_v59, %v3615_v60  ;;  %v7388_v59 = vld [vmem:[%s7750_s19 + $0x10] sm:$0xff]  }
 0x8d8   : > { %v7389_v60 = vld [vmem:[%s7750_s19 + $0x90] sm:$0xff]  }
 0x8dd   : > { %v7539_v6 = vpop.eup %7538 }
 0x8de   : > { %v3552_v7 = vmul.f32 %v7539_v6, %v8321_v41  ;;  %v3597_v41 = vld [vmem:[%s7738_s28 + $0xd0] sm:$0xff]  ;;  %v6658_v6 = vcombine.low %v3608_v51, %v3616_v55  ;;  %v7391_v51 = vld [vmem:[%s7750_s19 + $0xd8] sm:$0xff]  }
 0x8df   : > { %v6637_v22 = vcombine.high %v3589_v13, %v3597_v41  ;;  %v6636_v28 = vcombine.low %v3589_v13, %v3597_v41  ;;  %v6674_v13 = vcombine.low %v3624_v3, %v3632_v4  ;;  %v7392_v55 = vld [vmem:[%s7750_s19 + $0x18] sm:$0xff]  }
 0x8e0   : > { %v3560_v20 = vmul.f32 %v6614_v8, %v3552_v7  ;;  %v6673_v7 = vcombine.high %v3623_v2, %v3631_v62 }
 0x8e1   : > { %v7541_v14 = vpop.eup %7540 }
 0x8e2   : > { %v3553_v10 = vmul.f32 %v7541_v14, %v8323_v56  ;;  %v8367_v17 = vadd.f32 %v6615_v11, %v3560_v20  ;;  %v6639_v56 = vcombine.high %v3590_v15, %v3598_v16  ;;  %v3577_v14 = vld [vmem:[%s7738_s28 + $0x30] sm:$0xff] }
 0x8e3   : > { %v3585_v20 = vld [vmem:[%s7738_s28 + $0x70] sm:$0xff] }
 0x8e4   : > { %v3561_v12 = vmul.f32 %v6614_v8, %v3553_v10  ;;  %v6675_v8 = vcombine.high %v3624_v3, %v3632_v4  ;;  %v3578_v10 = vld [vmem:[%s7738_s28 + $0x38] sm:$0xff]  ;;  %v6629_v41 = vcombine.high %v3577_v14, %v3585_v20  ;;  %v3593_v16 = vld [vmem:[%s7738_s28 + $0xb0] sm:$0xff]  ;;  %v6628_v25 = vcombine.low %v3577_v14, %v3585_v20  ;;  %v7399_v3 = vld [vmem:[%s7750_s19 + $0xe8] sm:$0xff]  }
 0x8e5   : > { %v7400_v4 = vld [vmem:[%s7750_s19 + $0x28] sm:$0xff]   ;;  %v7405_v14 = vld [vmem:[%s7750_s19 + $0xb0] sm:$0xff]   ;;  %v7406_v20 = vld [vmem:[%s7750_s19 + $0x78] sm:$0xff]  }
 0x8e6   : > { %v8369_v18 = vadd.f32 %v6615_v11, %v3561_v12  ;;  %v3586_v11 = vld [vmem:[%s7738_s28 + $0x78] sm:$0xff]  ;;  %v6672_v12 = vcombine.low %v3623_v2, %v3631_v62  ;;  %v7397_v2 = vld [vmem:[%s7750_s19 + $0xa0] sm:$0xff]   ;;  %v7398_v62 = vld [vmem:[%s7750_s19 + $0x68] sm:$0xff]  }
 0x8e7   : > { %v6631_v15 = vcombine.high %v3578_v10, %v3586_v11  ;;  %v6630_v26 = vcombine.low %v3578_v10, %v3586_v11  ;;  %v7407_v10 = vld [vmem:[%s7750_s19 + $0xf8] sm:$0xff]  }
 0x8e8   : > { %v8373_v21 = vpack.c.bf16 %v8369_v18, %v8367_v17  ;;  %v7408_v11 = vld [vmem:[%s7750_s19 + $0x38] sm:$0xff]  }
 0x8ea   : > { %6680 = vmatmul.mubr.msk.bf16.vlgmr.msra.gmra.mrb[28].mxu1 %vm1657_vm10, %v8373_v21  ;;  %6681 = vmatmul.mubr.msk.bf16.vlgmr.msra.gmra.mrb[20].mxu0 %vm1657_vm10, %v8373_v21 }
 0x8eb   : > { %4129 = vmatpush1.bf16.msra.mxu1 %v6620_v61  ;;  %4172 = vmatpush1.bf16.msra.mxu0 %v6622_v63  ;;  %v6640_v61 = vcombine.low %v3591_v50, %v3599_v52  ;;  %v6642_v63 = vcombine.low %v3592_v24, %v3600_v40  ;;  %v7380_v50 = vld [vmem:[%s7750_s19] sm:$0xff]   ;;  %v7382_v24 = vld [vmem:[%s7750_s19 + $0x48] sm:$0xff]  }
 0x8ec   : > { %4130 = vmatprep.subr.bf16.mxu1 %v6637_v22  ;;  %4173 = vmatprep.subr.bf16.mxu0 %v6639_v56  ;;  %v3601_v22 = vld [vmem:[%s7738_s28 + $0xf0] sm:$0xff]  ;;  %v3594_v56 = vld [vmem:[%s7738_s28 + $0xb8] sm:$0xff]  ;;  %v7381_v52 = vld [vmem:[%s7750_s19 + $0x80] sm:$0xff]  }
 0x8ed   : > { %4160 = vmatprep.mubr.bf16.mxu1 %v7565_v23  ;;  %4203 = vmatprep.mubr.bf16.mxu0 %v7565_v23  ;;  %v6645_v27 = vcombine.high %v3593_v16, %v3601_v22  ;;  %v6644_v34 = vcombine.low %v3593_v16, %v3601_v22  ;;  %v6646_v35 = vcombine.low %v3594_v56, %v3602_v9  ;;  %v7383_v40 = vld [vmem:[%s7750_s19 + $0xc8] sm:$0xff]  }
 0x8ee   : > { %v8475_v16 = vld [vmem:[%s7744_s30 + $0x8] sm:$0xff] }
 0x8ef   : > { %4131 = vmatpush1.bf16.msra.mxu1 %v6636_v28  ;;  %4174 = vmatpush1.bf16.msra.mxu0 %v6638_v30  ;;  %v6647_v28 = vcombine.high %v3594_v56, %v3602_v9  ;;  %v3609_v30 = vld [vmem:[%s7738_s28 + $0x130] sm:$0xff]  ;;  %v8482_v56 = vsub.s32 0, %v8064_v19  ;;  %v8485_v9 = vsub.s32 2, %v8064_v19 }
 0x8f0   : > { %4132 = vmatprep.subr.bf16.mxu1 %v6653_v31  ;;  %4175 = vmatprep.subr.bf16.mxu0 %v6655_v32  ;;  %v3617_v31 = vld [vmem:[%s7738_s28 + $0x170] sm:$0xff]  ;;  %v3610_v32 = vld [vmem:[%s7738_s28 + $0x138] sm:$0xff] }
 0x8f1   : > { %v6661_v46 = vcombine.high %v3609_v30, %v3617_v31  ;;  %v6660_v42 = vcombine.low %v3609_v30, %v3617_v31  ;;  %v6662_v43 = vcombine.low %v3610_v32, %v3618_v33 }
 0x8f3   : > { %4133 = vmatpush1.bf16.msra.mxu1 %v6652_v29  ;;  %4176 = vmatpush1.bf16.msra.mxu0 %v6654_v36  ;;  %v6663_v29 = vcombine.high %v3610_v32, %v3618_v33  ;;  %v3625_v36 = vld [vmem:[%s7738_s28 + $0x1b0] sm:$0xff] }
 0x8f4   : > { %4134 = vmatprep.subr.bf16.mxu1 %v6669_v37  ;;  %4177 = vmatprep.subr.bf16.mxu0 %v6671_v38  ;;  %v3633_v37 = vld [vmem:[%s7738_s28 + $0x1f0] sm:$0xff]  ;;  %v3626_v38 = vld [vmem:[%s7738_s28 + $0x1b8] sm:$0xff] }
 0x8f5   : > { %v6677_v44 = vcombine.high %v3625_v36, %v3633_v37 }
 0x8f7   : > { %4135 = vmatpush1.bf16.msra.mxu1 %v6668_v45  ;;  %4178 = vmatpush1.bf16.msra.mxu0 %v6670_v47  ;;  %v6679_v45 = vcombine.high %v3626_v38, %v3634_v39  ;;  %v6676_v47 = vcombine.low %v3625_v36, %v3633_v37 }
 0x8f8   : > { %4214 = vmatprep.subr.bf16.mxu1 %v6625_v48  ;;  %4257 = vmatprep.subr.bf16.mxu0 %v6627_v49  ;;  %v6678_v48 = vcombine.low %v3626_v38, %v3634_v39  ;;  %v7379_v49 = vld [vmem:[%s7750_s19 + $0xc0] sm:$0xff]  }
 0x8fa   : > { %6682 = vmatmul.mubr.msk.bf16.vlgmr.msra.gmra.mrb[32].mxu1 %vm1657_vm10, %v8373_v21  ;;  %6683 = vmatmul.mubr.msk.bf16.vlgmr.msra.gmra.mrb[24].mxu0 %vm1657_vm10, %v8373_v21 }
 0x8fb   : > { %4215 = vmatpush1.bf16.msra.mxu1 %v6624_v53  ;;  %4258 = vmatpush1.bf16.msra.mxu0 %v6626_v54  ;;  %v7384_v53 = vld [vmem:[%s7750_s19 + $0x8] sm:$0xff]  }
 0x8fc   : > { %4216 = vmatprep.subr.bf16.mxu1 %v6641_v57  ;;  %4259 = vmatprep.subr.bf16.mxu0 %v6643_v58  ;;  %v7385_v54 = vld [vmem:[%s7750_s19 + $0x88] sm:$0xff]   ;;  %v7386_v57 = vld [vmem:[%s7750_s19 + $0x50] sm:$0xff]  }
 0x8fd   : > { %4246 = vmatprep.mubr.bf16.mxu1 %v7565_v23  ;;  %4289 = vmatprep.mubr.bf16.mxu0 %v7565_v23  ;;  %v7387_v58 = vld [vmem:[%s7750_s19 + $0xd0] sm:$0xff]  }
 0x8ff   : > { %4217 = vmatpush1.bf16.msra.mxu1 %v6640_v61  ;;  %4260 = vmatpush1.bf16.msra.mxu0 %v6642_v63  ;;  %v7393_v61 = vld [vmem:[%s7750_s19 + $0x98] sm:$0xff]   ;;  %v7394_v63 = vld [vmem:[%s7750_s19 + $0x60] sm:$0xff]  }
 0x900   : > { %4218 = vmatprep.subr.bf16.mxu1 %v6657_v0  ;;  %4261 = vmatprep.subr.bf16.mxu0 %v6659_v1  ;;  %v7395_v0 = vld [vmem:[%s7750_s19 + $0xe0] sm:$0xff]  }
 0x901   : > { %v7396_v1 = vld [vmem:[%s7750_s19 + $0x20] sm:$0xff]  }
 0x903   : > { %4219 = vmatpush1.bf16.msra.mxu1 %v6656_v5  ;;  %4262 = vmatpush1.bf16.msra.mxu0 %v6658_v6  ;;  %v7401_v5 = vld [vmem:[%s7750_s19 + $0xa8] sm:$0xff]   ;;  %v7402_v6 = vld [vmem:[%s7750_s19 + $0x70] sm:$0xff]  }
 0x904   : > { %4220 = vmatprep.subr.bf16.mxu1 %v6673_v7  ;;  %4263 = vmatprep.subr.bf16.mxu0 %v6675_v8  ;;  %v7403_v7 = vld [vmem:[%s7750_s19 + $0xf0] sm:$0xff]  }
 0x905   : > { %v7404_v8 = vld [vmem:[%s7750_s19 + $0x30] sm:$0xff]  }
 0x907   : > { %4221 = vmatpush1.bf16.msra.mxu1 %v6672_v12  ;;  %4264 = vmatpush1.bf16.msra.mxu0 %v6674_v13  ;;  %v7409_v12 = vld [vmem:[%s7750_s19 + $0xb8] sm:$0xff]   ;;  %v7410_v13 = vld [vmem:[%s7750_s19 + $0x140] sm:$0xff]  }
 0x908   : > { %4300 = vmatprep.subr.bf16.mxu1 %v6629_v41  ;;  %4343 = vmatprep.subr.bf16.mxu0 %v6631_v15  ;;  %v7411_v41 = vld [vmem:[%s7750_s19 + $0x1c0] sm:$0xff]   ;;  %v8472_v15 = vsub.s32 6, %v8064_v19 }
 0x90a   : > { %6684 = vmatmul.mubr.msk.bf16.vlgmr.msra.gmra.mrb[36].mxu1 %vm1657_vm10, %v8373_v21  ;;  %6685 = vmatmul.mubr.msk.bf16.vlgmr.msra.gmra.mrb[28].mxu0 %vm1657_vm10, %v8373_v21  ;;  %v8479_v22 = vrot.slane %v8475_v16, %v8472_v15 }
 0x90b   : > { %4301 = vmatpush1.bf16.msra.mxu1 %v6628_v25  ;;  %4344 = vmatpush1.bf16.msra.mxu0 %v6630_v26  ;;  %v3635_v25 = vld [vmem:[%s7744_s30] sm:$0xff]  ;;  %v8489_v26 = vsub.s32 1, %v8064_v19 }
 0x90c   : > { %4302 = vmatprep.subr.bf16.mxu1 %v6645_v27  ;;  %4345 = vmatprep.subr.bf16.mxu0 %v6647_v28  ;;  %v8492_v27 = vsub.s32 3, %v8064_v19  ;;  %v3642_v28 = vrot.slane %v3635_v25, %v8482_v56  ;;  %v3650_v30 = vrot.slane %v3635_v25, %v8485_v9 }
 0x90d   : > { %4332 = vmatprep.mubr.bf16.mxu1 %v7565_v23  ;;  %4375 = vmatprep.mubr.bf16.mxu0 %v7565_v23  ;;  %v7378_v23 = vld [vmem:[%s7750_s19 + $0x40] sm:$0xff]   ;;  %v3646_v31 = vrot.slane %v3635_v25, %v8489_v26 }
 0x90e   : > { %v3654_v32 = vrot.slane %v3635_v25, %v8492_v27 }
 0x90f   : > { %4303 = vmatpush1.bf16.msra.mxu1 %v6644_v34  ;;  %4346 = vmatpush1.bf16.msra.mxu0 %v6646_v35 }
 0x910   : > { %4304 = vmatprep.subr.bf16.mxu1 %v6661_v46  ;;  %4347 = vmatprep.subr.bf16.mxu0 %v6663_v29 }
 0x913   : > { %4305 = vmatpush1.bf16.msra.mxu1 %v6660_v42  ;;  %4348 = vmatpush1.bf16.msra.mxu0 %v6662_v43 }
 0x914   : > { %4306 = vmatprep.subr.bf16.mxu1 %v6677_v44  ;;  %4349 = vmatprep.subr.bf16.mxu0 %v6679_v45 }
 0x917   : > { %4307 = vmatpush1.bf16.msra.mxu1 %v6676_v47  ;;  %4350 = vmatpush1.bf16.msra.mxu0 %v6678_v48 }
 0x918   : > { %6988 = vmatprep.subr.bf16.mxu1 %v7378_v23  ;;  %7010 = vmatprep.subr.bf16.mxu0 %v7379_v49 }
 0x91a   : > { %6686 = vmatmul.mubr.msk.bf16.vlgmr.msra.gmra.mrb[40].mxu1 %vm1657_vm10, %v8373_v21  ;;  %6687 = vmatmul.mubr.msk.bf16.vlgmr.msra.gmra.mrb[32].mxu0 %vm1657_vm10, %v8373_v21  ;;  %v7390_v21 = vld [vmem:[%s7750_s19 + $0x58] sm:$0xff]  }
 0x91b   : > { %6989 = vmatpush3.bf16.msra.mxu1 %v7380_v50  ;;  %7011 = vmatpush3.bf16.msra.mxu0 %v7381_v52 }
 0x91c   : > { %6990 = vmatprep.subr.bf16.mxu1 %v7382_v24  ;;  %7012 = vmatprep.subr.bf16.mxu0 %v7383_v40 }
 0x91f   : > { %6991 = vmatpush3.bf16.msra.mxu1 %v7384_v53  ;;  %7013 = vmatpush3.bf16.msra.mxu0 %v7385_v54 }
 0x920   : > { %6992 = vmatprep.subr.bf16.mxu1 %v7386_v57  ;;  %7014 = vmatprep.subr.bf16.mxu0 %v7387_v58 }
 0x923   : > { %6993 = vmatpush3.bf16.msra.mxu1 %v7388_v59  ;;  %7015 = vmatpush3.bf16.msra.mxu0 %v7389_v60 }
 0x924   : > { %6994 = vmatprep.subr.bf16.mxu1 %v7390_v21  ;;  %7016 = vmatprep.subr.bf16.mxu0 %v7391_v51  ;;  %v7412_v51 = vld [vmem:[%s7750_s19 + $0x100] sm:$0xff]  }
 0x927   : > { %6995 = vmatpush3.bf16.msra.mxu1 %v7392_v55  ;;  %7017 = vmatpush3.bf16.msra.mxu0 %v7393_v61  ;;  %v7413_v55 = vld [vmem:[%s7750_s19 + $0x180] sm:$0xff]   ;;  %v7414_v61 = vld [vmem:[%s7750_s19 + $0x148] sm:$0xff]  }
 0x928   : > { %6996 = vmatprep.subr.bf16.mxu1 %v7394_v63  ;;  %7018 = vmatprep.subr.bf16.mxu0 %v7395_v0  ;;  %v7415_v63 = vld [vmem:[%s7750_s19 + $0x1c8] sm:$0xff]   ;;  %v8503_v0 = vsub.s32 4, %v8064_v19 }
 0x92b   : > { %6997 = vmatpush3.bf16.msra.mxu1 %v7396_v1  ;;  %7019 = vmatpush3.bf16.msra.mxu0 %v7397_v2  ;;  %v8506_v1 = vsub.s32 5, %v8064_v19  ;;  %v8509_v2 = vsub.s32 7, %v8064_v19 }
 0x92c   : > { %6998 = vmatprep.subr.bf16.mxu1 %v7398_v62  ;;  %7020 = vmatprep.subr.bf16.mxu0 %v7399_v3  ;;  %v7416_v62 = vld [vmem:[%s7750_s19 + $0x108] sm:$0xff]  }
 0x92d   : > { %v7417_v3 = vld [vmem:[%s7750_s19 + $0x188] sm:$0xff]   ;;  %v3662_v19 = vrot.slane %v3635_v25, %v8506_v1 }
 0x92f   : > { %6999 = vmatpush3.bf16.msra.mxu1 %v7400_v4  ;;  %7021 = vmatpush3.bf16.msra.mxu0 %v7401_v5  ;;  %v3658_v4 = vrot.slane %v3635_v25, %v8503_v0  ;;  %v3666_v5 = vrot.slane %v3635_v25, %v8472_v15 }
 0x930   : > { %7000 = vmatprep.subr.bf16.mxu1 %v7402_v6  ;;  %7022 = vmatprep.subr.bf16.mxu0 %v7403_v7  ;;  %v7418_v6 = vld [vmem:[%s7750_s19 + $0x150] sm:$0xff]  }
 0x931   : > { %v7419_v7 = vld [vmem:[%s7750_s19 + $0x1d0] sm:$0xff]  }
 0x933   : > { %7001 = vmatpush3.bf16.msra.mxu1 %v7404_v8  ;;  %7023 = vmatpush3.bf16.msra.mxu0 %v7405_v14  ;;  %v3670_v8 = vrot.slane %v3635_v25, %v8509_v2 }
 0x934   : > { %7002 = vmatprep.subr.bf16.mxu1 %v7406_v20  ;;  %7024 = vmatprep.subr.bf16.mxu0 %v7407_v10  ;;  %v7420_v10 = vld [vmem:[%s7750_s19 + $0x110] sm:$0xff]  }
 0x937   : > { %7003 = vmatpush3.bf16.msra.mxu1 %v7408_v11  ;;  %7025 = vmatpush3.bf16.msra.mxu0 %v7409_v12  ;;  %v7421_v11 = vld [vmem:[%s7750_s19 + $0x190] sm:$0xff]  }
 0x938   : > { %7032 = vmatprep.subr.bf16.mxu1 %v7410_v13  ;;  %7054 = vmatprep.subr.bf16.mxu0 %v7411_v41 }
 0x9bd   : > { %v4076_v33 = vpop.f32.mrb[28].mxu1  ;;  %v4119_v34 = vpop.f32.mrb[20].mxu0 }
 0x9be   : > { %v4077_v35 = vadd.f32 %v4076_v33, %v3642_v28  ;;  %v4120_v46 = vadd.f32 %v4119_v34, %v3650_v30  ;;  %v4078_v29 = vpop.f32.mrb[29].mxu1  ;;  %v4121_v36 = vpop.f32.mrb[21].mxu0 }
 0x9bf   : > { %v4079_v37 = vadd.f32 %v4078_v29, %v3646_v31  ;;  %v4122_v38 = vadd.f32 %v4121_v36, %v3654_v32  ;;  %v4080_v39 = vpop.f32.mrb[30].mxu1  ;;  %v4123_v42 = vpop.f32.mrb[22].mxu0 }
 0x9c0   : > { %v4081_v43 = vadd.f32 %v4080_v39, %v3642_v28  ;;  %v4124_v44 = vadd.f32 %v4123_v42, %v3650_v30  ;;  %v4082_v45 = vpop.f32.mrb[31].mxu1  ;;  %v4125_v47 = vpop.f32.mrb[23].mxu0  ;;  %v4386_v49 = vmax.f32 %v4077_v35, 0.0  ;;  %v4388_v50 = vmax.f32 %v4120_v46, 0.0  ;;  %v7422_v30 = vld [vmem:[%s7750_s19 + $0x158] sm:$0xff]  }
 0x9c1   : > { %v4083_v48 = vadd.f32 %v4082_v45, %v3646_v31  ;;  %v4126_v23 = vadd.f32 %v4125_v47, %v3654_v32  ;;  %v4387_v40 = vmax.f32 %v4079_v37, 0.0  ;;  %v4389_v53 = vmax.f32 %v4122_v38, 0.0  ;;  %v7423_v31 = vld [vmem:[%s7750_s19 + $0x1d8] sm:$0xff]  }
 0x9c2   : > { %v4402_v52 = vmax.f32 %v4081_v43, 0.0  ;;  %v4404_v24 = vmax.f32 %v4124_v44, 0.0  ;;  %v7424_v39 = vld [vmem:[%s7750_s19 + $0x118] sm:$0xff]  }
 0x9c3   : > { %v4403_v54 = vmax.f32 %v4083_v48, 0.0  ;;  %v4405_v57 = vmax.f32 %v4126_v23, 0.0  ;;  %v7425_v42 = vld [vmem:[%s7750_s19 + $0x198] sm:$0xff]   ;;  %v7426_v48 = vld [vmem:[%s7750_s19 + $0x160] sm:$0xff]  }
 0x9c4   : > { %v4418_v58 = vpack.c.bf16 %v4402_v52, %v4386_v49  ;;  %v4420_v59 = vpack.c.bf16 %v4404_v24, %v4388_v50  ;;  %v7427_v23 = vld [vmem:[%s7750_s19 + $0x1e0] sm:$0xff]  }
 0x9c5   : > { %v4419_v60 = vpack.c.bf16 %v4403_v54, %v4387_v40  ;;  %v4421_v21 = vpack.c.bf16 %v4405_v57, %v4389_v53 }
 0x9c7   : > { %5497 = vmatprep.mubr.bf16.mxu1 %v4419_v60  ;;  %5538 = vmatprep.mubr.bf16.mxu0 %v4421_v21  ;;  %v7430_v60 = vld [vmem:[%s7750_s19 + $0x168] sm:$0xff]  }
 0x9c8   : > { %5498 = vmatmul.mubr.bf16.vlgmr.msra.gmra.mrb[44].mxu1 %v4418_v58  ;;  %5539 = vmatmul.mubr.bf16.vlgmr.msra.gmra.mrb[36].mxu0 %v4420_v59  ;;  %v7428_v58 = vld [vmem:[%s7750_s19 + $0x120] sm:$0xff]   ;;  %v7431_v21 = vld [vmem:[%s7750_s19 + $0x1e8] sm:$0xff]  }
 0x9c9   : > { %7033 = vmatpush3.bf16.msra.mxu1 %v7412_v51  ;;  %7055 = vmatpush3.bf16.msra.mxu0 %v7413_v55  ;;  %v7429_v59 = vld [vmem:[%s7750_s19 + $0x1a0] sm:$0xff]   ;;  %v7432_v51 = vld [vmem:[%s7750_s19 + $0x128] sm:$0xff]  }
 0x9ca   : > { %7034 = vmatprep.subr.bf16.mxu1 %v7414_v61  ;;  %7056 = vmatprep.subr.bf16.mxu0 %v7415_v63  ;;  %v7433_v55 = vld [vmem:[%s7750_s19 + $0x1a8] sm:$0xff]   ;;  %v3674_v61 = vrot.slane %v8475_v16, %v8482_v56  ;;  %v3682_v63 = vrot.slane %v8475_v16, %v8485_v9 }
 0x9cd   : > { %v4162_v14 = vpop.f32.mrb[32].mxu1  ;;  %v4205_v20 = vpop.f32.mrb[24].mxu0  ;;  %7035 = vmatpush3.bf16.msra.mxu1 %v7416_v62  ;;  %7057 = vmatpush3.bf16.msra.mxu0 %v7417_v3  ;;  %v7434_v62 = vld [vmem:[%s7750_s19 + $0x170] sm:$0xff]  }
 0x9ce   : > { %v4163_v12 = vadd.f32 %v4162_v14, %v3658_v4  ;;  %v4206_v13 = vadd.f32 %v4205_v20, %v3666_v5  ;;  %v4164_v41 = vpop.f32.mrb[33].mxu1  ;;  %v4207_v28 = vpop.f32.mrb[25].mxu0  ;;  %7036 = vmatprep.subr.bf16.mxu1 %v7418_v6  ;;  %7058 = vmatprep.subr.bf16.mxu0 %v7419_v7  ;;  %v7435_v3 = vld [vmem:[%s7750_s19 + $0x1f0] sm:$0xff]  }
 0x9cf   : > { %v4165_v32 = vadd.f32 %v4164_v41, %v3662_v19  ;;  %v4208_v33 = vadd.f32 %v4207_v28, %v3670_v8  ;;  %v4166_v34 = vpop.f32.mrb[34].mxu1  ;;  %v4209_v25 = vpop.f32.mrb[26].mxu0 }
 0x9d0   : > { %v4167_v35 = vadd.f32 %v4166_v34, %v3658_v4  ;;  %v4210_v46 = vadd.f32 %v4209_v25, %v3666_v5  ;;  %v4168_v29 = vpop.f32.mrb[35].mxu1  ;;  %v4211_v36 = vpop.f32.mrb[27].mxu0  ;;  %v4390_v43 = vmax.f32 %v4163_v12, 0.0  ;;  %v4392_v44 = vmax.f32 %v4206_v13, 0.0  ;;  %v7438_v12 = vld [vmem:[%s7750_s19 + $0x178] sm:$0xff]  }
 0x9d1   : > { %v4169_v37 = vadd.f32 %v4168_v29, %v3662_v19  ;;  %v4212_v38 = vadd.f32 %v4211_v36, %v3670_v8  ;;  %7037 = vmatpush3.bf16.msra.mxu1 %v7420_v10  ;;  %7059 = vmatpush3.bf16.msra.mxu0 %v7421_v11  ;;  %v4391_v49 = vmax.f32 %v4165_v32, 0.0  ;;  %v4393_v50 = vmax.f32 %v4208_v33, 0.0  ;;  %v7436_v19 = vld [vmem:[%s7750_s19 + $0x130] sm:$0xff]   ;;  %v7439_v13 = vld [vmem:[%s7750_s19 + $0x1f8] sm:$0xff]  }
 0x9d2   : > { %v4406_v45 = vmax.f32 %v4167_v35, 0.0  ;;  %v4408_v47 = vmax.f32 %v4210_v46, 0.0  ;;  %7038 = vmatprep.subr.bf16.mxu1 %v7422_v30  ;;  %7060 = vmatprep.subr.bf16.mxu0 %v7423_v31  ;;  %v3678_v4 = vrot.slane %v8475_v16, %v8489_v26  ;;  %v3686_v5 = vrot.slane %v8475_v16, %v8492_v27  ;;  %v7437_v8 = vld [vmem:[%s7750_s19 + $0x1b0] sm:$0xff]   ;;  %v7440_v29 = vld [vmem:[%s7750_s19 + $0x138] sm:$0xff]  }
 0x9d3   : > { %v4407_v52 = vmax.f32 %v4169_v37, 0.0  ;;  %v4409_v24 = vmax.f32 %v4212_v38, 0.0  ;;  %v7441_v36 = vld [vmem:[%s7750_s19 + $0x1b8] sm:$0xff]  }
 0x9d4   : > { %v8527_v40 = vpack.c.bf16 %v4406_v45, %v4390_v43  ;;  %v8529_v53 = vpack.c.bf16 %v4408_v47, %v4392_v44  ;;  %v7442_v43 = vld [vmem:[%s7750_s19 + $0x240] sm:$0xff]  }
 0x9d5   : > { %v4423_v54 = vpack.c.bf16 %v4407_v52, %v4391_v49  ;;  %v4425_v57 = vpack.c.bf16 %v4409_v24, %v4393_v50  ;;  %7039 = vmatpush3.bf16.msra.mxu1 %v7424_v39  ;;  %7061 = vmatpush3.bf16.msra.mxu0 %v7425_v42  ;;  %v7443_v44 = vld [vmem:[%s7750_s19 + $0x2c0] sm:$0xff]  }
 0x9d6   : > { %7040 = vmatprep.subr.bf16.mxu1 %v7426_v48  ;;  %7062 = vmatprep.subr.bf16.mxu0 %v7427_v23 }
 0x9d7   : > { %5579 = vmatprep.mubr.bf16.mxu1 %v4423_v54  ;;  %5620 = vmatprep.mubr.bf16.mxu0 %v4425_v57  ;;  %v7444_v54 = vld [vmem:[%s7750_s19 + $0x200] sm:$0xff]  }
 0x9d8   : > { %v7445_v57 = vld [vmem:[%s7750_s19 + $0x280] sm:$0xff]  }
 0x9d9   : > { %7041 = vmatpush3.bf16.msra.mxu1 %v7428_v58  ;;  %7063 = vmatpush3.bf16.msra.mxu0 %v7429_v59  ;;  %v7446_v58 = vld [vmem:[%s7750_s19 + $0x248] sm:$0xff]  }
 0x9da   : > { %7042 = vmatprep.subr.bf16.mxu1 %v7430_v60  ;;  %7064 = vmatprep.subr.bf16.mxu0 %v7431_v21  ;;  %v7447_v59 = vld [vmem:[%s7750_s19 + $0x2c8] sm:$0xff]   ;;  %v3690_v21 = vrot.slane %v8475_v16, %v8503_v0 }
 0x9db   : > { %v7448_v60 = vld [vmem:[%s7750_s19 + $0x208] sm:$0xff]  }
 0x9dd   : > { %v4248_v6 = vpop.f32.mrb[36].mxu1  ;;  %v4291_v7 = vpop.f32.mrb[28].mxu0  ;;  %7043 = vmatpush3.bf16.msra.mxu1 %v7432_v51  ;;  %7065 = vmatpush3.bf16.msra.mxu0 %v7433_v55  ;;  %v7449_v51 = vld [vmem:[%s7750_s19 + $0x288] sm:$0xff]   ;;  %v7450_v55 = vld [vmem:[%s7750_s19 + $0x250] sm:$0xff]  }
 0x9de   : > { %v4249_v14 = vadd.f32 %v4248_v6, %v3674_v61  ;;  %v4292_v20 = vadd.f32 %v4291_v7, %v3682_v63  ;;  %v4250_v10 = vpop.f32.mrb[37].mxu1  ;;  %v4293_v11 = vpop.f32.mrb[29].mxu0  ;;  %7044 = vmatprep.subr.bf16.mxu1 %v7434_v62  ;;  %7066 = vmatprep.subr.bf16.mxu0 %v7435_v3  ;;  %v7452_v3 = vld [vmem:[%s7750_s19 + $0x210] sm:$0xff]  }
 0x9df   : > { %v4251_v41 = vadd.f32 %v4250_v10, %v3678_v4  ;;  %v4294_v28 = vadd.f32 %v4293_v11, %v3686_v5  ;;  %v4252_v30 = vpop.f32.mrb[38].mxu1  ;;  %v4295_v31 = vpop.f32.mrb[30].mxu0  ;;  %v7455_v11 = vld [vmem:[%s7750_s19 + $0x2d8] sm:$0xff]  }
 0x9e0   : > { %v4253_v32 = vadd.f32 %v4252_v30, %v3674_v61  ;;  %v4296_v33 = vadd.f32 %v4295_v31, %v3682_v63  ;;  %v4254_v34 = vpop.f32.mrb[39].mxu1  ;;  %v4297_v25 = vpop.f32.mrb[31].mxu0  ;;  %v4394_v37 = vmax.f32 %v4249_v14, 0.0  ;;  %v4396_v38 = vmax.f32 %v4292_v20, 0.0  ;;  %v7451_v61 = vld [vmem:[%s7750_s19 + $0x2d0] sm:$0xff]  }
 0x9e1   : > { %v4255_v35 = vadd.f32 %v4254_v34, %v3678_v4  ;;  %v4298_v46 = vadd.f32 %v4297_v25, %v3686_v5  ;;  %7045 = vmatpush3.bf16.msra.mxu1 %v7436_v19  ;;  %7067 = vmatpush3.bf16.msra.mxu0 %v7437_v8  ;;  %v4395_v45 = vmax.f32 %v4251_v41, 0.0  ;;  %v4397_v47 = vmax.f32 %v4294_v28, 0.0  ;;  %v7453_v19 = vld [vmem:[%s7750_s19 + $0x290] sm:$0xff]   ;;  %v7454_v8 = vld [vmem:[%s7750_s19 + $0x258] sm:$0xff]  }
 0x9e2   : > { %v4410_v39 = vmax.f32 %v4253_v32, 0.0  ;;  %v4412_v42 = vmax.f32 %v4296_v33, 0.0  ;;  %7046 = vmatprep.subr.bf16.mxu1 %v7438_v12  ;;  %7068 = vmatprep.subr.bf16.mxu0 %v7439_v13  ;;  %v7456_v32 = vld [vmem:[%s7750_s19 + $0x218] sm:$0xff]  }
 0x9e3   : > { %v4411_v48 = vmax.f32 %v4255_v35, 0.0  ;;  %v4413_v23 = vmax.f32 %v4298_v46, 0.0  ;;  %v7457_v46 = vld [vmem:[%s7750_s19 + $0x298] sm:$0xff]  }
 0x9e4   : > { %v8555_v49 = vpack.c.bf16 %v4410_v39, %v4394_v37  ;;  %v8557_v50 = vpack.c.bf16 %v4412_v42, %v4396_v38  ;;  %v7459_v39 = vld [vmem:[%s7750_s19 + $0x2e0] sm:$0xff]  }
 0x9e5   : > { %v4427_v52 = vpack.c.bf16 %v4411_v48, %v4395_v45  ;;  %v4429_v24 = vpack.c.bf16 %v4413_v23, %v4397_v47  ;;  %7047 = vmatpush3.bf16.msra.mxu1 %v7440_v29  ;;  %7069 = vmatpush3.bf16.msra.mxu0 %v7441_v36  ;;  %v7458_v29 = vld [vmem:[%s7750_s19 + $0x260] sm:$0xff]   ;;  %v7462_v23 = vld [vmem:[%s7750_s19 + $0x268] sm:$0xff]  }
 0x9e6   : > { %7076 = vmatprep.subr.bf16.mxu1 %v7442_v43  ;;  %7098 = vmatprep.subr.bf16.mxu0 %v7443_v44  ;;  %v7460_v47 = vld [vmem:[%s7750_s19 + $0x220] sm:$0xff]  }
 0x9e7   : > { %v7461_v48 = vld [vmem:[%s7750_s19 + $0x2a0] sm:$0xff]  }
 0x9e8   : > { %5580 = vmatmul.mubr.bf16.vlgmr.msra.gmra.mrb[48].mxu1 %v8527_v40  ;;  %5621 = vmatmul.mubr.bf16.vlgmr.msra.gmra.mrb[40].mxu0 %v8529_v53  ;;  %v3694_v40 = vrot.slane %v8475_v16, %v8506_v1  ;;  %v3702_v53 = vrot.slane %v8475_v16, %v8509_v2 }
 0x9e9   : > { %7077 = vmatpush3.bf16.msra.mxu1 %v7444_v54  ;;  %5661 = vmatprep.mubr.bf16.mxu1 %v4427_v52  ;;  %v7463_v52 = vld [vmem:[%s7750_s19 + $0x2e8] sm:$0xff]  }
 0x9ea   : > { %7099 = vmatpush3.bf16.msra.mxu0 %v7445_v57  ;;  %5702 = vmatprep.mubr.bf16.mxu0 %v4429_v24  ;;  %v7464_v24 = vld [vmem:[%s7750_s19 + $0x228] sm:$0xff]   ;;  %v7466_v57 = vld [vmem:[%s7750_s19 + $0x270] sm:$0xff]  }
 0x9eb   : > { %7078 = vmatprep.subr.bf16.mxu1 %v7446_v58  ;;  %7100 = vmatprep.subr.bf16.mxu0 %v7447_v59  ;;  %v7465_v54 = vld [vmem:[%s7750_s19 + $0x2a8] sm:$0xff]   ;;  %v7467_v58 = vld [vmem:[%s7750_s19 + $0x2f0] sm:$0xff]  }
 0x9ec   : > { %v7468_v59 = vld [vmem:[%s7750_s19 + $0x230] sm:$0xff]  }
 0x9ed   : > { %v4334_v63 = vpop.f32.mrb[40].mxu1  ;;  %v4377_v62 = vpop.f32.mrb[32].mxu0  ;;  %7079 = vmatpush3.bf16.msra.mxu1 %v7448_v60  ;;  %v7469_v60 = vld [vmem:[%s7750_s19 + $0x2b0] sm:$0xff]  }
 0x9ee   : > { %v4335_v4 = vadd.f32 %v4334_v63, %v3690_v21  ;;  %v4378_v5 = vadd.f32 %v4377_v62, %v8479_v22  ;;  %7101 = vmatpush3.bf16.msra.mxu0 %v7449_v51  ;;  %v4336_v6 = vpop.f32.mrb[41].mxu1  ;;  %v4379_v7 = vpop.f32.mrb[33].mxu0  ;;  %7080 = vmatprep.subr.bf16.mxu1 %v7450_v55  ;;  %v7471_v51 = vld [vmem:[%s7750_s19 + $0x2f8] sm:$0xff]   ;;  %v7476_v63 = vld [vmem:[%s7750_s19 + $0x300] sm:$0xff]  }
 0x9ef   : > { %v4337_v14 = vadd.f32 %v4336_v6, %v3694_v40  ;;  %v4380_v20 = vadd.f32 %v4379_v7, %v3702_v53  ;;  %v4338_v10 = vpop.f32.mrb[42].mxu1  ;;  %v4381_v16 = vpop.f32.mrb[34].mxu0  ;;  %7102 = vmatprep.subr.bf16.mxu0 %v7451_v61  ;;  %v7472_v55 = vld [vmem:[%s7750_s19 + $0x238] sm:$0xff]   ;;  %v7475_v61 = vld [vmem:[%s7750_s19 + $0x3c0] sm:$0xff]   ;;  %v7481_v6 = vld [vmem:[%s7750_s19 + $0x388] sm:$0xff]  }
 0x9f0   : > { %v4339_v12 = vadd.f32 %v4338_v10, %v3690_v21  ;;  %v4382_v13 = vadd.f32 %v4381_v16, %v8479_v22  ;;  %v4340_v41 = vpop.f32.mrb[43].mxu1  ;;  %v4383_v28 = vpop.f32.mrb[35].mxu0  ;;  %v4398_v33 = vmax.f32 %v4335_v4, 0.0  ;;  %v4400_v34 = vmax.f32 %v4378_v5, 0.0  ;;  %v7470_v21 = vld [vmem:[%s7750_s19 + $0x278] sm:$0xff]   ;;  %v7477_v62 = vld [vmem:[%s7750_s19 + $0x380] sm:$0xff]  }
 0x9f1   : > { %v4341_v30 = vadd.f32 %v4340_v41, %v3694_v40  ;;  %v4384_v31 = vadd.f32 %v4383_v28, %v3702_v53  ;;  %7081 = vmatpush3.bf16.msra.mxu1 %v7452_v3  ;;  %v4399_v36 = vmax.f32 %v4337_v14, 0.0  ;;  %v4401_v22 = vmax.f32 %v4380_v20, 0.0  ;;  %v7473_v40 = vld [vmem:[%s7750_s19 + $0x2b8] sm:$0xff]   ;;  %v7474_v53 = vld [vmem:[%s7750_s19 + $0x340] sm:$0xff]   ;;  %v7478_v3 = vld [vmem:[%s7750_s19 + $0x348] sm:$0xff]  }
 0x9f2   : > { %v4414_v25 = vmax.f32 %v4339_v12, 0.0  ;;  %v4416_v35 = vmax.f32 %v4382_v13, 0.0  ;;  %7103 = vmatpush3.bf16.msra.mxu0 %v7453_v19  ;;  %7082 = vmatprep.subr.bf16.mxu1 %v7454_v8  ;;  %v7479_v4 = vld [vmem:[%s7750_s19 + $0x3c8] sm:$0xff]   ;;  %v7482_v7 = vld [vmem:[%s7750_s19 + $0x350] sm:$0xff]   ;;  %v7486_v8 = vld [vmem:[%s7750_s19 + $0x358] sm:$0xff]  }
 0x9f3   : > { %v4415_v37 = vmax.f32 %v4341_v30, 0.0  ;;  %v4417_v38 = vmax.f32 %v4384_v31, 0.0  ;;  %7104 = vmatprep.subr.bf16.mxu0 %v7455_v11  ;;  %v7480_v5 = vld [vmem:[%s7750_s19 + $0x308] sm:$0xff]   ;;  %v7483_v19 = vld [vmem:[%s7750_s19 + $0x3d0] sm:$0xff]   ;;  %v7487_v14 = vld [vmem:[%s7750_s19 + $0x3d8] sm:$0xff]  }
 0x9f4   : > { %v8585_v42 = vpack.c.bf16 %v4414_v25, %v4398_v33  ;;  %v8587_v43 = vpack.c.bf16 %v4416_v35, %v4400_v34  ;;  %v7488_v20 = vld [vmem:[%s7750_s19 + $0x318] sm:$0xff]   ;;  %v7490_v16 = vld [vmem:[%s7750_s19 + $0x360] sm:$0xff]   ;;  %v7494_v41 = vld [vmem:[%s7750_s19 + $0x368] sm:$0xff]  }
 0x9f5   : > { %v4431_v44 = vpack.c.bf16 %v4415_v37, %v4399_v36  ;;  %v4433_v45 = vpack.c.bf16 %v4417_v38, %v4401_v22  ;;  %7083 = vmatpush3.bf16.msra.mxu1 %v7456_v32  ;;  %v7489_v10 = vld [vmem:[%s7750_s19 + $0x398] sm:$0xff]   ;;  %v7491_v11 = vld [vmem:[%s7750_s19 + $0x3e0] sm:$0xff]   ;;  %v7495_v28 = vld [vmem:[%s7750_s19 + $0x3e8] sm:$0xff]  }
 0x9f6   : > { %7105 = vmatpush3.bf16.msra.mxu0 %v7457_v46  ;;  %7084 = vmatprep.subr.bf16.mxu1 %v7458_v29  ;;  %v7492_v12 = vld [vmem:[%s7750_s19 + $0x320] sm:$0xff]   ;;  %v7496_v30 = vld [vmem:[%s7750_s19 + $0x328] sm:$0xff]   ;;  %v7498_v32 = vld [vmem:[%s7750_s19 + $0x370] sm:$0xff]  }
 0x9f7   : > { %7106 = vmatprep.subr.bf16.mxu0 %v7459_v39  ;;  %v7493_v13 = vld [vmem:[%s7750_s19 + $0x3a0] sm:$0xff]   ;;  %v7497_v31 = vld [vmem:[%s7750_s19 + $0x3a8] sm:$0xff]   ;;  %v7499_v33 = vld [vmem:[%s7750_s19 + $0x3f0] sm:$0xff]  }
 0x9f8   : > { %v7500_v34 = vld [vmem:[%s7750_s19 + $0x330] sm:$0xff]   ;;  %v7502_v35 = vld [vmem:[%s7750_s19 + $0x378] sm:$0xff]   ;;  %v6688_v38 = vld [vmem:[%s851_s25] ss:$0 sm:$0xff] }
 0x9f9   : > { %7085 = vmatpush3.bf16.msra.mxu1 %v7460_v47  ;;  %v7501_v25 = vld [vmem:[%s7750_s19 + $0x3b0] sm:$0xff]   ;;  %v7503_v46 = vld [vmem:[%s7750_s19 + $0x3f8] sm:$0xff]  }
 0x9fa   : > { %7107 = vmatpush3.bf16.msra.mxu0 %v7461_v48  ;;  %7086 = vmatprep.subr.bf16.mxu1 %v7462_v23  ;;  %v7504_v29 = vld [vmem:[%s7750_s19 + $0x338] sm:$0xff]  }
 0x9fb   : > { %7108 = vmatprep.subr.bf16.mxu0 %v7463_v52  ;;  %v7505_v36 = vld [vmem:[%s7750_s19 + $0x3b8] sm:$0xff]  }
 0x9fd   : > { %7087 = vmatpush3.bf16.msra.mxu1 %v7464_v24 }
 0x9fe   : > { %7109 = vmatpush3.bf16.msra.mxu0 %v7465_v54  ;;  %7088 = vmatprep.subr.bf16.mxu1 %v7466_v57 }
 0x9ff   : > { %7110 = vmatprep.subr.bf16.mxu0 %v7467_v58 }
 0xa01   : > { %7089 = vmatpush3.bf16.msra.mxu1 %v7468_v59 }
 0xa02   : > { %7111 = vmatpush3.bf16.msra.mxu0 %v7469_v60  ;;  %7090 = vmatprep.subr.bf16.mxu1 %v7470_v21 }
 0xa03   : > { %7112 = vmatprep.subr.bf16.mxu0 %v7471_v51 }
 0xa05   : > { %7091 = vmatpush3.bf16.msra.mxu1 %v7472_v55 }
 0xa06   : > { %7113 = vmatpush3.bf16.msra.mxu0 %v7473_v40  ;;  %7120 = vmatprep.subr.bf16.mxu1 %v7474_v53 }
 0xa07   : > { %7142 = vmatprep.subr.bf16.mxu0 %v7475_v61 }
 0xa08   : > { %5662 = vmatmul.mubr.bf16.vlgmr.msra.gmra.mrb[52].mxu1 %v8555_v49  ;;  %v7484_v49 = vld [vmem:[%s7750_s19 + $0x310] sm:$0xff]  }
 0xa09   : > { %5703 = vmatmul.mubr.bf16.vlgmr.msra.gmra.mrb[44].mxu0 %v8557_v50  ;;  %7121 = vmatpush3.bf16.msra.mxu1 %v7476_v63  ;;  %v7485_v50 = vld [vmem:[%s7750_s19 + $0x390] sm:$0xff]  }
 0xa0a   : > { %5743 = vmatprep.mubr.bf16.mxu1 %v4431_v44  ;;  %7143 = vmatpush3.bf16.msra.mxu0 %v7477_v62 }
 0xa0b   : > { %5784 = vmatprep.mubr.bf16.mxu0 %v4433_v45  ;;  %7122 = vmatprep.subr.bf16.mxu1 %v7478_v3 }
 0xa0c   : > { %7144 = vmatprep.subr.bf16.mxu0 %v7479_v4 }
 0xa0d   : > { %7123 = vmatpush3.bf16.msra.mxu1 %v7480_v5 }
 0xa0e   : > { %7145 = vmatpush3.bf16.msra.mxu0 %v7481_v6  ;;  %7124 = vmatprep.subr.bf16.mxu1 %v7482_v7 }
 0xa0f   : > { %7146 = vmatprep.subr.bf16.mxu0 %v7483_v19 }
 0xa11   : > { %7125 = vmatpush3.bf16.msra.mxu1 %v7484_v49 }
 0xa12   : > { %7147 = vmatpush3.bf16.msra.mxu0 %v7485_v50  ;;  %7126 = vmatprep.subr.bf16.mxu1 %v7486_v8 }
 0xa13   : > { %7148 = vmatprep.subr.bf16.mxu0 %v7487_v14 }
 0xa15   : > { %7127 = vmatpush3.bf16.msra.mxu1 %v7488_v20 }
 0xa16   : > { %7149 = vmatpush3.bf16.msra.mxu0 %v7489_v10  ;;  %7128 = vmatprep.subr.bf16.mxu1 %v7490_v16 }
 0xa17   : > { %7150 = vmatprep.subr.bf16.mxu0 %v7491_v11 }
 0xa19   : > { %7129 = vmatpush3.bf16.msra.mxu1 %v7492_v12 }
 0xa1a   : > { %7151 = vmatpush3.bf16.msra.mxu0 %v7493_v13  ;;  %7130 = vmatprep.subr.bf16.mxu1 %v7494_v41 }
 0xa1b   : > { %7152 = vmatprep.subr.bf16.mxu0 %v7495_v28 }
 0xa1d   : > { %7131 = vmatpush3.bf16.msra.mxu1 %v7496_v30 }
 0xa1e   : > { %7153 = vmatpush3.bf16.msra.mxu0 %v7497_v31  ;;  %7132 = vmatprep.subr.bf16.mxu1 %v7498_v32 }
 0xa1f   : > { %7154 = vmatprep.subr.bf16.mxu0 %v7499_v33 }
 0xa21   : > { %7133 = vmatpush3.bf16.msra.mxu1 %v7500_v34 }
 0xa22   : > { %7155 = vmatpush3.bf16.msra.mxu0 %v7501_v25  ;;  %7134 = vmatprep.subr.bf16.mxu1 %v7502_v35 }
 0xa23   : > { %7156 = vmatprep.subr.bf16.mxu0 %v7503_v46 }
 0xa25   : > { %7135 = vmatpush3.bf16.msra.mxu1 %v7504_v29 }
 0xa26   : > { %7157 = vmatpush3.bf16.msra.mxu0 %v7505_v36 }
 0xa28   : > { %5744 = vmatmul.mubr.bf16.vlgmr.msra.gmra.mrb[56].mxu1 %v8585_v42 }
 0xa29   : > { %5785 = vmatmul.mubr.bf16.vlgmr.msra.gmra.mrb[48].mxu0 %v8587_v43 }
 0xa9b   : > { %v7004_v22 = vpop.f32.mrb[44].mxu1  ;;  %v7026_v37 = vpop.f32.mrb[36].mxu0 }
 0xa9c   : > { %v7005_v39 = vpop.f32.mrb[45].mxu1  ;;  %v7027_v44 = vpop.f32.mrb[37].mxu0 }
 0xa9d   : > { %v7006_v45 = vadd.f32 %v7005_v39, %v7004_v22  ;;  %v7028_v47 = vadd.f32 %v7027_v44, %v7026_v37  ;;  %v7007_v48 = vpop.f32.mrb[46].mxu1  ;;  %v7029_v23 = vpop.f32.mrb[38].mxu0 }
 0xa9e   : > { %v7008_v52 = vpop.f32.mrb[47].mxu1  ;;  %v7030_v24 = vpop.f32.mrb[39].mxu0 }
 0xa9f   : > { %v5500_v54 = vadd.f32 %v7006_v45, %v6688_v38  ;;  %v7009_v57 = vadd.f32 %v7008_v52, %v7007_v48  ;;  %v7031_v42 = vadd.f32 %v7030_v24, %v7029_v23 }
 0xaa1   : > { %v5541_v58 = vadd.f32 %v7028_v47, %v5500_v54  ;;  %v5503_v43 = vadd.f32 %v7009_v57, %v6688_v38 }
 0xaa3   : > { %v5544_v59 = vadd.f32 %v7031_v42, %v5503_v43 }
 0xabb   : > { %v7048_v60 = vpop.f32.mrb[48].mxu1  ;;  %v7070_v21 = vpop.f32.mrb[40].mxu0 }
 0xabc   : > { %v7049_v51 = vpop.f32.mrb[49].mxu1  ;;  %v7071_v55 = vpop.f32.mrb[41].mxu0 }
 0xabd   : > { %v7050_v40 = vadd.f32 %v7049_v51, %v7048_v60  ;;  %v7072_v53 = vadd.f32 %v7071_v55, %v7070_v21  ;;  %v7051_v61 = vpop.f32.mrb[50].mxu1  ;;  %v7073_v63 = vpop.f32.mrb[42].mxu0 }
 0xabe   : > { %v7052_v62 = vpop.f32.mrb[51].mxu1  ;;  %v7074_v3 = vpop.f32.mrb[43].mxu0 }
 0xabf   : > { %v5582_v4 = vadd.f32 %v7050_v40, %v5541_v58  ;;  %v7053_v5 = vadd.f32 %v7052_v62, %v7051_v61  ;;  %v7075_v6 = vadd.f32 %v7074_v3, %v7073_v63 }
 0xac1   : > { %v5623_v7 = vadd.f32 %v7072_v53, %v5582_v4  ;;  %v5585_v19 = vadd.f32 %v7053_v5, %v5544_v59 }
 0xac3   : > { %v5626_v49 = vadd.f32 %v7075_v6, %v5585_v19 }
 0xadb   : > { %v7092_v50 = vpop.f32.mrb[52].mxu1 }
 0xadc   : > { %v7114_v8 = vpop.f32.mrb[44].mxu0  ;;  %v7093_v14 = vpop.f32.mrb[53].mxu1 }
 0xadd   : > { %v7094_v20 = vadd.f32 %v7093_v14, %v7092_v50  ;;  %v7115_v10 = vpop.f32.mrb[45].mxu0  ;;  %v7095_v16 = vpop.f32.mrb[54].mxu1  ;;  %v6818_v50 = vld [vmem:[%s8893_s5] ss:$0 sm:$0xff] }
 0xade   : > { %v7116_v11 = vadd.f32 %v7115_v10, %v7114_v8  ;;  %v7117_v12 = vpop.f32.mrb[46].mxu0  ;;  %v7096_v13 = vpop.f32.mrb[55].mxu1 }
 0xadf   : > { %v5664_v41 = vadd.f32 %v7094_v20, %v5623_v7  ;;  %v7097_v28 = vadd.f32 %v7096_v13, %v7095_v16  ;;  %v7118_v30 = vpop.f32.mrb[47].mxu0  ;;  %v6817_v7 = vld [vmem:[%s854_s3] ss:$0 sm:$0xff]  ;;  %v5847_v13 = vld [vmem:[%s8894_s0 + $0x8] sm:$0xff] (!%p6819_p5) }
 0xae0   : > { %v7119_v31 = vadd.f32 %v7118_v30, %v7117_v12  ;;  %v5850_v12 = vld [vmem:[%s8894_s0 + $0x20] sm:$0xff] (!%p6819_p5) }
 0xae1   : > { %v5705_v32 = vadd.f32 %v7116_v11, %v5664_v41  ;;  %v5667_v33 = vadd.f32 %v7097_v28, %v5626_v49  ;;  %v5846_v11 = vld [vmem:[%s8894_s0] sm:$0xff] (!%p6819_p5)  ;;  %v5851_v28 = vld [vmem:[%s8894_s0 + $0x28] sm:$0xff] (!%p6819_p5) }
 0xae2   : > { %v6821_v41 = vcombine.high (!%p6819_p5), %v5846_v11, %v5850_v12  ;;  %v6820_v30 = vcombine.low (!%p6819_p5), %v5846_v11, %v5850_v12  ;;  %v5872_v11 = vld [vmem:[%s8894_s0 + $0xd0] sm:$0xff] (!%p6819_p5) }
 0xae3   : > { %v5708_v34 = vadd.f32 %v7119_v31, %v5667_v33  ;;  %v5854_v31 = vld [vmem:[%s8894_s0 + $0x40] sm:$0xff] (!%p6819_p5)  ;;  %v7569_v33 = vmov (!%p6819_p5), 0   ;;  %v5876_v12 = vld [vmem:[%s8894_s0 + $0xf0] sm:$0xff] (!%p6819_p5) }
 0xae4   : > { %6115 = vmatprep.mubr.bf16.mxu0 (!%p6819_p5), %v7569_v33  ;;  %6158 = vmatprep.mubr.bf16.mxu1 (!%p6819_p5), %v7569_v33 }
 0xae5   : > { %6083 = vmatprep.subr.bf16.mxu0 (!%p6819_p5), %v6821_v41  ;;  %v5877_v41 = vld [vmem:[%s8894_s0 + $0xf8] sm:$0xff] (!%p6819_p5) }
 0xae6   : > { %6084 = vmatpush1.bf16.msra.mxu0 (!%p6819_p5), %v6820_v30 }
 0xafb   : > { %v7136_v25 = vpop.f32.mrb[56].mxu1 }
 0xafc   : > { %v7158_v35 = vpop.f32.mrb[48].mxu0  ;;  %v7137_v46 = vpop.f32.mrb[57].mxu1 }
 0xafd   : > { %v7138_v29 = vadd.f32 %v7137_v46, %v7136_v25  ;;  %v7159_v36 = vpop.f32.mrb[49].mxu0  ;;  %v7139_v22 = vpop.f32.mrb[58].mxu1  ;;  %v6822_v25 = vcombine.low (!%p6819_p5), %v5847_v13, %v5851_v28  ;;  %v5855_v46 = vld [vmem:[%s8894_s0 + $0x48] sm:$0xff] (!%p6819_p5) }
 0xafe   : > { %v7160_v37 = vadd.f32 %v7159_v36, %v7158_v35  ;;  %v7161_v38 = vpop.f32.mrb[50].mxu0  ;;  %v7140_v39 = vpop.f32.mrb[59].mxu1  ;;  %v5862_v36 = vld [vmem:[%s8894_s0 + $0x80] sm:$0xff] (!%p6819_p5) }
 0xaff   : > { %v5746_v44 = vadd.f32 %v7138_v29, %v5705_v32  ;;  %v7141_v45 = vadd.f32 %v7140_v39, %v7139_v22  ;;  %v7162_v47 = vpop.f32.mrb[51].mxu0  ;;  %v5858_v32 = vld [vmem:[%s8894_s0 + $0x60] sm:$0xff] (!%p6819_p5)  ;;  %v5859_v29 = vld [vmem:[%s8894_s0 + $0x68] sm:$0xff] (!%p6819_p5) }
 0xb00   : > { %v7163_v48 = vadd.f32 %v7162_v47, %v7161_v38  ;;  %v6829_v35 = vcombine.high (!%p6819_p5), %v5854_v31, %v5858_v32  ;;  %v6831_v22 = vcombine.high (!%p6819_p5), %v5855_v46, %v5859_v29  ;;  %v5863_v38 = vld [vmem:[%s8894_s0 + $0x88] sm:$0xff] (!%p6819_p5) }
 0xb01   : > { %v5787_v23 = vadd.f32 %v7160_v37, %v5746_v44  ;;  %v5749_v52 = vadd.f32 %v7141_v45, %v5708_v34  ;;  %v6823_v34 = vcombine.high (!%p6819_p5), %v5847_v13, %v5851_v28  ;;  %v5866_v37 = vld [vmem:[%s8894_s0 + $0xa0] sm:$0xff] (!%p6819_p5)  ;;  %v5867_v39 = vld [vmem:[%s8894_s0 + $0xa8] sm:$0xff] (!%p6819_p5)  ;;  %v6828_v44 = vcombine.low (!%p6819_p5), %v5854_v31, %v5858_v32  ;;  %v5873_v13 = vld [vmem:[%s8894_s0 + $0xd8] sm:$0xff] (!%p6819_p5) }
 0xb02   : > { %6085 = vmatprep.subr.bf16.mxu0 (!%p6819_p5), %v6829_v35  ;;  %v6830_v45 = vcombine.low (!%p6819_p5), %v5855_v46, %v5859_v29  ;;  %v6837_v47 = vcombine.high (!%p6819_p5), %v5862_v36, %v5866_v37  ;;  %v6849_v31 = vcombine.high (!%p6819_p5), %v5872_v11, %v5876_v12  ;;  %v6851_v32 = vcombine.high (!%p6819_p5), %v5873_v13, %v5877_v41 }
 0xb03   : > { %v5790_v24 = vadd.f32 %v7163_v48, %v5749_v52  ;;  %v5793_v54 = vadd.f32 %v5787_v23, %v8367_v17  ;;  %6126 = vmatprep.subr.bf16.mxu1 (!%p6819_p5), %v6823_v34  ;;  %v6839_v48 = vcombine.high (!%p6819_p5), %v5863_v38, %v5867_v39  ;;  %v5870_v23 = vld [vmem:[%s8894_s0 + $0xc0] sm:$0xff] (!%p6819_p5)  ;;  %6086 = vmatpush1.bf16.msra.mxu0 (!%p6819_p5), %v6828_v44 }
 0xb04   : > { %6127 = vmatpush1.bf16.msra.mxu1 (!%p6819_p5), %v6822_v25  ;;  %v5874_v52 = vld [vmem:[%s8894_s0 + $0xe0] sm:$0xff] (!%p6819_p5)  ;;  %6087 = vmatprep.subr.bf16.mxu0 (!%p6819_p5), %v6837_v47  ;;  %v6848_v34 = vcombine.low (!%p6819_p5), %v5872_v11, %v5876_v12  ;;  %v6850_v25 = vcombine.low (!%p6819_p5), %v5873_v13, %v5877_v41 }
 0xb05   : > { %v5797_v57 = vsel %vm1657_vm10, %v5793_v54, 0.0  ;;  %v5794_v42 = vadd.f32 %v5790_v24, %v8369_v18  ;;  %6128 = vmatprep.subr.bf16.mxu1 (!%p6819_p5), %v6831_v22  ;;  %v5871_v24 = vld [vmem:[%s8894_s0 + $0xc8] sm:$0xff] (!%p6819_p5) }
 0xb06   : > { %5798 = vadd.xlane.f32.xlu1 %v5797_v57  ;;  %v6836_v57 = vcombine.low (!%p6819_p5), %v5862_v36, %v5866_v37 }
 0xb07   : > { %v5800_v58 = vsel %vm1657_vm10, %v5794_v42, 0.0 }
 0xb08   : > { %5801 = vadd.xlane.f32.xlu0 %v5800_v58  ;;  %6129 = vmatpush1.bf16.msra.mxu1 (!%p6819_p5), %v6830_v45  ;;  %v6845_v58 = vcombine.high (!%p6819_p5), %v5870_v23, %v5874_v52 }
 0xb09   : > { %6130 = vmatprep.subr.bf16.mxu1 (!%p6819_p5), %v6839_v48  ;;  %6088 = vmatpush1.bf16.msra.mxu0 (!%p6819_p5), %v6836_v57 }
 0xb0a   : > { %6089 = vmatprep.subr.bf16.mxu0 (!%p6819_p5), %v6845_v58 }
 0xb93   : > { %v5799_v43 = vpop.xlane.xlu1 %5798 }
 0xb94   : > { %v5803_v59 = vmul.f32 0.015625, %v5799_v43 }
 0xb95   : > { %v5802_v60 = vpop.xlane.xlu0 %5801 }
 0xb96   : > { %v5805_v21 = vsub.f32 %v5793_v54, %v5803_v59  ;;  %v5804_v51 = vmul.f32 0.015625, %v5802_v60  ;;  %v5875_v54 = vld [vmem:[%s8894_s0 + $0xe8] sm:$0xff] (!%p6819_p5)  ;;  %v5848_v59 = vld [vmem:[%s8894_s0 + $0x10] sm:$0xff] (!%p6819_p5) }
 0xb97   : > { %v6847_v43 = vcombine.high (!%p6819_p5), %v5871_v24, %v5875_v54  ;;  %v5852_v60 = vld [vmem:[%s8894_s0 + $0x30] sm:$0xff] (!%p6819_p5) }
 0xb98   : > { %v5806_v55 = vsub.f32 %v5794_v42, %v5804_v51  ;;  %v5807_v40 = vmul.f32 %v5805_v21, %v5805_v21  ;;  %v6838_v42 = vcombine.low (!%p6819_p5), %v5863_v38, %v5867_v39  ;;  %v5853_v51 = vld [vmem:[%s8894_s0 + $0x38] sm:$0xff] (!%p6819_p5) }
 0xb9a   : > { %v5809_v53 = vsel %vm1657_vm10, %v5807_v40, 0.0  ;;  %v5808_v61 = vmul.f32 %v5806_v55, %v5806_v55  ;;  %6131 = vmatpush1.bf16.msra.mxu1 (!%p6819_p5), %v6838_v42  ;;  %v6846_v40 = vcombine.low (!%p6819_p5), %v5871_v24, %v5875_v54 }
 0xb9b   : > { %5810 = vadd.xlane.f32.xlu1 %v5809_v53  ;;  %v6825_v53 = vcombine.high (!%p6819_p5), %v5848_v59, %v5852_v60  ;;  %6132 = vmatprep.subr.bf16.mxu1 (!%p6819_p5), %v6847_v43 }
 0xb9c   : > { %v5812_v17 = vsel %vm1657_vm10, %v5808_v61, 0.0 }
 0xb9d   : > { %5813 = vadd.xlane.f32.xlu0 %v5812_v17  ;;  %v5856_v17 = vld [vmem:[%s8894_s0 + $0x50] sm:$0xff] (!%p6819_p5) }
 0xb9e   : > { %6133 = vmatpush1.bf16.msra.mxu1 (!%p6819_p5), %v6846_v40 }
 0xc28   : > { %v5811_v18 = vpop.xlane.xlu1 %5810 }
 0xc29   : > { %v5815_v63 = vmul.f32 0.015625, %v5811_v18  ;;  %v5860_v18 = vld [vmem:[%s8894_s0 + $0x70] sm:$0xff] (!%p6819_p5) }
 0xc2a   : > { %v5814_v62 = vpop.xlane.xlu0 %5813 }
 0xc2b   : > { %v5817_v3 = vadd.f32 1e-05, %v5815_v63  ;;  %v5816_v4 = vmul.f32 0.015625, %v5814_v62  ;;  %v5857_v62 = vld [vmem:[%s8894_s0 + $0x58] sm:$0xff] (!%p6819_p5) }
 0xc2d   : > { %7542 = vrsqrt.f32 %v5817_v3  ;;  %v5818_v5 = vadd.f32 1e-05, %v5816_v4  ;;  %v5861_v3 = vld [vmem:[%s8894_s0 + $0x78] sm:$0xff] (!%p6819_p5)  ;;  %v6824_v4 = vcombine.low (!%p6819_p5), %v5848_v59, %v5852_v60 }
 0xc2f   : > { %7544 = vrsqrt.f32 %v5818_v5 }
 0xc37   : > { %v7543_v6 = vpop.eup %7542 }
 0xc38   : > { %v5821_v19 = vmul.f32 %v7543_v6, %v5805_v21  ;;  %v5849_v21 = vld [vmem:[%s8894_s0 + $0x18] sm:$0xff] (!%p6819_p5)  ;;  %v6833_v6 = vcombine.high (!%p6819_p5), %v5856_v17, %v5860_v18 }
 0xc39   : > { %v7545_v49 = vpop.eup %7544  ;;  %v6827_v61 = vcombine.high (!%p6819_p5), %v5849_v21, %v5853_v51  ;;  %v6826_v5 = vcombine.low (!%p6819_p5), %v5849_v21, %v5853_v51 }
 0xc3a   : > { %v5829_v8 = vmul.f32 %v6817_v7, %v5821_v19  ;;  %v5822_v14 = vmul.f32 %v7545_v49, %v5806_v55  ;;  %5844 = sbr.rel (%p6819_p5) target bundleno = 3372 (0xd2c), region = 108  ;;  %v6844_v55 = vcombine.low (!%p6819_p5), %v5870_v23, %v5874_v52  ;;  %v5864_v19 = vld [vmem:[%s8894_s0 + $0x90] sm:$0xff] (!%p6819_p5) }
 0xc3b   : > { %6212 = vmatprep.subr.bf16.mxu1 (!%p6819_p5), %v6827_v61  ;;  %v5868_v49 = vld [vmem:[%s8894_s0 + $0xb0] sm:$0xff] (!%p6819_p5) }
 0xc3c   : > { %v8660_v20 = vadd.f32 %v6818_v50, %v5829_v8  ;;  %v5830_v10 = vmul.f32 %v6817_v7, %v5822_v14  ;;  %6090 = vmatpush1.bf16.msra.mxu0 (!%p6819_p5), %v6844_v55  ;;  %v6835_v7 = vcombine.high (!%p6819_p5), %v5857_v62, %v5861_v3  ;;  %v5869_v8 = vld [vmem:[%s8894_s0 + $0xb8] sm:$0xff] (!%p6819_p5)  ;;  %v6832_v14 = vcombine.low (!%p6819_p5), %v5856_v17, %v5860_v18 }
 0xc3d   : > { %6169 = vmatprep.subr.bf16.mxu0 (!%p6819_p5), %v6825_v53  ;;  %v6840_v28 = vcombine.low (!%p6819_p5), %v5864_v19, %v5868_v49 }
 0xc3e   : > { %5839 = vst.msk [vmem:[#allocation2] sm:$0xff] %vm1657_vm10, %v8660_v20  ;;  %v5838_v16 = vadd.f32 %v6818_v50, %v5830_v10  ;;  %v5865_v50 = vld [vmem:[%s8894_s0 + $0x98] sm:$0xff] (!%p6819_p5)  ;;  %v6841_v10 = vcombine.high (!%p6819_p5), %v5864_v19, %v5868_v49 }
 0xc3f   : > { %v6842_v30 = vcombine.low (!%p6819_p5), %v5865_v50, %v5869_v8 }
 0xc40   : > { %5840 = vst.msk [vmem:[#allocation2 + $0x8] sm:$0xff] %vm1657_vm10, %v5838_v16  ;;  %v5845_v63 = vpack.c.bf16 (!%p6819_p5), %v5838_v16, %v8660_v20  ;;  %v6834_v20 = vcombine.low (!%p6819_p5), %v5857_v62, %v5861_v3  ;;  %v6843_v16 = vcombine.high (!%p6819_p5), %v5865_v50, %v5869_v8 }
 0xc42   : > { %6852 = vmatmul.mubr.msk.bf16.vlgmr.msra.gmra.mrb[0].mxu0 %vm1657_vm10, %v5845_v63  ;;  %6853 = vmatmul.mubr.msk.bf16.vlgmr.msra.gmra.mrb[0].mxu1 %vm1657_vm10, %v5845_v63 }
 0xc43   : > { %6170 = vmatpush1.bf16.msra.mxu0 %v6824_v4  ;;  %6213 = vmatpush1.bf16.msra.mxu1 %v6826_v5 }
 0xc44   : > { %6171 = vmatprep.subr.bf16.mxu0 %v6833_v6  ;;  %6214 = vmatprep.subr.bf16.mxu1 %v6835_v7 }
 0xc45   : > { %6201 = vmatprep.mubr.bf16.mxu0 %v7569_v33  ;;  %6244 = vmatprep.mubr.bf16.mxu1 %v7569_v33  ;;  %v5878_v33 = vld [vmem:[%s8895_s27] sm:$0xff] }
 0xc46   : > { %v5883_v35 = vrot.slane %v5878_v33, %v8482_v56  ;;  %v5891_v46 = vrot.slane %v5878_v33, %v8485_v9  ;;  %v5887_v29 = vrot.slane %v5878_v33, %v8489_v26  ;;  %v5895_v36 = vrot.slane %v5878_v33, %v8492_v27 }
 0xc47   : > { %6172 = vmatpush1.bf16.msra.mxu0 %v6832_v14  ;;  %6215 = vmatpush1.bf16.msra.mxu1 %v6834_v20  ;;  %v5899_v57 = vrot.slane %v5878_v33, %v8503_v0  ;;  %v5907_v42 = vrot.slane %v5878_v33, %v8472_v15  ;;  %v5903_v58 = vrot.slane %v5878_v33, %v8506_v1 }
 0xc48   : > { %6173 = vmatprep.subr.bf16.mxu0 %v6841_v10  ;;  %6216 = vmatprep.subr.bf16.mxu1 %v6843_v16  ;;  %v5911_v43 = vrot.slane %v5878_v33, %v8509_v2 }
 0xc4b   : > { %6174 = vmatpush1.bf16.msra.mxu0 %v6840_v28  ;;  %6217 = vmatpush1.bf16.msra.mxu1 %v6842_v30 }
 0xc4c   : > { %6175 = vmatprep.subr.bf16.mxu0 %v6849_v31  ;;  %6218 = vmatprep.subr.bf16.mxu1 %v6851_v32 }
 0xc4f   : > { %6176 = vmatpush1.bf16.msra.mxu0 %v6848_v34  ;;  %6219 = vmatpush1.bf16.msra.mxu1 %v6850_v25 }
 0xc52   : > { %6854 = vmatmul.mubr.msk.bf16.vlgmr.msra.gmra.mrb[4].mxu0 %vm1657_vm10, %v5845_v63  ;;  %6855 = vmatmul.mubr.msk.bf16.vlgmr.msra.gmra.mrb[4].mxu1 %vm1657_vm10, %v5845_v63 }
 0xd15   : > { %v6117_v22 = vpop.f32.mrb[0].mxu0  ;;  %v6160_v38 = vpop.f32.mrb[0].mxu1 }
 0xd16   : > { %v6118_v37 = vadd.f32 %v6117_v22, %v5883_v35  ;;  %v6119_v39 = vpop.f32.mrb[1].mxu0  ;;  %v6161_v44 = vadd.f32 %v6160_v38, %v5891_v46  ;;  %v6162_v47 = vpop.f32.mrb[1].mxu1 }
 0xd17   : > { %v6120_v45 = vadd.f32 %v6119_v39, %v5887_v29  ;;  %v6121_v48 = vpop.f32.mrb[2].mxu0  ;;  %v6163_v23 = vadd.f32 %v6162_v47, %v5895_v36  ;;  %v6164_v52 = vpop.f32.mrb[2].mxu1 }
 0xd18   : > { %6255 = vst [vmem:[%s8896_s4] sm:$0xff] %v6118_v37  ;;  %v6122_v56 = vadd.f32 %v6121_v48, %v5883_v35  ;;  %v6123_v9 = vpop.f32.mrb[3].mxu0  ;;  %6257 = vst [vmem:[%s8896_s4 + $0x10] sm:$0xff] %v6161_v44  ;;  %v6165_v26 = vadd.f32 %v6164_v52, %v5891_v46  ;;  %v6166_v24 = vpop.f32.mrb[3].mxu1 }
 0xd19   : > { %6256 = vst [vmem:[%s8896_s4 + $0x8] sm:$0xff] %v6120_v45  ;;  %v6124_v27 = vadd.f32 %v6123_v9, %v5887_v29  ;;  %6258 = vst [vmem:[%s8896_s4 + $0x18] sm:$0xff] %v6163_v23  ;;  %v6167_v54 = vadd.f32 %v6166_v24, %v5895_v36 }
 0xd1a   : > { %6263 = vst [vmem:[%s8896_s4 + $0x40] sm:$0xff] %v6122_v56  ;;  %6265 = vst [vmem:[%s8896_s4 + $0x50] sm:$0xff] %v6165_v26 }
 0xd1b   : > { %6264 = vst [vmem:[%s8896_s4 + $0x48] sm:$0xff] %v6124_v27  ;;  %6266 = vst [vmem:[%s8896_s4 + $0x58] sm:$0xff] %v6167_v54 }
 0xd25   : > { %v6203_v59 = vpop.f32.mrb[4].mxu0  ;;  %v6246_v21 = vpop.f32.mrb[4].mxu1 }
 0xd26   : > { %v6204_v60 = vadd.f32 %v6203_v59, %v5899_v57  ;;  %v6205_v51 = vpop.f32.mrb[5].mxu0  ;;  %v6247_v55 = vadd.f32 %v6246_v21, %v5907_v42  ;;  %v6248_v53 = vpop.f32.mrb[5].mxu1 }
 0xd27   : > { %v6206_v40 = vadd.f32 %v6205_v51, %v5903_v58  ;;  %v6207_v61 = vpop.f32.mrb[6].mxu0  ;;  %v6249_v17 = vadd.f32 %v6248_v53, %v5911_v43  ;;  %v6250_v18 = vpop.f32.mrb[6].mxu1 }
 0xd28   : > { %6259 = vst [vmem:[%s8896_s4 + $0x20] sm:$0xff] %v6204_v60  ;;  %v6208_v0 = vadd.f32 %v6207_v61, %v5899_v57  ;;  %v6209_v15 = vpop.f32.mrb[7].mxu0  ;;  %6261 = vst [vmem:[%s8896_s4 + $0x30] sm:$0xff] %v6247_v55  ;;  %v6251_v1 = vadd.f32 %v6250_v18, %v5907_v42  ;;  %v6252_v63 = vpop.f32.mrb[7].mxu1 }
 0xd29   : > { %6260 = vst [vmem:[%s8896_s4 + $0x28] sm:$0xff] %v6206_v40  ;;  %v6210_v2 = vadd.f32 %v6209_v15, %v5903_v58  ;;  %6262 = vst [vmem:[%s8896_s4 + $0x38] sm:$0xff] %v6249_v17  ;;  %v6253_v62 = vadd.f32 %v6252_v63, %v5911_v43 }
 0xd2a   : > { %6267 = vst [vmem:[%s8896_s4 + $0x60] sm:$0xff] %v6208_v0  ;;  %6269 = vst [vmem:[%s8896_s4 + $0x70] sm:$0xff] %v6251_v1 }
 0xd2b   : > { %6268 = vst [vmem:[%s8896_s4 + $0x68] sm:$0xff] %v6210_v2  ;;  %6270 = vst [vmem:[%s8896_s4 + $0x78] sm:$0xff] %v6253_v62 }
 0xd2c PF: > { %s8897_s5 = sld [smem:[#allocation3_spill]] }
 0xd32   : > { %s30_s1 = sadd.s32 1, %s8897_s5  }
 0xd33   : > { %p27_p6 = scmp.ge.s32.totalorder %s30_s1, 4  }
 0xd35   :  { %29 = sbr.rel (!%p27_p6) target bundleno = 11 (0xb), region = 179 }

</bundles_post_ra>
